<compile_context>
chip_gen: v6e
topology: v6e:2x2x1
jax: 0.10.0
libtpu: 0.0.40
codegen_flags: <defaults>
</compile_context>

<pallas_src>
import jax
import jax.numpy as jnp
from jax.experimental import pallas as pl
from jax.experimental.pallas import tpu as pltpu


# ------------------------------ Pallas kernels -------------------------------

def _dense_kernel(a_ref, b_ref, o_ref):
    # (M, K) @ (K, N) -> (M, N); bf16 inputs, f32 accumulation.  Layer 1 (1x1 -> 4x4).
    o_ref[...] = jnp.dot(a_ref[...], b_ref[...],
                         preferred_element_type=jnp.float32).astype(o_ref.dtype)


def _convt_bn_kernel(scale_ref, shift_ref, b_ref, a_ref, o_ref, sum_ref, sq_ref):
    # Fused prologue: previous layer's BatchNorm scale/shift + ReLU, applied per patch
    # row (row k = tap*Cin + ci -> scale/shift tiled 4x over taps).  Padding positions
    # hold -shift/scale, so they map to exactly 0 here (ConvTranspose2d zero padding).
    a = a_ref[...].astype(jnp.float32)
    a = jnp.maximum(a * scale_ref[...] + shift_ref[...], 0.0)
    # Transposed matmul: y^T (Cout, tm) = W^T (Cout, K) @ a' (K, tm); bf16 MXU, f32 acc.
    y = jnp.dot(b_ref[...], a.astype(jnp.bfloat16), preferred_element_type=jnp.float32)
    o_ref[...] = y.astype(o_ref.dtype)

    # Per-sub-pixel BatchNorm statistics of THIS layer's output: resident accumulators
    # across the (sequential) m axis only, so the sub-pixel axis can be "parallel".
    @pl.when(pl.program_id(1) == 0)
    def _():
        sum_ref[...] = jnp.zeros_like(sum_ref)
        sq_ref[...] = jnp.zeros_like(sq_ref)

    sum_ref[...] += jnp.sum(y, axis=1, keepdims=True)
    sq_ref[...] += jnp.sum(y * y, axis=1, keepdims=True)


def _convt_tanh_kernel(scale_ref, shift_ref, b_ref, a_ref, o_ref):
    # Last layer: fused prev-BN+ReLU prologue, matmul, tanh epilogue (no BatchNorm).
    a = a_ref[...].astype(jnp.float32)
    a = jnp.maximum(a * scale_ref[...] + shift_ref[...], 0.0)
    y = jnp.dot(b_ref[...], a.astype(jnp.bfloat16), preferred_element_type=jnp.float32)
    o_ref[...] = jnp.tanh(y).astype(o_ref.dtype)


# ------------------------------ tiling helpers --------------------------------

def _round_up(x, m):
    return ((x + m - 1) // m) * m


def _tile_and_pad(m, k, cout, out_itemsize=2, budget=12 * 1024 * 1024):
    """Pick a lane-dense (multiple-of-128) m tile whose double-buffered a/y blocks plus
    the weight block fit a conservative scoped-VMEM budget (v5e default 16 MiB, v6e/v7x
    32 MiB), and the padded M (multiple of the tile)."""
    m_pad = _round_up(max(m, 128), 128)
    tm = 128
    for cand in (2048, 1024, 512, 256, 128):
        need = (2 * k * cand * 2                      # a block (bf16), double-buffered
                + 2 * cout * cand * out_itemsize      # y block, double-buffered
                + 2 * cout * k * 2                    # weight block (bf16), double-buffered
                + 8 * (k + cout) * 4)                 # scale/shift/stats blocks (f32)
        if need <= budget:
            tm = cand
            break
    tm = min(tm, m_pad)
    m_pad = _round_up(m_pad, tm)
    return tm, m_pad


def _a_spec(k, tm, n_m_tiles):
    """Patch-tensor BlockSpec; deepen pipelining on small-K streaming layers."""
    idx = lambda s, m: (s, 0, m)
    if k <= 512 and n_m_tiles >= 3:
        return pl.BlockSpec((None, k, tm), idx, pipeline_mode=pl.Buffered(3))
    return pl.BlockSpec((None, k, tm), idx)


# ------------------------------ wrappers --------------------------------------

def pallas_dense(a, b, out_dtype=jnp.float32):
    """Single-block matmul a (M, K) @ b (K, N) -> (M, N) for the 1x1 -> 4x4 first layer."""
    m = a.shape[0]
    n = b.shape[1]
    return pl.pallas_call(
        _dense_kernel,
        out_shape=jax.ShapeDtypeStruct((m, n), out_dtype),
    )(a, b)


def pallas_subpixel_conv_bn(scale_k, shift_k, b_t, a_t, tm, out_dtype=jnp.bfloat16):
    """Per sub-pixel s: y^T[s] = W^T[s] @ relu(scale*a^T[s] + shift), plus fused
    per-sub-pixel per-channel sum / sumsq (reduced over s by the caller).

    scale_k/shift_k: (K, 1) f32; b_t: (S, Cout, K) bf16; a_t: (S, K, M) bf16
    -> ((S, Cout, M) out_dtype, (S, Cout, 1) f32, (S, Cout, 1) f32)."""
    S, Cout, K = b_t.shape
    M = a_t.shape[2]
    n_m = M // tm
    return pl.pallas_call(
        _convt_bn_kernel,
        out_shape=(jax.ShapeDtypeStruct((S, Cout, M), out_dtype),
                   jax.ShapeDtypeStruct((S, Cout, 1), jnp.float32),
                   jax.ShapeDtypeStruct((S, Cout, 1), jnp.float32)),
        grid=(S, n_m),
        in_specs=[pl.BlockSpec((K, 1), lambda s, m: (0, 0)),
                  pl.BlockSpec((K, 1), lambda s, m: (0, 0)),
                  pl.BlockSpec((None, Cout, K), lambda s, m: (s, 0, 0)),
                  _a_spec(K, tm, n_m)],
        out_specs=(pl.BlockSpec((None, Cout, tm), lambda s, m: (s, 0, m)),
                   pl.BlockSpec((None, Cout, 1), lambda s, m: (s, 0, 0)),
                   pl.BlockSpec((None, Cout, 1), lambda s, m: (s, 0, 0))),
        compiler_params=pltpu.CompilerParams(
            # s: independent sub-pixels (sharded across TensorCores on v7x);
            # m: sequential so the per-s stats blocks stay resident accumulators.
            dimension_semantics=("parallel", "arbitrary")),
    )(scale_k, shift_k, b_t, a_t)


def pallas_subpixel_conv_tanh(scale_k, shift_k, b_t, a_t, tm, out_dtype=jnp.float32):
    """Final-layer sub-pixel conv: fused prev-BN+ReLU prologue and tanh epilogue."""
    S, Cout, K = b_t.shape
    M = a_t.shape[2]
    n_m = M // tm
    return pl.pallas_call(
        _convt_tanh_kernel,
        out_shape=jax.ShapeDtypeStruct((S, Cout, M), out_dtype),
        grid=(S, n_m),
        in_specs=[pl.BlockSpec((K, 1), lambda s, m: (0, 0)),
                  pl.BlockSpec((K, 1), lambda s, m: (0, 0)),
                  pl.BlockSpec((None, Cout, K), lambda s, m: (s, 0, 0)),
                  _a_spec(K, tm, n_m)],
        out_specs=pl.BlockSpec((None, Cout, tm), lambda s, m: (s, 0, m)),
        compiler_params=pltpu.CompilerParams(
            dimension_semantics=("parallel", "parallel")),
    )(scale_k, shift_k, b_t, a_t)


# --------------------- sub-pixel ConvTranspose helpers (XLA side) ------------------

def _subpixel_im2col(x, pad_c, m_pad):
    """x: (N, H, W, C) PRE-BatchNorm activation; pad_c: (C,) per-channel value that the
    fused BN+ReLU prologue maps to exactly 0 (= -shift/scale).
    Returns (4, 4*C, m_pad).  Sub-pixel s = di*2+dj, row k = (dh*2+dw)*C + ci."""
    N, H, W, C = x.shape
    M = N * H * W
    pv = pad_c.astype(x.dtype)
    row = jnp.broadcast_to(pv, (N, H, 1, C))
    xp = jnp.concatenate([row, x, row], axis=2)                       # pad W
    col = jnp.broadcast_to(pv, (N, 1, W + 2, C))
    xp = jnp.concatenate([col, xp, col], axis=1)                      # pad H
    subs = []
    for di in range(2):
        for dj in range(2):
            taps = [xp[:, di + dh:di + dh + H, dj + dw:dj + dw + W, :]
                    for dh in range(2) for dw in range(2)]            # each (N,H,W,C)
            a_s = jnp.stack(taps, axis=0)                             # (4, N, H, W, C)
            a_s = a_s.transpose(0, 4, 1, 2, 3).reshape(4 * C, M)
            subs.append(a_s)
    a_t = jnp.stack(subs, axis=0)                                     # (4, 4C, M)
    if m_pad > M:                                                     # lane-dense padding
        fill = jnp.broadcast_to(jnp.tile(pv, 4).reshape(1, 4 * C, 1),
                                (4, 4 * C, m_pad - M))
        a_t = jnp.concatenate([a_t, fill], axis=2)
    return a_t


def _subpixel_weights(w):
    """w: (Cin, Cout, 4, 4) PyTorch ConvTranspose2d layout -> (4, Cout, 4*Cin) bf16."""
    Cin, Cout = w.shape[0], w.shape[1]
    subs = []
    for di in range(2):
        for dj in range(2):
            taps = [w[:, :, 3 - di - 2 * dh, 3 - dj - 2 * dw]
                    for dh in range(2) for dw in range(2)]            # each (Cin, Cout)
            b_s = jnp.stack(taps, axis=0).reshape(4 * Cin, Cout)      # k = tap*Cin + ci
            subs.append(b_s.T)                                        # (Cout, 4*Cin)
    return jnp.stack(subs, axis=0).astype(jnp.bfloat16)


def _subpixel_to_nhwc(y_t, N, H, W):
    """y_t: (4, Cout, N*H*W) with s = di*2+dj -> (N, 2H, 2W, Cout)."""
    Cout = y_t.shape[1]
    y = y_t.reshape(2, 2, Cout, N, H, W)
    y = y.transpose(3, 4, 0, 5, 1, 2)                                 # (N, H, di, W, dj, C)
    return y.reshape(N, 2 * H, 2 * W, Cout)


def _bn_scale_shift(ssum, ssq, count, gamma, beta, eps=1e-5):
    mean = ssum.reshape(-1) / count
    var = jnp.maximum(ssq.reshape(-1) / count - mean * mean, 0.0)      # biased, like PyTorch BN
    scale = gamma / jnp.sqrt(var + eps)
    shift = beta - mean * scale
    return (scale.reshape(-1, 1).astype(jnp.float32),
            shift.reshape(-1, 1).astype(jnp.float32))


def _bn_pad_value(scale, shift):
    """Per-channel value that max(scale*p + shift, 0) maps to 0 (used as conv padding)."""
    s = jnp.where(scale == 0.0, 1.0, scale)
    return (-shift / s).reshape(-1)


def _fused_layer_inputs(x, scale, shift, w, out_itemsize):
    """Patch tensor (BN-neutral padding), per-row scale/shift, sub-pixel weights and the
    m tiling for one stride-2 ConvT layer whose prologue applies the previous BN+ReLU."""
    n, h, wd, cin = x.shape
    cout = w.shape[1]
    m = n * h * wd
    tm, m_pad = _tile_and_pad(m, 4 * cin, cout, out_itemsize)
    a_t = _subpixel_im2col(x, _bn_pad_value(scale, shift), m_pad)     # (4, 4*cin, m_pad)
    b_t = _subpixel_weights(w)                                        # (4, cout, 4*cin)
    scale_k = jnp.tile(scale.reshape(-1), 4).reshape(-1, 1)           # row k = tap*cin+ci
    shift_k = jnp.tile(shift.reshape(-1), 4).reshape(-1, 1)
    return a_t, b_t, scale_k, shift_k, tm, m


# ------------------------------ Generator ------------------------------------

def init_generator_params(key, z_dim, ngf):
    """DCGAN-style init: ConvT weights ~ 0.02*N(0,1), BN gamma=1, beta=0."""
    chans = [z_dim, ngf * 8, ngf * 4, ngf * 2, ngf, 3]
    params = []
    for i in range(5):
        key, sub = jax.random.split(key)
        w = 0.02 * jax.random.normal(sub, (chans[i], chans[i + 1], 4, 4), jnp.float32)
        if i < 4:
            params.append((w, jnp.ones((chans[i + 1],), jnp.float32),
                              jnp.zeros((chans[i + 1],), jnp.float32)))
        else:
            params.append((w,))
    return params


def generator_forward(z, params, eps=1e-5):
    """z: (N, z_dim, 1, 1) -> (N, 3, 64, 64), NCHW like the PyTorch module.
    BatchNorm uses per-batch statistics (training-mode BN of a fresh module)."""
    N = z.shape[0]

    # ---- layer 1: ConvTranspose2d(z_dim, ngf*8, 4, 1, 0): 1x1 -> 4x4 (one matmul) ----
    w1, g1, b1 = params[0]
    c1 = w1.shape[1]
    y1 = pallas_dense(z.reshape(N, -1).astype(jnp.bfloat16),
                      w1.reshape(w1.shape[0], c1 * 16).astype(jnp.bfloat16))   # (N, c1*16) f32
    y1c = y1.reshape(N, c1, 16)
    scale, shift = _bn_scale_shift(jnp.sum(y1c, axis=(0, 2)),
                                   jnp.sum(y1c * y1c, axis=(0, 2)),
                                   float(N * 16), g1, b1, eps)
    # keep the PRE-BatchNorm activation; BN+ReLU runs inside the next conv's prologue.
    x = y1c.transpose(0, 2, 1).reshape(N, 4, 4, c1).astype(jnp.bfloat16)       # NHWC

    # ---- layers 2-4: stride-2 ConvT with fused prev-BN+ReLU prologue + fused stats ----
    for i in (1, 2, 3):
        w, gamma, beta = params[i]
        n, h, wd, _ = x.shape
        a_t, b_t, scale_k, shift_k, tm, m = _fused_layer_inputs(x, scale, shift, w, 2)
        y_t, ssum, ssq = pallas_subpixel_conv_bn(scale_k, shift_k, b_t, a_t, tm)
        scale, shift = _bn_scale_shift(jnp.sum(ssum, axis=0), jnp.sum(ssq, axis=0),
                                       float(4 * m), gamma, beta, eps)
        x = _subpixel_to_nhwc(y_t[:, :, :m], n, h, wd)      # pre-BN (N, 2h, 2wd, Cout) bf16

    # ---- layer 5: stride-2 ConvT, fused prev-BN+ReLU prologue + tanh epilogue ---------
    (w5,) = params[4]
    n, h, wd, _ = x.shape
    a_t, b_t, scale_k, shift_k, tm, m = _fused_layer_inputs(x, scale, shift, w5, 4)
    y_t = pallas_subpixel_conv_tanh(scale_k, shift_k, b_t, a_t, tm)     # (4, 3, m_pad) f32
    out = _subpixel_to_nhwc(y_t[:, :, :m], n, h, wd)                    # (N, 64, 64, 3)
    return out.transpose(0, 3, 1, 2)                                    # NCHW


if __name__ == "__main__":
    z_dim, ngf, batch = 16, 8, 2
    key = jax.random.PRNGKey(0)
    pkey, zkey = jax.random.split(key)
    params = init_generator_params(pkey, z_dim, ngf)
    z = jax.random.normal(zkey, (batch, z_dim, 1, 1), jnp.float32)

    fwd = jax.jit(generator_forward)
    out = jax.block_until_ready(fwd(z, params))

    assert out.shape == (batch, 3, 64, 64), out.shape
    assert out.dtype == jnp.float32
    assert bool(jnp.all(jnp.isfinite(out)))
    assert bool(jnp.all(jnp.abs(out) <= 1.0))   # tanh range
    print("KERNEL_OK")
</pallas_src>

<mosaic_0001>
module attributes {stable_mosaic.version = 11 : i64} {
  func.func @_dense_kernel(%arg0: memref<2x16xbf16, #tpu.memory_space<vmem>>, %arg1: memref<16x1024xbf16, #tpu.memory_space<vmem>>, %arg2: memref<2x1024xf32, #tpu.memory_space<vmem>>) attributes {dimension_semantics = [], scalar_prefetch = 0 : i64, scratch_operands = 0 : i64, tpu.core_type = #tpu.core_type<tc>} {
    %c0 = arith.constant 0 : index
    %c0_0 = arith.constant 0 : index
    %0 = vector.load %arg0[%c0, %c0_0] : memref<2x16xbf16, #tpu.memory_space<vmem>>, vector<2x16xbf16>
    %c0_1 = arith.constant 0 : index
    %c0_2 = arith.constant 0 : index
    %1 = vector.load %arg1[%c0_1, %c0_2] : memref<16x1024xbf16, #tpu.memory_space<vmem>>, vector<16x1024xbf16>
    %cst = arith.constant dense<0.000000e+00> : vector<2x1024xf32>
    %2 = tpu.matmul %0, %1, %cst {dimension_numbers = #tpu.dot_dimension_numbers<[1], [0], [0], [1], [0, 0, 1, 1], [], []>} : vector<2x16xbf16>, vector<16x1024xbf16>, vector<2x1024xf32> -> vector<2x1024xf32>
    %c0_3 = arith.constant 0 : index
    %c0_4 = arith.constant 0 : index
    %3 = vector.load %arg2[%c0_3, %c0_4] : memref<2x1024xf32, #tpu.memory_space<vmem>>, vector<2x1024xf32>
    tpu.vector_store %arg2[%c0_3, %c0_4], %2 {strides = array<i32>} : memref<2x1024xf32, #tpu.memory_space<vmem>>, vector<2x1024xf32>,
    return
  }
}

module attributes {stable_mosaic.version = 11 : i64} {
  func.func @_convt_bn_kernel(%arg0: i32, %arg1: i32, %arg2: memref<256x1xf32, #tpu.memory_space<vmem>>, %arg3: memref<256x1xf32, #tpu.memory_space<vmem>>, %arg4: memref<1x32x256xbf16, #tpu.memory_space<vmem>>, %arg5: memref<1x256x128xbf16, #tpu.memory_space<vmem>>, %arg6: memref<1x32x128xbf16, #tpu.memory_space<vmem>>, %arg7: memref<1x32x1xf32, #tpu.memory_space<vmem>>, %arg8: memref<1x32x1xf32, #tpu.memory_space<vmem>>) attributes {dimension_semantics = [#tpu.dimension_semantics<parallel>, #tpu.dimension_semantics<arbitrary>], iteration_bounds = array<i64: 4, 1>, scalar_prefetch = 0 : i64, scratch_operands = 0 : i64, tpu.core_type = #tpu.core_type<tc>, window_params = [{pipeline_mode = #tpu.pipeline_mode<synchronous>, transform_indices = @transform_0, window_bounds = array<i64: 256, 1>}, {pipeline_mode = #tpu.pipeline_mode<synchronous>, transform_indices = @transform_1, window_bounds = array<i64: 256, 1>}, {transform_indices = @transform_2, window_bounds = array<i64: 1, 32, 256>}, {transform_indices = @transform_3, window_bounds = array<i64: 1, 256, 128>}, {transform_indices = @transform_4, window_bounds = array<i64: 1, 32, 128>}, {transform_indices = @transform_5, window_bounds = array<i64: 1, 32, 1>}, {transform_indices = @transform_6, window_bounds = array<i64: 1, 32, 1>}]} {
    %c0 = arith.constant 0 : index
    %c0_0 = arith.constant 0 : index
    %c0_1 = arith.constant 0 : index
    %0 = vector.load %arg5[%c0, %c0_0, %c0_1] : memref<1x256x128xbf16, #tpu.memory_space<vmem>>, vector<1x256x128xbf16>
    %1 = vector.shape_cast %0 : vector<1x256x128xbf16> to vector<256x128xbf16>
    %2 = arith.extf %1 : vector<256x128xbf16> to vector<256x128xf32>
    %c0_2 = arith.constant 0 : index
    %c0_3 = arith.constant 0 : index
    %3 = vector.load %arg2[%c0_2, %c0_3] : memref<256x1xf32, #tpu.memory_space<vmem>>, vector<256x1xf32>
    %4 = vector.broadcast %3 : vector<256x1xf32> to vector<256x128xf32>
    %5 = arith.mulf %2, %4 : vector<256x128xf32>
    %c0_4 = arith.constant 0 : index
    %c0_5 = arith.constant 0 : index
    %6 = vector.load %arg3[%c0_4, %c0_5] : memref<256x1xf32, #tpu.memory_space<vmem>>, vector<256x1xf32>
    %7 = vector.broadcast %6 : vector<256x1xf32> to vector<256x128xf32>
    %8 = arith.addf %5, %7 : vector<256x128xf32>
    %cst = arith.constant 0.000000e+00 : f32
    %9 = vector.broadcast %cst : f32 to vector<256x128xf32>
    %10 = arith.maximumf %8, %9 : vector<256x128xf32>
    %c0_6 = arith.constant 0 : index
    %c0_7 = arith.constant 0 : index
    %c0_8 = arith.constant 0 : index
    %11 = vector.load %arg4[%c0_6, %c0_7, %c0_8] : memref<1x32x256xbf16, #tpu.memory_space<vmem>>, vector<1x32x256xbf16>
    %12 = vector.shape_cast %11 : vector<1x32x256xbf16> to vector<32x256xbf16>
    %13 = arith.truncf %10 : vector<256x128xf32> to vector<256x128xbf16>
    %cst_9 = arith.constant dense<0.000000e+00> : vector<32x128xf32>
    %14 = tpu.matmul %12, %13, %cst_9 {dimension_numbers = #tpu.dot_dimension_numbers<[1], [0], [0], [1], [0, 0, 1, 1], [], []>} : vector<32x256xbf16>, vector<256x128xbf16>, vector<32x128xf32> -> vector<32x128xf32>
    %15 = arith.truncf %14 : vector<32x128xf32> to vector<32x128xbf16>
    %c0_10 = arith.constant 0 : index
    %c0_11 = arith.constant 0 : index
    %c0_12 = arith.constant 0 : index
    %16 = vector.load %arg6[%c0_10, %c0_11, %c0_12] : memref<1x32x128xbf16, #tpu.memory_space<vmem>>, vector<1x32x128xbf16>
    %17 = vector.shape_cast %16 : vector<1x32x128xbf16> to vector<32x128xbf16>
    %18 = vector.shape_cast %15 : vector<32x128xbf16> to vector<1x32x128xbf16>
    tpu.vector_store %arg6[%c0_10, %c0_11, %c0_12], %18 {strides = array<i32>} : memref<1x32x128xbf16, #tpu.memory_space<vmem>>, vector<1x32x128xbf16>,
    %c0_i32 = arith.constant 0 : i32
    %19 = arith.cmpi eq, %arg1, %c0_i32 : i32
    %20 = arith.extui %19 : i1 to i32
    %c0_i32_13 = arith.constant 0 : i32
    %21 = arith.cmpi ne, %20, %c0_i32_13 : i32
    scf.if %21 {
      %cst_28 = arith.constant 0.000000e+00 : f32
      %39 = vector.broadcast %cst_28 : f32 to vector<32x1xf32>
      %c0_29 = arith.constant 0 : index
      %c0_30 = arith.constant 0 : index
      %c0_31 = arith.constant 0 : index
      %40 = vector.load %arg7[%c0_29, %c0_30, %c0_31] : memref<1x32x1xf32, #tpu.memory_space<vmem>>, vector<1x32x1xf32>
      %41 = vector.shape_cast %40 : vector<1x32x1xf32> to vector<32x1xf32>
      %42 = vector.shape_cast %39 : vector<32x1xf32> to vector<1x32x1xf32>
      tpu.vector_store %arg7[%c0_29, %c0_30, %c0_31], %42 {strides = array<i32>} : memref<1x32x1xf32, #tpu.memory_space<vmem>>, vector<1x32x1xf32>,
      %cst_32 = arith.constant 0.000000e+00 : f32
      %43 = vector.broadcast %cst_32 : f32 to vector<32x1xf32>
      %c0_33 = arith.constant 0 : index
      %c0_34 = arith.constant 0 : index
      %c0_35 = arith.constant 0 : index
      %44 = vector.load %arg8[%c0_33, %c0_34, %c0_35] : memref<1x32x1xf32, #tpu.memory_space<vmem>>, vector<1x32x1xf32>
      %45 = vector.shape_cast %44 : vector<1x32x1xf32> to vector<32x1xf32>
      %46 = vector.shape_cast %43 : vector<32x1xf32> to vector<1x32x1xf32>
      tpu.vector_store %arg8[%c0_33, %c0_34, %c0_35], %46 {strides = array<i32>} : memref<1x32x1xf32, #tpu.memory_space<vmem>>, vector<1x32x1xf32>,
    } else {
    }
    %c0_14 = arith.constant 0 : index
    %c0_15 = arith.constant 0 : index
    %c0_16 = arith.constant 0 : index
    %22 = vector.load %arg7[%c0_14, %c0_15, %c0_16] : memref<1x32x1xf32, #tpu.memory_space<vmem>>, vector<1x32x1xf32>
    %23 = vector.shape_cast %22 : vector<1x32x1xf32> to vector<32x1xf32>
    %cst_17 = arith.constant dense<0.000000e+00> : vector<32xf32>
    %24 = vector.multi_reduction <add>, %14, %cst_17 [1] : vector<32x128xf32> to vector<32xf32>
    %25 = vector.shape_cast %24 : vector<32xf32> to vector<32x1xf32>
    %26 = arith.addf %23, %25 : vector<32x1xf32>
    %c0_18 = arith.constant 0 : index
    %c0_19 = arith.constant 0 : index
    %c0_20 = arith.constant 0 : index
    %27 = vector.load %arg7[%c0_18, %c0_19, %c0_20] : memref<1x32x1xf32, #tpu.memory_space<vmem>>, vector<1x32x1xf32>
    %28 = vector.shape_cast %27 : vector<1x32x1xf32> to vector<32x1xf32>
    %29 = vector.shape_cast %26 : vector<32x1xf32> to vector<1x32x1xf32>
    tpu.vector_store %arg7[%c0_18, %c0_19, %c0_20], %29 {strides = array<i32>} : memref<1x32x1xf32, #tpu.memory_space<vmem>>, vector<1x32x1xf32>,
    %c0_21 = arith.constant 0 : index
    %c0_22 = arith.constant 0 : index
    %c0_23 = arith.constant 0 : index
    %30 = vector.load %arg8[%c0_21, %c0_22, %c0_23] : memref<1x32x1xf32, #tpu.memory_space<vmem>>, vector<1x32x1xf32>
    %31 = vector.shape_cast %30 : vector<1x32x1xf32> to vector<32x1xf32>
    %32 = arith.mulf %14, %14 : vector<32x128xf32>
    %cst_24 = arith.constant dense<0.000000e+00> : vector<32xf32>
    %33 = vector.multi_reduction <add>, %32, %cst_24 [1] : vector<32x128xf32> to vector<32xf32>
    %34 = vector.shape_cast %33 : vector<32xf32> to vector<32x1xf32>
    %35 = arith.addf %31, %34 : vector<32x1xf32>
    %c0_25 = arith.constant 0 : index
    %c0_26 = arith.constant 0 : index
    %c0_27 = arith.constant 0 : index
    %36 = vector.load %arg8[%c0_25, %c0_26, %c0_27] : memref<1x32x1xf32, #tpu.memory_space<vmem>>, vector<1x32x1xf32>
    %37 = vector.shape_cast %36 : vector<1x32x1xf32> to vector<32x1xf32>
    %38 = vector.shape_cast %35 : vector<32x1xf32> to vector<1x32x1xf32>
    tpu.vector_store %arg8[%c0_25, %c0_26, %c0_27], %38 {strides = array<i32>} : memref<1x32x1xf32, #tpu.memory_space<vmem>>, vector<1x32x1xf32>,
    return
  }
  func.func @transform_0(%arg0: i32, %arg1: i32) -> (i32, i32) {
    %c0_i32 = arith.constant 0 : i32
    %c0_i32_0 = arith.constant 0 : i32
    %c0_i32_1 = arith.constant 0 : i32
    return %c0_i32, %c0_i32_0 : i32, i32
  }
  func.func @transform_1(%arg0: i32, %arg1: i32) -> (i32, i32) {
    %c0_i32 = arith.constant 0 : i32
    %c0_i32_0 = arith.constant 0 : i32
    %c0_i32_1 = arith.constant 0 : i32
    return %c0_i32, %c0_i32_0 : i32, i32
  }
  func.func @transform_2(%arg0: i32, %arg1: i32) -> (i32, i32, i32) {
    %c0_i32 = arith.constant 0 : i32
    %c0_i32_0 = arith.constant 0 : i32
    %c0_i32_1 = arith.constant 0 : i32
    return %arg0, %c0_i32, %c0_i32_0 : i32, i32, i32
  }
  func.func @transform_3(%arg0: i32, %arg1: i32) -> (i32, i32, i32) {
    %c0_i32 = arith.constant 0 : i32
    %c0_i32_0 = arith.constant 0 : i32
    return %arg0, %c0_i32, %arg1 : i32, i32, i32
  }
  func.func @transform_4(%arg0: i32, %arg1: i32) -> (i32, i32, i32) {
    %c0_i32 = arith.constant 0 : i32
    %c0_i32_0 = arith.constant 0 : i32
    return %arg0, %c0_i32, %arg1 : i32, i32, i32
  }
  func.func @transform_5(%arg0: i32, %arg1: i32) -> (i32, i32, i32) {
    %c0_i32 = arith.constant 0 : i32
    %c0_i32_0 = arith.constant 0 : i32
    %c0_i32_1 = arith.constant 0 : i32
    return %arg0, %c0_i32, %c0_i32_0 : i32, i32, i32
  }
  func.func @transform_6(%arg0: i32, %arg1: i32) -> (i32, i32, i32) {
    %c0_i32 = arith.constant 0 : i32
    %c0_i32_0 = arith.constant 0 : i32
    %c0_i32_1 = arith.constant 0 : i32
    return %arg0, %c0_i32, %c0_i32_0 : i32, i32, i32
  }
}

module attributes {stable_mosaic.version = 11 : i64} {
  func.func @_convt_bn_kernel(%arg0: i32, %arg1: i32, %arg2: memref<128x1xf32, #tpu.memory_space<vmem>>, %arg3: memref<128x1xf32, #tpu.memory_space<vmem>>, %arg4: memref<1x16x128xbf16, #tpu.memory_space<vmem>>, %arg5: memref<1x128x128xbf16, #tpu.memory_space<vmem>>, %arg6: memref<1x16x128xbf16, #tpu.memory_space<vmem>>, %arg7: memref<1x16x1xf32, #tpu.memory_space<vmem>>, %arg8: memref<1x16x1xf32, #tpu.memory_space<vmem>>) attributes {dimension_semantics = [#tpu.dimension_semantics<parallel>, #tpu.dimension_semantics<arbitrary>], iteration_bounds = array<i64: 4, 1>, scalar_prefetch = 0 : i64, scratch_operands = 0 : i64, tpu.core_type = #tpu.core_type<tc>, window_params = [{pipeline_mode = #tpu.pipeline_mode<synchronous>, transform_indices = @transform_0, window_bounds = array<i64: 128, 1>}, {pipeline_mode = #tpu.pipeline_mode<synchronous>, transform_indices = @transform_1, window_bounds = array<i64: 128, 1>}, {transform_indices = @transform_2, window_bounds = array<i64: 1, 16, 128>}, {transform_indices = @transform_3, window_bounds = array<i64: 1, 128, 128>}, {transform_indices = @transform_4, window_bounds = array<i64: 1, 16, 128>}, {transform_indices = @transform_5, window_bounds = array<i64: 1, 16, 1>}, {transform_indices = @transform_6, window_bounds = array<i64: 1, 16, 1>}]} {
    %c0 = arith.constant 0 : index
    %c0_0 = arith.constant 0 : index
    %c0_1 = arith.constant 0 : index
    %0 = vector.load %arg5[%c0, %c0_0, %c0_1] : memref<1x128x128xbf16, #tpu.memory_space<vmem>>, vector<1x128x128xbf16>
    %1 = vector.shape_cast %0 : vector<1x128x128xbf16> to vector<128x128xbf16>
    %2 = arith.extf %1 : vector<128x128xbf16> to vector<128x128xf32>
    %c0_2 = arith.constant 0 : index
    %c0_3 = arith.constant 0 : index
    %3 = vector.load %arg2[%c0_2, %c0_3] : memref<128x1xf32, #tpu.memory_space<vmem>>, vector<128x1xf32>
    %4 = vector.broadcast %3 : vector<128x1xf32> to vector<128x128xf32>
    %5 = arith.mulf %2, %4 : vector<128x128xf32>
    %c0_4 = arith.constant 0 : index
    %c0_5 = arith.constant 0 : index
    %6 = vector.load %arg3[%c0_4, %c0_5] : memref<128x1xf32, #tpu.memory_space<vmem>>, vector<128x1xf32>
    %7 = vector.broadcast %6 : vector<128x1xf32> to vector<128x128xf32>
    %8 = arith.addf %5, %7 : vector<128x128xf32>
    %cst = arith.constant 0.000000e+00 : f32
    %9 = vector.broadcast %cst : f32 to vector<128x128xf32>
    %10 = arith.maximumf %8, %9 : vector<128x128xf32>
    %c0_6 = arith.constant 0 : index
    %c0_7 = arith.constant 0 : index
    %c0_8 = arith.constant 0 : index
    %11 = vector.load %arg4[%c0_6, %c0_7, %c0_8] : memref<1x16x128xbf16, #tpu.memory_space<vmem>>, vector<1x16x128xbf16>
    %12 = vector.shape_cast %11 : vector<1x16x128xbf16> to vector<16x128xbf16>
    %13 = arith.truncf %10 : vector<128x128xf32> to vector<128x128xbf16>
    %cst_9 = arith.constant dense<0.000000e+00> : vector<16x128xf32>
    %14 = tpu.matmul %12, %13, %cst_9 {dimension_numbers = #tpu.dot_dimension_numbers<[1], [0], [0], [1], [0, 0, 1, 1], [], []>} : vector<16x128xbf16>, vector<128x128xbf16>, vector<16x128xf32> -> vector<16x128xf32>
    %15 = arith.truncf %14 : vector<16x128xf32> to vector<16x128xbf16>
    %c0_10 = arith.constant 0 : index
    %c0_11 = arith.constant 0 : index
    %c0_12 = arith.constant 0 : index
    %16 = vector.load %arg6[%c0_10, %c0_11, %c0_12] : memref<1x16x128xbf16, #tpu.memory_space<vmem>>, vector<1x16x128xbf16>
    %17 = vector.shape_cast %16 : vector<1x16x128xbf16> to vector<16x128xbf16>
    %18 = vector.shape_cast %15 : vector<16x128xbf16> to vector<1x16x128xbf16>
    tpu.vector_store %arg6[%c0_10, %c0_11, %c0_12], %18 {strides = array<i32>} : memref<1x16x128xbf16, #tpu.memory_space<vmem>>, vector<1x16x128xbf16>,
    %c0_i32 = arith.constant 0 : i32
    %19 = arith.cmpi eq, %arg1, %c0_i32 : i32
    %20 = arith.extui %19 : i1 to i32
    %c0_i32_13 = arith.constant 0 : i32
    %21 = arith.cmpi ne, %20, %c0_i32_13 : i32
    scf.if %21 {
      %cst_28 = arith.constant 0.000000e+00 : f32
      %39 = vector.broadcast %cst_28 : f32 to vector<16x1xf32>
      %c0_29 = arith.constant 0 : index
      %c0_30 = arith.constant 0 : index
      %c0_31 = arith.constant 0 : index
      %40 = vector.load %arg7[%c0_29, %c0_30, %c0_31] : memref<1x16x1xf32, #tpu.memory_space<vmem>>, vector<1x16x1xf32>
      %41 = vector.shape_cast %40 : vector<1x16x1xf32> to vector<16x1xf32>
      %42 = vector.shape_cast %39 : vector<16x1xf32> to vector<1x16x1xf32>
      tpu.vector_store %arg7[%c0_29, %c0_30, %c0_31], %42 {strides = array<i32>} : memref<1x16x1xf32, #tpu.memory_space<vmem>>, vector<1x16x1xf32>,
      %cst_32 = arith.constant 0.000000e+00 : f32
      %43 = vector.broadcast %cst_32 : f32 to vector<16x1xf32>
      %c0_33 = arith.constant 0 : index
      %c0_34 = arith.constant 0 : index
      %c0_35 = arith.constant 0 : index
      %44 = vector.load %arg8[%c0_33, %c0_34, %c0_35] : memref<1x16x1xf32, #tpu.memory_space<vmem>>, vector<1x16x1xf32>
      %45 = vector.shape_cast %44 : vector<1x16x1xf32> to vector<16x1xf32>
      %46 = vector.shape_cast %43 : vector<16x1xf32> to vector<1x16x1xf32>
      tpu.vector_store %arg8[%c0_33, %c0_34, %c0_35], %46 {strides = array<i32>} : memref<1x16x1xf32, #tpu.memory_space<vmem>>, vector<1x16x1xf32>,
    } else {
    }
    %c0_14 = arith.constant 0 : index
    %c0_15 = arith.constant 0 : index
    %c0_16 = arith.constant 0 : index
    %22 = vector.load %arg7[%c0_14, %c0_15, %c0_16] : memref<1x16x1xf32, #tpu.memory_space<vmem>>, vector<1x16x1xf32>
    %23 = vector.shape_cast %22 : vector<1x16x1xf32> to vector<16x1xf32>
    %cst_17 = arith.constant dense<0.000000e+00> : vector<16xf32>
    %24 = vector.multi_reduction <add>, %14, %cst_17 [1] : vector<16x128xf32> to vector<16xf32>
    %25 = vector.shape_cast %24 : vector<16xf32> to vector<16x1xf32>
    %26 = arith.addf %23, %25 : vector<16x1xf32>
    %c0_18 = arith.constant 0 : index
    %c0_19 = arith.constant 0 : index
    %c0_20 = arith.constant 0 : index
    %27 = vector.load %arg7[%c0_18, %c0_19, %c0_20] : memref<1x16x1xf32, #tpu.memory_space<vmem>>, vector<1x16x1xf32>
    %28 = vector.shape_cast %27 : vector<1x16x1xf32> to vector<16x1xf32>
    %29 = vector.shape_cast %26 : vector<16x1xf32> to vector<1x16x1xf32>
    tpu.vector_store %arg7[%c0_18, %c0_19, %c0_20], %29 {strides = array<i32>} : memref<1x16x1xf32, #tpu.memory_space<vmem>>, vector<1x16x1xf32>,
    %c0_21 = arith.constant 0 : index
    %c0_22 = arith.constant 0 : index
    %c0_23 = arith.constant 0 : index
    %30 = vector.load %arg8[%c0_21, %c0_22, %c0_23] : memref<1x16x1xf32, #tpu.memory_space<vmem>>, vector<1x16x1xf32>
    %31 = vector.shape_cast %30 : vector<1x16x1xf32> to vector<16x1xf32>
    %32 = arith.mulf %14, %14 : vector<16x128xf32>
    %cst_24 = arith.constant dense<0.000000e+00> : vector<16xf32>
    %33 = vector.multi_reduction <add>, %32, %cst_24 [1] : vector<16x128xf32> to vector<16xf32>
    %34 = vector.shape_cast %33 : vector<16xf32> to vector<16x1xf32>
    %35 = arith.addf %31, %34 : vector<16x1xf32>
    %c0_25 = arith.constant 0 : index
    %c0_26 = arith.constant 0 : index
    %c0_27 = arith.constant 0 : index
    %36 = vector.load %arg8[%c0_25, %c0_26, %c0_27] : memref<1x16x1xf32, #tpu.memory_space<vmem>>, vector<1x16x1xf32>
    %37 = vector.shape_cast %36 : vector<1x16x1xf32> to vector<16x1xf32>
    %38 = vector.shape_cast %35 : vector<16x1xf32> to vector<1x16x1xf32>
    tpu.vector_store %arg8[%c0_25, %c0_26, %c0_27], %38 {strides = array<i32>} : memref<1x16x1xf32, #tpu.memory_space<vmem>>, vector<1x16x1xf32>,
    return
  }
  func.func @transform_0(%arg0: i32, %arg1: i32) -> (i32, i32) {
    %c0_i32 = arith.constant 0 : i32
    %c0_i32_0 = arith.constant 0 : i32
    %c0_i32_1 = arith.constant 0 : i32
    return %c0_i32, %c0_i32_0 : i32, i32
  }
  func.func @transform_1(%arg0: i32, %arg1: i32) -> (i32, i32) {
    %c0_i32 = arith.constant 0 : i32
    %c0_i32_0 = arith.constant 0 : i32
    %c0_i32_1 = arith.constant 0 : i32
    return %c0_i32, %c0_i32_0 : i32, i32
  }
  func.func @transform_2(%arg0: i32, %arg1: i32) -> (i32, i32, i32) {
    %c0_i32 = arith.constant 0 : i32
    %c0_i32_0 = arith.constant 0 : i32
    %c0_i32_1 = arith.constant 0 : i32
    return %arg0, %c0_i32, %c0_i32_0 : i32, i32, i32
  }
  func.func @transform_3(%arg0: i32, %arg1: i32) -> (i32, i32, i32) {
    %c0_i32 = arith.constant 0 : i32
    %c0_i32_0 = arith.constant 0 : i32
    return %arg0, %c0_i32, %arg1 : i32, i32, i32
  }
  func.func @transform_4(%arg0: i32, %arg1: i32) -> (i32, i32, i32) {
    %c0_i32 = arith.constant 0 : i32
    %c0_i32_0 = arith.constant 0 : i32
    return %arg0, %c0_i32, %arg1 : i32, i32, i32
  }
  func.func @transform_5(%arg0: i32, %arg1: i32) -> (i32, i32, i32) {
    %c0_i32 = arith.constant 0 : i32
    %c0_i32_0 = arith.constant 0 : i32
    %c0_i32_1 = arith.constant 0 : i32
    return %arg0, %c0_i32, %c0_i32_0 : i32, i32, i32
  }
  func.func @transform_6(%arg0: i32, %arg1: i32) -> (i32, i32, i32) {
    %c0_i32 = arith.constant 0 : i32
    %c0_i32_0 = arith.constant 0 : i32
    %c0_i32_1 = arith.constant 0 : i32
    return %arg0, %c0_i32, %c0_i32_0 : i32, i32, i32
  }
}

module attributes {stable_mosaic.version = 11 : i64} {
  func.func @_convt_bn_kernel(%arg0: i32, %arg1: i32, %arg2: memref<64x1xf32, #tpu.memory_space<vmem>>, %arg3: memref<64x1xf32, #tpu.memory_space<vmem>>, %arg4: memref<1x8x64xbf16, #tpu.memory_space<vmem>>, %arg5: memref<1x64x512xbf16, #tpu.memory_space<vmem>>, %arg6: memref<1x8x512xbf16, #tpu.memory_space<vmem>>, %arg7: memref<1x8x1xf32, #tpu.memory_space<vmem>>, %arg8: memref<1x8x1xf32, #tpu.memory_space<vmem>>) attributes {dimension_semantics = [#tpu.dimension_semantics<parallel>, #tpu.dimension_semantics<arbitrary>], iteration_bounds = array<i64: 4, 1>, scalar_prefetch = 0 : i64, scratch_operands = 0 : i64, tpu.core_type = #tpu.core_type<tc>, window_params = [{pipeline_mode = #tpu.pipeline_mode<synchronous>, transform_indices = @transform_0, window_bounds = array<i64: 64, 1>}, {pipeline_mode = #tpu.pipeline_mode<synchronous>, transform_indices = @transform_1, window_bounds = array<i64: 64, 1>}, {transform_indices = @transform_2, window_bounds = array<i64: 1, 8, 64>}, {transform_indices = @transform_3, window_bounds = array<i64: 1, 64, 512>}, {transform_indices = @transform_4, window_bounds = array<i64: 1, 8, 512>}, {transform_indices = @transform_5, window_bounds = array<i64: 1, 8, 1>}, {transform_indices = @transform_6, window_bounds = array<i64: 1, 8, 1>}]} {
    %c0 = arith.constant 0 : index
    %c0_0 = arith.constant 0 : index
    %c0_1 = arith.constant 0 : index
    %0 = vector.load %arg5[%c0, %c0_0, %c0_1] : memref<1x64x512xbf16, #tpu.memory_space<vmem>>, vector<1x64x512xbf16>
    %1 = vector.shape_cast %0 : vector<1x64x512xbf16> to vector<64x512xbf16>
    %2 = arith.extf %1 : vector<64x512xbf16> to vector<64x512xf32>
    %c0_2 = arith.constant 0 : index
    %c0_3 = arith.constant 0 : index
    %3 = vector.load %arg2[%c0_2, %c0_3] : memref<64x1xf32, #tpu.memory_space<vmem>>, vector<64x1xf32>
    %4 = vector.broadcast %3 : vector<64x1xf32> to vector<64x512xf32>
    %5 = arith.mulf %2, %4 : vector<64x512xf32>
    %c0_4 = arith.constant 0 : index
    %c0_5 = arith.constant 0 : index
    %6 = vector.load %arg3[%c0_4, %c0_5] : memref<64x1xf32, #tpu.memory_space<vmem>>, vector<64x1xf32>
    %7 = vector.broadcast %6 : vector<64x1xf32> to vector<64x512xf32>
    %8 = arith.addf %5, %7 : vector<64x512xf32>
    %cst = arith.constant 0.000000e+00 : f32
    %9 = vector.broadcast %cst : f32 to vector<64x512xf32>
    %10 = arith.maximumf %8, %9 : vector<64x512xf32>
    %c0_6 = arith.constant 0 : index
    %c0_7 = arith.constant 0 : index
    %c0_8 = arith.constant 0 : index
    %11 = vector.load %arg4[%c0_6, %c0_7, %c0_8] : memref<1x8x64xbf16, #tpu.memory_space<vmem>>, vector<1x8x64xbf16>
    %12 = vector.shape_cast %11 : vector<1x8x64xbf16> to vector<8x64xbf16>
    %13 = arith.truncf %10 : vector<64x512xf32> to vector<64x512xbf16>
    %cst_9 = arith.constant dense<0.000000e+00> : vector<8x512xf32>
    %14 = tpu.matmul %12, %13, %cst_9 {dimension_numbers = #tpu.dot_dimension_numbers<[1], [0], [0], [1], [0, 0, 1, 1], [], []>} : vector<8x64xbf16>, vector<64x512xbf16>, vector<8x512xf32> -> vector<8x512xf32>
    %15 = arith.truncf %14 : vector<8x512xf32> to vector<8x512xbf16>
    %c0_10 = arith.constant 0 : index
    %c0_11 = arith.constant 0 : index
    %c0_12 = arith.constant 0 : index
    %16 = vector.load %arg6[%c0_10, %c0_11, %c0_12] : memref<1x8x512xbf16, #tpu.memory_space<vmem>>, vector<1x8x512xbf16>
    %17 = vector.shape_cast %16 : vector<1x8x512xbf16> to vector<8x512xbf16>
    %18 = vector.shape_cast %15 : vector<8x512xbf16> to vector<1x8x512xbf16>
    tpu.vector_store %arg6[%c0_10, %c0_11, %c0_12], %18 {strides = array<i32>} : memref<1x8x512xbf16, #tpu.memory_space<vmem>>, vector<1x8x512xbf16>,
    %c0_i32 = arith.constant 0 : i32
    %19 = arith.cmpi eq, %arg1, %c0_i32 : i32
    %20 = arith.extui %19 : i1 to i32
    %c0_i32_13 = arith.constant 0 : i32
    %21 = arith.cmpi ne, %20, %c0_i32_13 : i32
    scf.if %21 {
      %cst_28 = arith.constant 0.000000e+00 : f32
      %39 = vector.broadcast %cst_28 : f32 to vector<8x1xf32>
      %c0_29 = arith.constant 0 : index
      %c0_30 = arith.constant 0 : index
      %c0_31 = arith.constant 0 : index
      %40 = vector.load %arg7[%c0_29, %c0_30, %c0_31] : memref<1x8x1xf32, #tpu.memory_space<vmem>>, vector<1x8x1xf32>
      %41 = vector.shape_cast %40 : vector<1x8x1xf32> to vector<8x1xf32>
      %42 = vector.shape_cast %39 : vector<8x1xf32> to vector<1x8x1xf32>
      tpu.vector_store %arg7[%c0_29, %c0_30, %c0_31], %42 {strides = array<i32>} : memref<1x8x1xf32, #tpu.memory_space<vmem>>, vector<1x8x1xf32>,
      %cst_32 = arith.constant 0.000000e+00 : f32
      %43 = vector.broadcast %cst_32 : f32 to vector<8x1xf32>
      %c0_33 = arith.constant 0 : index
      %c0_34 = arith.constant 0 : index
      %c0_35 = arith.constant 0 : index
      %44 = vector.load %arg8[%c0_33, %c0_34, %c0_35] : memref<1x8x1xf32, #tpu.memory_space<vmem>>, vector<1x8x1xf32>
      %45 = vector.shape_cast %44 : vector<1x8x1xf32> to vector<8x1xf32>
      %46 = vector.shape_cast %43 : vector<8x1xf32> to vector<1x8x1xf32>
      tpu.vector_store %arg8[%c0_33, %c0_34, %c0_35], %46 {strides = array<i32>} : memref<1x8x1xf32, #tpu.memory_space<vmem>>, vector<1x8x1xf32>,
    } else {
    }
    %c0_14 = arith.constant 0 : index
    %c0_15 = arith.constant 0 : index
    %c0_16 = arith.constant 0 : index
    %22 = vector.load %arg7[%c0_14, %c0_15, %c0_16] : memref<1x8x1xf32, #tpu.memory_space<vmem>>, vector<1x8x1xf32>
    %23 = vector.shape_cast %22 : vector<1x8x1xf32> to vector<8x1xf32>
    %cst_17 = arith.constant dense<0.000000e+00> : vector<8xf32>
    %24 = vector.multi_reduction <add>, %14, %cst_17 [1] : vector<8x512xf32> to vector<8xf32>
    %25 = vector.shape_cast %24 : vector<8xf32> to vector<8x1xf32>
    %26 = arith.addf %23, %25 : vector<8x1xf32>
    %c0_18 = arith.constant 0 : index
    %c0_19 = arith.constant 0 : index
    %c0_20 = arith.constant 0 : index
    %27 = vector.load %arg7[%c0_18, %c0_19, %c0_20] : memref<1x8x1xf32, #tpu.memory_space<vmem>>, vector<1x8x1xf32>
    %28 = vector.shape_cast %27 : vector<1x8x1xf32> to vector<8x1xf32>
    %29 = vector.shape_cast %26 : vector<8x1xf32> to vector<1x8x1xf32>
    tpu.vector_store %arg7[%c0_18, %c0_19, %c0_20], %29 {strides = array<i32>} : memref<1x8x1xf32, #tpu.memory_space<vmem>>, vector<1x8x1xf32>,
    %c0_21 = arith.constant 0 : index
    %c0_22 = arith.constant 0 : index
    %c0_23 = arith.constant 0 : index
    %30 = vector.load %arg8[%c0_21, %c0_22, %c0_23] : memref<1x8x1xf32, #tpu.memory_space<vmem>>, vector<1x8x1xf32>
    %31 = vector.shape_cast %30 : vector<1x8x1xf32> to vector<8x1xf32>
    %32 = arith.mulf %14, %14 : vector<8x512xf32>
    %cst_24 = arith.constant dense<0.000000e+00> : vector<8xf32>
    %33 = vector.multi_reduction <add>, %32, %cst_24 [1] : vector<8x512xf32> to vector<8xf32>
    %34 = vector.shape_cast %33 : vector<8xf32> to vector<8x1xf32>
    %35 = arith.addf %31, %34 : vector<8x1xf32>
    %c0_25 = arith.constant 0 : index
    %c0_26 = arith.constant 0 : index
    %c0_27 = arith.constant 0 : index
    %36 = vector.load %arg8[%c0_25, %c0_26, %c0_27] : memref<1x8x1xf32, #tpu.memory_space<vmem>>, vector<1x8x1xf32>
    %37 = vector.shape_cast %36 : vector<1x8x1xf32> to vector<8x1xf32>
    %38 = vector.shape_cast %35 : vector<8x1xf32> to vector<1x8x1xf32>
    tpu.vector_store %arg8[%c0_25, %c0_26, %c0_27], %38 {strides = array<i32>} : memref<1x8x1xf32, #tpu.memory_space<vmem>>, vector<1x8x1xf32>,
    return
  }
  func.func @transform_0(%arg0: i32, %arg1: i32) -> (i32, i32) {
    %c0_i32 = arith.constant 0 : i32
    %c0_i32_0 = arith.constant 0 : i32
    %c0_i32_1 = arith.constant 0 : i32
    return %c0_i32, %c0_i32_0 : i32, i32
  }
  func.func @transform_1(%arg0: i32, %arg1: i32) -> (i32, i32) {
    %c0_i32 = arith.constant 0 : i32
    %c0_i32_0 = arith.constant 0 : i32
    %c0_i32_1 = arith.constant 0 : i32
    return %c0_i32, %c0_i32_0 : i32, i32
  }
  func.func @transform_2(%arg0: i32, %arg1: i32) -> (i32, i32, i32) {
    %c0_i32 = arith.constant 0 : i32
    %c0_i32_0 = arith.constant 0 : i32
    %c0_i32_1 = arith.constant 0 : i32
    return %arg0, %c0_i32, %c0_i32_0 : i32, i32, i32
  }
  func.func @transform_3(%arg0: i32, %arg1: i32) -> (i32, i32, i32) {
    %c0_i32 = arith.constant 0 : i32
    %c0_i32_0 = arith.constant 0 : i32
    return %arg0, %c0_i32, %arg1 : i32, i32, i32
  }
  func.func @transform_4(%arg0: i32, %arg1: i32) -> (i32, i32, i32) {
    %c0_i32 = arith.constant 0 : i32
    %c0_i32_0 = arith.constant 0 : i32
    return %arg0, %c0_i32, %arg1 : i32, i32, i32
  }
  func.func @transform_5(%arg0: i32, %arg1: i32) -> (i32, i32, i32) {
    %c0_i32 = arith.constant 0 : i32
    %c0_i32_0 = arith.constant 0 : i32
    %c0_i32_1 = arith.constant 0 : i32
    return %arg0, %c0_i32, %c0_i32_0 : i32, i32, i32
  }
  func.func @transform_6(%arg0: i32, %arg1: i32) -> (i32, i32, i32) {
    %c0_i32 = arith.constant 0 : i32
    %c0_i32_0 = arith.constant 0 : i32
    %c0_i32_1 = arith.constant 0 : i32
    return %arg0, %c0_i32, %c0_i32_0 : i32, i32, i32
  }
}

module attributes {stable_mosaic.version = 11 : i64} {
  func.func @_convt_tanh_kernel(%arg0: i32, %arg1: i32, %arg2: memref<32x1xf32, #tpu.memory_space<vmem>>, %arg3: memref<32x1xf32, #tpu.memory_space<vmem>>, %arg4: memref<1x3x32xbf16, #tpu.memory_space<vmem>>, %arg5: memref<1x32x2048xbf16, #tpu.memory_space<vmem>>, %arg6: memref<1x3x2048xf32, #tpu.memory_space<vmem>>) attributes {dimension_semantics = [#tpu.dimension_semantics<parallel>, #tpu.dimension_semantics<parallel>], iteration_bounds = array<i64: 4, 1>, scalar_prefetch = 0 : i64, scratch_operands = 0 : i64, tpu.core_type = #tpu.core_type<tc>, window_params = [{pipeline_mode = #tpu.pipeline_mode<synchronous>, transform_indices = @transform_0, window_bounds = array<i64: 32, 1>}, {pipeline_mode = #tpu.pipeline_mode<synchronous>, transform_indices = @transform_1, window_bounds = array<i64: 32, 1>}, {transform_indices = @transform_2, window_bounds = array<i64: 1, 3, 32>}, {transform_indices = @transform_3, window_bounds = array<i64: 1, 32, 2048>}, {transform_indices = @transform_4, window_bounds = array<i64: 1, 3, 2048>}]} {
    %c0 = arith.constant 0 : index
    %c0_0 = arith.constant 0 : index
    %c0_1 = arith.constant 0 : index
    %0 = vector.load %arg5[%c0, %c0_0, %c0_1] : memref<1x32x2048xbf16, #tpu.memory_space<vmem>>, vector<1x32x2048xbf16>
    %1 = vector.shape_cast %0 : vector<1x32x2048xbf16> to vector<32x2048xbf16>
    %2 = arith.extf %1 : vector<32x2048xbf16> to vector<32x2048xf32>
    %c0_2 = arith.constant 0 : index
    %c0_3 = arith.constant 0 : index
    %3 = vector.load %arg2[%c0_2, %c0_3] : memref<32x1xf32, #tpu.memory_space<vmem>>, vector<32x1xf32>
    %4 = vector.broadcast %3 : vector<32x1xf32> to vector<32x2048xf32>
    %5 = arith.mulf %2, %4 : vector<32x2048xf32>
    %c0_4 = arith.constant 0 : index
    %c0_5 = arith.constant 0 : index
    %6 = vector.load %arg3[%c0_4, %c0_5] : memref<32x1xf32, #tpu.memory_space<vmem>>, vector<32x1xf32>
    %7 = vector.broadcast %6 : vector<32x1xf32> to vector<32x2048xf32>
    %8 = arith.addf %5, %7 : vector<32x2048xf32>
    %cst = arith.constant 0.000000e+00 : f32
    %9 = vector.broadcast %cst : f32 to vector<32x2048xf32>
    %10 = arith.maximumf %8, %9 : vector<32x2048xf32>
    %c0_6 = arith.constant 0 : index
    %c0_7 = arith.constant 0 : index
    %c0_8 = arith.constant 0 : index
    %11 = vector.load %arg4[%c0_6, %c0_7, %c0_8] : memref<1x3x32xbf16, #tpu.memory_space<vmem>>, vector<1x3x32xbf16>
    %12 = vector.shape_cast %11 : vector<1x3x32xbf16> to vector<3x32xbf16>
    %13 = arith.truncf %10 : vector<32x2048xf32> to vector<32x2048xbf16>
    %cst_9 = arith.constant dense<0.000000e+00> : vector<3x2048xf32>
    %14 = tpu.matmul %12, %13, %cst_9 {dimension_numbers = #tpu.dot_dimension_numbers<[1], [0], [0], [1], [0, 0, 1, 1], [], []>} : vector<3x32xbf16>, vector<32x2048xbf16>, vector<3x2048xf32> -> vector<3x2048xf32>
    %15 = math.tanh %14 : vector<3x2048xf32>
    %c0_10 = arith.constant 0 : index
    %c0_11 = arith.constant 0 : index
    %c0_12 = arith.constant 0 : index
    %16 = vector.load %arg6[%c0_10, %c0_11, %c0_12] : memref<1x3x2048xf32, #tpu.memory_space<vmem>>, vector<1x3x2048xf32>
    %17 = vector.shape_cast %16 : vector<1x3x2048xf32> to vector<3x2048xf32>
    %18 = vector.shape_cast %15 : vector<3x2048xf32> to vector<1x3x2048xf32>
    tpu.vector_store %arg6[%c0_10, %c0_11, %c0_12], %18 {strides = array<i32>} : memref<1x3x2048xf32, #tpu.memory_space<vmem>>, vector<1x3x2048xf32>,
    return
  }
  func.func @transform_0(%arg0: i32, %arg1: i32) -> (i32, i32) {
    %c0_i32 = arith.constant 0 : i32
    %c0_i32_0 = arith.constant 0 : i32
    %c0_i32_1 = arith.constant 0 : i32
    return %c0_i32, %c0_i32_0 : i32, i32
  }
  func.func @transform_1(%arg0: i32, %arg1: i32) -> (i32, i32) {
    %c0_i32 = arith.constant 0 : i32
    %c0_i32_0 = arith.constant 0 : i32
    %c0_i32_1 = arith.constant 0 : i32
    return %c0_i32, %c0_i32_0 : i32, i32
  }
  func.func @transform_2(%arg0: i32, %arg1: i32) -> (i32, i32, i32) {
    %c0_i32 = arith.constant 0 : i32
    %c0_i32_0 = arith.constant 0 : i32
    %c0_i32_1 = arith.constant 0 : i32
    return %arg0, %c0_i32, %c0_i32_0 : i32, i32, i32
  }
  func.func @transform_3(%arg0: i32, %arg1: i32) -> (i32, i32, i32) {
    %c0_i32 = arith.constant 0 : i32
    %c0_i32_0 = arith.constant 0 : i32
    return %arg0, %c0_i32, %arg1 : i32, i32, i32
  }
  func.func @transform_4(%arg0: i32, %arg1: i32) -> (i32, i32, i32) {
    %c0_i32 = arith.constant 0 : i32
    %c0_i32_0 = arith.constant 0 : i32
    return %arg0, %c0_i32, %arg1 : i32, i32, i32
  }
}

</mosaic_0001>

<bundles_post_ra>
// kernel: tile.40
= control target key start
LH: loop header
LB: loop body
LE: loop exit
PB: predicated region body
PF: predicated region fallthrough
CT: control target
= control target key end

     0   :  { %v12_v2 = vmov 0.0   ;;  %s29_s0 = inlined_call_operand.vmem [shape: bf16[64], index: 0, kind: input, shape index: {}]   ;;  %s30_s1 = inlined_call_operand.vmem [shape: bf16[4,64], index: 1, kind: output, shape index: {}]  }
   0x1   :  { %v4_v0 = vld [vmem:[%s29_s0] ss:$0 sm:$0xff] }
   0x2   :  { %v5_v1 = vunpack.i.l.bf16 %v4_v0 }
   0x4   :  { %v9_v3 = vpack.c.bf16 %v12_v2, %v5_v1 }
   0x6   :  { %10 = vst [vmem:[%s30_s1] sm:$0x3] %v9_v3 }

// kernel: tile.48
= control target key start
LH: loop header
LB: loop body
LE: loop exit
PB: predicated region body
PF: predicated region fallthrough
CT: control target
= control target key end

     0   :  { %s22_s0 = inlined_call_operand.vmem [shape: f32[64], index: 0, kind: input, shape index: {}]   ;;  %s23_s1 = inlined_call_operand.vmem [shape: f32[4,64], index: 1, kind: output, shape index: {}]  }
   0x1   :  { %v4_v0 = vld [vmem:[%s22_s0] ss:$0 sm:$0xff] }
   0x2   :  { %5 = vst [vmem:[%s23_s1] sm:$0xf] %v4_v0 }

// kernel: generator_forward.5
= control target key start
LH: loop header
LB: loop body
LE: loop exit
PB: predicated region body
PF: predicated region fallthrough
CT: control target
= control target key end

     0   :  { %v293_v3 = vmov 0   ;;  %vm61_vm0 = vcmask 130048   ;;  %v294_v18 = vmov 1983009808   ;;  %v242_v20 = vlaneseq  ;;  %s343_s1 = inlined_call_operand.vmem [shape: bf16[16,1024], index: 1, kind: input, shape index: {}]   ;;  %s344_s0 = inlined_call_operand.vmem [shape: bf16[2,16], index: 0, kind: input, shape index: {}]   ;;  %s345_s2 = inlined_call_operand.vmem [shape: f32[2,1024], index: 2, kind: output, shape index: {}]  }
   0x1   :  { %v13_v0 = vld [vmem:[%s343_s1] sm:$0xff]  ;;  %v14_v2 = vld [vmem:[%s343_s1 + $0x8] sm:$0xff]  ;;  %97 = vmatprep.mubr.bf16.mxu0 %v293_v3  ;;  %138 = vmatprep.mubr.bf16.mxu1 %v293_v3  ;;  %v15_v7 = vld [vmem:[%s343_s1 + $0x10] sm:$0xff]  ;;  %v240_v19 = vunpack.c.l.s4 %v294_v18 }
   0x2   :  { %v17_v1 = vld [vmem:[%s343_s1 + $0x20] sm:$0xff]  ;;  %v18_v5 = vld [vmem:[%s343_s1 + $0x28] sm:$0xff]  ;;  %v19_v10 = vld [vmem:[%s343_s1 + $0x30] sm:$0xff]  ;;  %v243_v22 = vshrl.u32 %v242_v20, 7 }
   0x3   :  { %v280_v4 = vcombine.high %v13_v0, %v17_v1  ;;  %v279_v6 = vcombine.low %v13_v0, %v17_v1  ;;  %v282_v8 = vcombine.high %v14_v2, %v18_v5  ;;  %v281_v9 = vcombine.low %v14_v2, %v18_v5  ;;  %v16_v11 = vld [vmem:[%s343_s1 + $0x18] sm:$0xff]  ;;  %v12_v15 = vld [vmem:[%s344_s0] sm:$0x1] }
   0x4   :  { %v20_v12 = vld [vmem:[%s343_s1 + $0x38] sm:$0xff]  ;;  %v284_v13 = vcombine.high %v15_v7, %v19_v10  ;;  %v283_v16 = vcombine.low %v15_v7, %v19_v10  ;;  %v241_v21 = vunpack.c.0.s8 %v240_v19 }
   0x5   :  { %79 = vmatprep.subr.bf16.mxu0 %v280_v4  ;;  %v286_v14 = vcombine.high %v16_v11, %v20_v12  ;;  %120 = vmatprep.subr.bf16.mxu1 %v282_v8  ;;  %v285_v17 = vcombine.low %v16_v11, %v20_v12 }
   0x6   :  { %80 = vmatpush1.bf16.msra.mxu0 %v279_v6  ;;  %121 = vmatpush1.bf16.msra.mxu1 %v281_v9  ;;  %v244_v25 = vsub.s32 %v241_v21, %v243_v22 }
   0x7   :  { %161 = vmatprep.subr.bf16.mxu0 %v284_v13  ;;  %202 = vmatprep.subr.bf16.mxu1 %v286_v14 }
   0x9   :  { %287 = vmatmul.mubr.msk.bf16.vlgmr.msra.gmra.mxu0 %vm61_vm0, %v12_v15  ;;  %288 = vmatmul.mubr.msk.bf16.vlgmr.msra.gmra.mxu1 %vm61_vm0, %v12_v15 }
   0xa   :  { %162 = vmatpush1.bf16.msra.mxu0 %v283_v16  ;;  %203 = vmatpush1.bf16.msra.mxu1 %v285_v17 }
   0xb   :  { %179 = vmatprep.mubr.bf16.mxu0 %v293_v3  ;;  %220 = vmatprep.mubr.bf16.mxu1 %v293_v3 }
  0x11   :  { %289 = vmatmul.mubr.msk.bf16.vlgmr.msra.gmra.mxu0 %vm61_vm0, %v12_v15  ;;  %290 = vmatmul.mubr.msk.bf16.vlgmr.msra.gmra.mxu1 %vm61_vm0, %v12_v15 }
  0xc9   :  { %v99_v23 = vpop.f32.mrf.mxu0  ;;  %v140_v24 = vpop.f32.mrf.mxu1 }
  0xcb   :  { %v101_v26 = vpop.f32.mrf.mxu0  ;;  %v142_v28 = vpop.f32.mrf.mxu1 }
  0xcc   :  { %v237_v27 = vcombine.low %v99_v23, %v101_v26  ;;  %v238_v29 = vcombine.low %v140_v24, %v142_v28 }
  0xcd   :  { %v103_v30 = vpop.f32.mrf.mxu0  ;;  %v144_v32 = vpop.f32.mrf.mxu1 }
  0xce   :  { %v245_v31 = vrot.slane %v237_v27, %v244_v25  ;;  %v252_v33 = vrot.slane %v238_v29, %v244_v25 }
  0xcf   :  { %v104_v34 = vpop.f32.mrf.mxu0  ;;  %v145_v35 = vpop.f32.mrf.mxu1 }
  0xd0   :  { %v253_v36 = vcombine.low %v245_v31, %v252_v33 }
  0xd1   :  { %v181_v37 = vpop.f32.mrf.mxu0  ;;  %v222_v38 = vpop.f32.mrf.mxu1 }
  0xd2   :  { %273 = vst [vmem:[%s345_s2] sm:$0xff] %v253_v36 }
  0xd3   :  { %v183_v39 = vpop.f32.mrf.mxu0  ;;  %v224_v41 = vpop.f32.mrf.mxu1 }
  0xd4   :  { %v254_v40 = vcombine.low %v181_v37, %v183_v39  ;;  %v255_v42 = vcombine.low %v222_v38, %v224_v41 }
  0xd5   :  { %v185_v43 = vpop.f32.mrf.mxu0  ;;  %v226_v45 = vpop.f32.mrf.mxu1 }
  0xd6   :  { %v262_v44 = vrot.slane %v254_v40, %v244_v25  ;;  %v269_v46 = vrot.slane %v255_v42, %v244_v25 }
  0xd7   :  { %v186_v47 = vpop.f32.mrf.mxu0  ;;  %v227_v48 = vpop.f32.mrf.mxu1 }
  0xd8   :  { %v270_v49 = vcombine.low %v262_v44, %v269_v46 }
  0xda   :  { %274 = vst [vmem:[%s345_s2 + $0x8] sm:$0xff] %v270_v49 }

// kernel: tile.0
= control target key start
LH: loop header
LB: loop body
LE: loop exit
PB: predicated region body
PF: predicated region fallthrough
CT: control target
= control target key end

     0   :  { %s1091_s8 = smov 125   ;;  %s1092_s9 = smov 126   ;;  %vm8_vm0 = vcmask 7168   ;;  %s2190_s0 = inlined_call_operand.vmem [shape: f32[4,64], index: 0, kind: input, shape index: {}]   ;;  %s2191_s1 = inlined_call_operand.vmem [shape: f32[256,1], index: 1, kind: output, shape index: {}]  }
   0x1   :  { %v5_v0 = vld [vmem:[%s2190_s0] sm:$0xf]  ;;  %s1090_s0 = smov 127   ;;  %s1093_s10 = smov 124  }
   0x2   :  { %6 = vst [vmem:[#allocation0] sm:$0xf] %v5_v0  ;;  %s1094_s11 = smov 123   ;;  %s1095_s12 = smov 122  }
   0x3   :  { %s1096_s13 = smov 121   ;;  %s1097_s14 = smov 120  }
   0x4   :  { %s1098_s15 = smov 119   ;;  %s1099_s16 = smov 118  }
   0x5   :  { %s1100_s17 = smov 117   ;;  %s1101_s18 = smov 116  }
   0x6   :  { %s1102_s19 = smov 115   ;;  %s1103_s20 = smov 114  }
   0x7   :  { %s1104_s21 = smov 113   ;;  %s1105_s22 = smov 112  }
   0x8   :  { %s1106_s23 = smov 111   ;;  %s1107_s24 = smov 110  }
   0x9   :  { %v16_v1 = vld [vmem:[#allocation0] sm:$0xf]   ;;  %s1108_s25 = smov 109   ;;  %s1109_s26 = smov 108  }
   0xa   :  { %v40_v2 = vld [vmem:[#allocation0] sm:$0xf]   ;;  %17 = vrot.lane.b32.xlu0 %v16_v1, %s1090_s0  ;;  %s1110_s27 = smov 107   ;;  %s1111_s28 = smov 106  }
   0xb   :  { %41 = vrot.lane.b32.xlu1 %v40_v2, %s1091_s8  ;;  %v28_v3 = vld [vmem:[#allocation0] sm:$0xf]   ;;  %s1112_s29 = smov 105   ;;  %s1113_s30 = smov 104  }
   0xc   :  { %v52_v4 = vld [vmem:[#allocation0] sm:$0xf]   ;;  %s1114_s2 = smov 103   ;;  %s1115_s3 = smov 102  }
   0xd   :  { %v64_v5 = vld [vmem:[#allocation0] sm:$0xf]   ;;  %s1116_s4 = smov 101   ;;  %s1117_s5 = smov 100  }
   0xe   :  { %29 = vrot.lane.b32.xlu0 %v28_v3, %s1092_s9  ;;  %v76_v6 = vld [vmem:[#allocation0] sm:$0xf]   ;;  %s1118_s6 = smov 99   ;;  %s1119_s7 = smov 98  }
   0xf   :  { %53 = vrot.lane.b32.xlu1 %v52_v4, %s1093_s10  ;;  %v88_v7 = vld [vmem:[#allocation0] sm:$0xf]   ;;  %s1120_s0 = smov 97   ;;  %s1121_s8 = smov 96  }
  0x10   :  { %v100_v8 = vld [vmem:[#allocation0] sm:$0xf]   ;;  %s1122_s9 = smov 95   ;;  %s1123_s10 = smov 94  }
  0x11   :  { %v112_v9 = vld [vmem:[#allocation0] sm:$0xf]  }
  0x12   :  { %65 = vrot.lane.b32.xlu0 %v64_v5, %s1094_s11  ;;  %v124_v10 = vld [vmem:[#allocation0] sm:$0xf]   ;;  %s1124_s11 = smov 93  }
  0x13   :  { %77 = vrot.lane.b32.xlu1 %v76_v6, %s1095_s12  ;;  %v136_v11 = vld [vmem:[#allocation0] sm:$0xf]   ;;  %s1125_s12 = smov 92  }
  0x14   :  { %v148_v12 = vld [vmem:[#allocation0] sm:$0xf]  }
  0x15   :  { %v160_v13 = vld [vmem:[#allocation0] sm:$0xf]  }
  0x16   :  { %89 = vrot.lane.b32.xlu0 %v88_v7, %s1096_s13  ;;  %v172_v14 = vld [vmem:[#allocation0] sm:$0xf]   ;;  %s1126_s13 = smov 91  }
  0x17   :  { %101 = vrot.lane.b32.xlu1 %v100_v8, %s1097_s14  ;;  %v184_v15 = vld [vmem:[#allocation0] sm:$0xf]   ;;  %s1127_s14 = smov 90  }
  0x18   :  { %v196_v16 = vld [vmem:[#allocation0] sm:$0xf]  }
  0x19   :  { %v208_v17 = vld [vmem:[#allocation0] sm:$0xf]  }
  0x1a   :  { %113 = vrot.lane.b32.xlu0 %v112_v9, %s1098_s15  ;;  %v220_v18 = vld [vmem:[#allocation0] sm:$0xf]   ;;  %s1128_s15 = smov 89  }
  0x1b   :  { %125 = vrot.lane.b32.xlu1 %v124_v10, %s1099_s16  ;;  %v232_v19 = vld [vmem:[#allocation0] sm:$0xf]   ;;  %s1129_s16 = smov 88  }
  0x1c   :  { %v244_v20 = vld [vmem:[#allocation0] sm:$0xf]  }
  0x1d   :  { %v256_v21 = vld [vmem:[#allocation0] sm:$0xf]  }
  0x1e   :  { %137 = vrot.lane.b32.xlu0 %v136_v11, %s1100_s17  ;;  %v268_v22 = vld [vmem:[#allocation0] sm:$0xf]   ;;  %s1130_s17 = smov 87  }
  0x1f   :  { %149 = vrot.lane.b32.xlu1 %v148_v12, %s1101_s18  ;;  %v280_v23 = vld [vmem:[#allocation0] sm:$0xf]   ;;  %s1131_s18 = smov 86  }
  0x20   :  { %v292_v24 = vld [vmem:[#allocation0] sm:$0xf]  }
  0x21   :  { %v304_v25 = vld [vmem:[#allocation0] sm:$0xf]  }
  0x22   :  { %161 = vrot.lane.b32.xlu0 %v160_v13, %s1102_s19  ;;  %v316_v26 = vld [vmem:[#allocation0] sm:$0xf]   ;;  %s1132_s19 = smov 85  }
  0x23   :  { %173 = vrot.lane.b32.xlu1 %v172_v14, %s1103_s20  ;;  %v328_v27 = vld [vmem:[#allocation0] sm:$0xf]   ;;  %s1133_s20 = smov 84  }
  0x24   :  { %v340_v28 = vld [vmem:[#allocation0] sm:$0xf]  }
  0x25   :  { %v352_v29 = vld [vmem:[#allocation0] sm:$0xf]  }
  0x26   :  { %185 = vrot.lane.b32.xlu0 %v184_v15, %s1104_s21  ;;  %v364_v30 = vld [vmem:[#allocation0] sm:$0xf]   ;;  %s1134_s21 = smov 83  }
  0x27   :  { %197 = vrot.lane.b32.xlu1 %v196_v16, %s1105_s22  ;;  %v376_v31 = vld [vmem:[#allocation0] sm:$0xf]   ;;  %s1135_s22 = smov 82  }
  0x28   :  { %v388_v32 = vld [vmem:[#allocation0] sm:$0xf]  }
  0x29   :  { %v400_v33 = vld [vmem:[#allocation0] sm:$0xf]  }
  0x2a   :  { %209 = vrot.lane.b32.xlu0 %v208_v17, %s1106_s23  ;;  %v412_v34 = vld [vmem:[#allocation0] sm:$0xf]   ;;  %s1136_s23 = smov 81  }
  0x2b   :  { %221 = vrot.lane.b32.xlu1 %v220_v18, %s1107_s24  ;;  %v424_v35 = vld [vmem:[#allocation0] sm:$0xf]   ;;  %s1137_s24 = smov 80  }
  0x2c   :  { %v436_v36 = vld [vmem:[#allocation0] sm:$0xf]  }
  0x2d   :  { %v448_v37 = vld [vmem:[#allocation0] sm:$0xf]  }
  0x2e   :  { %233 = vrot.lane.b32.xlu0 %v232_v19, %s1108_s25  ;;  %v460_v38 = vld [vmem:[#allocation0] sm:$0xf]   ;;  %s1138_s25 = smov 79  }
  0x2f   :  { %245 = vrot.lane.b32.xlu1 %v244_v20, %s1109_s26  ;;  %v472_v39 = vld [vmem:[#allocation0] sm:$0xf]   ;;  %s1139_s26 = smov 78  }
  0x30   :  { %v484_v40 = vld [vmem:[#allocation0] sm:$0xf]  }
  0x31   :  { %v496_v41 = vld [vmem:[#allocation0] sm:$0xf]  }
  0x32   :  { %257 = vrot.lane.b32.xlu0 %v256_v21, %s1110_s27  ;;  %v508_v42 = vld [vmem:[#allocation0] sm:$0xf]   ;;  %s1140_s27 = smov 77  }
  0x33   :  { %269 = vrot.lane.b32.xlu1 %v268_v22, %s1111_s28  ;;  %v520_v43 = vld [vmem:[#allocation0] sm:$0xf]   ;;  %s1141_s28 = smov 76  }
  0x34   :  { %v532_v44 = vld [vmem:[#allocation0] sm:$0xf]  }
  0x35   :  { %v544_v45 = vld [vmem:[#allocation0] sm:$0xf]  }
  0x36   :  { %281 = vrot.lane.b32.xlu0 %v280_v23, %s1112_s29  ;;  %v556_v46 = vld [vmem:[#allocation0] sm:$0xf]   ;;  %s1142_s29 = smov 75  }
  0x37   :  { %293 = vrot.lane.b32.xlu1 %v292_v24, %s1113_s30  ;;  %v568_v47 = vld [vmem:[#allocation0] sm:$0xf]   ;;  %s1143_s30 = smov 74  }
  0x38   :  { %v580_v48 = vld [vmem:[#allocation0] sm:$0xf]  }
  0x39   :  { %v592_v49 = vld [vmem:[#allocation0] sm:$0xf]  }
  0x3a   :  { %305 = vrot.lane.b32.xlu0 %v304_v25, %s1114_s2  ;;  %v604_v50 = vld [vmem:[#allocation0] sm:$0xf]   ;;  %s1144_s2 = smov 73  }
  0x3b   :  { %317 = vrot.lane.b32.xlu1 %v316_v26, %s1115_s3  ;;  %v616_v51 = vld [vmem:[#allocation0] sm:$0xf]   ;;  %s1145_s3 = smov 72  }
  0x3c   :  { %v628_v52 = vld [vmem:[#allocation0] sm:$0xf]  }
  0x3d   :  { %v640_v53 = vld [vmem:[#allocation0] sm:$0xf]  }
  0x3e   :  { %329 = vrot.lane.b32.xlu0 %v328_v27, %s1116_s4  ;;  %v652_v54 = vld [vmem:[#allocation0] sm:$0xf]  }
  0x3f   :  { %341 = vrot.lane.b32.xlu1 %v340_v28, %s1117_s5  ;;  %v664_v55 = vld [vmem:[#allocation0] sm:$0xf]  }
  0x40   :  { %v676_v56 = vld [vmem:[#allocation0] sm:$0xf]  }
  0x41   :  { %v688_v57 = vld [vmem:[#allocation0] sm:$0xf]  }
  0x42   :  { %353 = vrot.lane.b32.xlu0 %v352_v29, %s1118_s6  ;;  %v700_v58 = vld [vmem:[#allocation0] sm:$0xf]   ;;  %s1152_s6 = smov 65  }
  0x43   :  { %365 = vrot.lane.b32.xlu1 %v364_v30, %s1119_s7  ;;  %v7_v59 = vld [vmem:[#allocation0] sm:$0xf]  }
  0x44   :  { %9 = vst.msk [vmem:[%s2191_s1] sm:$0x1] %vm8_vm0, %v7_v59   ;;  %772 = vst.msk [vmem:[%s2191_s1 + $0x3f] sm:$0x2] %vm8_vm0, %v7_v59   ;;  %v712_v60 = vld [vmem:[#allocation0] sm:$0xf]  }
  0x45   :  { %773 = vst.msk [vmem:[%s2191_s1 + $0x7e] sm:$0x4] %vm8_vm0, %v7_v59   ;;  %774 = vst.msk [vmem:[%s2191_s1 + $0xbd] sm:$0x8] %vm8_vm0, %v7_v59   ;;  %v724_v61 = vld [vmem:[#allocation0] sm:$0xf]  }
  0x46   :  { %377 = vrot.lane.b32.xlu0 %v376_v31, %s1120_s0  ;;  %v736_v0 = vld [vmem:[#allocation0] sm:$0xf]  }
  0x47   :  { %389 = vrot.lane.b32.xlu1 %v388_v32, %s1121_s8  ;;  %v748_v1 = vld [vmem:[#allocation0] sm:$0xf]  }
  0x48   :  { %v760_v4 = vld [vmem:[#allocation0] sm:$0xf]  }
  0x4a   :  { %401 = vrot.lane.b32.xlu0 %v400_v33, %s1122_s9 }
  0x4b   :  { %413 = vrot.lane.b32.xlu1 %v412_v34, %s1123_s10 }
  0x4e   :  { %425 = vrot.lane.b32.xlu0 %v424_v35, %s1124_s11  ;;  %s1146_s11 = smov 71  }
  0x4f   :  { %437 = vrot.lane.b32.xlu1 %v436_v36, %s1125_s12  ;;  %s1147_s12 = smov 70  }
  0x52   :  { %449 = vrot.lane.b32.xlu0 %v448_v37, %s1126_s13 }
  0x53   :  { %461 = vrot.lane.b32.xlu1 %v460_v38, %s1127_s14 }
  0x56   :  { %473 = vrot.lane.b32.xlu0 %v472_v39, %s1128_s15 }
  0x57   :  { %485 = vrot.lane.b32.xlu1 %v484_v40, %s1129_s16 }
  0x5a   :  { %497 = vrot.lane.b32.xlu0 %v496_v41, %s1130_s17  ;;  %s1150_s17 = smov 67  }
  0x5b   :  { %509 = vrot.lane.b32.xlu1 %v508_v42, %s1131_s18  ;;  %s1151_s18 = smov 66  }
  0x5e   :  { %521 = vrot.lane.b32.xlu0 %v520_v43, %s1132_s19 }
  0x5f   :  { %533 = vrot.lane.b32.xlu1 %v532_v44, %s1133_s20 }
  0x62   :  { %545 = vrot.lane.b32.xlu0 %v544_v45, %s1134_s21 }
  0x63   :  { %557 = vrot.lane.b32.xlu1 %v556_v46, %s1135_s22 }
  0x66   :  { %569 = vrot.lane.b32.xlu0 %v568_v47, %s1136_s23 }
  0x67   :  { %581 = vrot.lane.b32.xlu1 %v580_v48, %s1137_s24 }
  0x6a   :  { %593 = vrot.lane.b32.xlu0 %v592_v49, %s1138_s25 }
  0x6b   :  { %605 = vrot.lane.b32.xlu1 %v604_v50, %s1139_s26 }
  0x6e   :  { %617 = vrot.lane.b32.xlu0 %v616_v51, %s1140_s27 }
  0x6f   :  { %629 = vrot.lane.b32.xlu1 %v628_v52, %s1141_s28 }
  0x72   :  { %641 = vrot.lane.b32.xlu0 %v640_v53, %s1142_s29  ;;  %s1148_s29 = smov 69  }
  0x73   :  { %653 = vrot.lane.b32.xlu1 %v652_v54, %s1143_s30  ;;  %s1149_s30 = smov 68  }
  0x76   :  { %665 = vrot.lane.b32.xlu0 %v664_v55, %s1144_s2 }
  0x77   :  { %677 = vrot.lane.b32.xlu1 %v676_v56, %s1145_s3 }
  0x7a   :  { %689 = vrot.lane.b32.xlu0 %v688_v57, %s1146_s11 }
  0x7b   :  { %701 = vrot.lane.b32.xlu1 %v700_v58, %s1147_s12 }
  0x7c   :  { %v18_v62 = vpop.permute.xlu0 %17  }
  0x7d   :  { %v42_v63 = vpop.permute.xlu1 %41   ;;  %775 = vst.msk [vmem:[%s2191_s1 + $0x1] sm:$0x1] %vm8_vm0, %v18_v62   ;;  %776 = vst.msk [vmem:[%s2191_s1 + $0x40] sm:$0x2] %vm8_vm0, %v18_v62  }
  0x7e   :  { %777 = vst.msk [vmem:[%s2191_s1 + $0x7f] sm:$0x4] %vm8_vm0, %v18_v62   ;;  %778 = vst.msk [vmem:[%s2191_s1 + $0xbe] sm:$0x8] %vm8_vm0, %v18_v62   ;;  %713 = vrot.lane.b32.xlu0 %v712_v60, %s1148_s29 }
  0x7f   :  { %783 = vst.msk [vmem:[%s2191_s1 + $0x3] sm:$0x1] %vm8_vm0, %v42_v63   ;;  %784 = vst.msk [vmem:[%s2191_s1 + $0x42] sm:$0x2] %vm8_vm0, %v42_v63   ;;  %725 = vrot.lane.b32.xlu1 %v724_v61, %s1149_s30 }
  0x80   :  { %785 = vst.msk [vmem:[%s2191_s1 + $0x81] sm:$0x4] %vm8_vm0, %v42_v63   ;;  %786 = vst.msk [vmem:[%s2191_s1 + $0xc0] sm:$0x8] %vm8_vm0, %v42_v63   ;;  %v30_v2 = vpop.permute.xlu0 %29  }
  0x81   :  { %v54_v3 = vpop.permute.xlu1 %53   ;;  %779 = vst.msk [vmem:[%s2191_s1 + $0x2] sm:$0x1] %vm8_vm0, %v30_v2   ;;  %780 = vst.msk [vmem:[%s2191_s1 + $0x41] sm:$0x2] %vm8_vm0, %v30_v2  }
  0x82   :  { %781 = vst.msk [vmem:[%s2191_s1 + $0x80] sm:$0x4] %vm8_vm0, %v30_v2   ;;  %782 = vst.msk [vmem:[%s2191_s1 + $0xbf] sm:$0x8] %vm8_vm0, %v30_v2   ;;  %737 = vrot.lane.b32.xlu0 %v736_v0, %s1150_s17 }
  0x83   :  { %787 = vst.msk [vmem:[%s2191_s1 + $0x4] sm:$0x1] %vm8_vm0, %v54_v3   ;;  %788 = vst.msk [vmem:[%s2191_s1 + $0x43] sm:$0x2] %vm8_vm0, %v54_v3   ;;  %749 = vrot.lane.b32.xlu1 %v748_v1, %s1151_s18 }
  0x84   :  { %789 = vst.msk [vmem:[%s2191_s1 + $0x82] sm:$0x4] %vm8_vm0, %v54_v3   ;;  %790 = vst.msk [vmem:[%s2191_s1 + $0xc1] sm:$0x8] %vm8_vm0, %v54_v3   ;;  %v66_v5 = vpop.permute.xlu0 %65  }
  0x85   :  { %v78_v6 = vpop.permute.xlu1 %77   ;;  %791 = vst.msk [vmem:[%s2191_s1 + $0x5] sm:$0x1] %vm8_vm0, %v66_v5   ;;  %792 = vst.msk [vmem:[%s2191_s1 + $0x44] sm:$0x2] %vm8_vm0, %v66_v5  }
  0x86   :  { %793 = vst.msk [vmem:[%s2191_s1 + $0x83] sm:$0x4] %vm8_vm0, %v66_v5   ;;  %794 = vst.msk [vmem:[%s2191_s1 + $0xc2] sm:$0x8] %vm8_vm0, %v66_v5   ;;  %761 = vrot.lane.b32.xlu0 %v760_v4, %s1152_s6 }
  0x87   :  { %795 = vst.msk [vmem:[%s2191_s1 + $0x6] sm:$0x1] %vm8_vm0, %v78_v6   ;;  %796 = vst.msk [vmem:[%s2191_s1 + $0x45] sm:$0x2] %vm8_vm0, %v78_v6  }
  0x88   :  { %797 = vst.msk [vmem:[%s2191_s1 + $0x84] sm:$0x4] %vm8_vm0, %v78_v6   ;;  %798 = vst.msk [vmem:[%s2191_s1 + $0xc3] sm:$0x8] %vm8_vm0, %v78_v6   ;;  %v90_v7 = vpop.permute.xlu0 %89  }
  0x89   :  { %v102_v8 = vpop.permute.xlu1 %101   ;;  %799 = vst.msk [vmem:[%s2191_s1 + $0x7] sm:$0x1] %vm8_vm0, %v90_v7   ;;  %800 = vst.msk [vmem:[%s2191_s1 + $0x46] sm:$0x2] %vm8_vm0, %v90_v7  }
  0x8a   :  { %801 = vst.msk [vmem:[%s2191_s1 + $0x85] sm:$0x4] %vm8_vm0, %v90_v7   ;;  %802 = vst.msk [vmem:[%s2191_s1 + $0xc4] sm:$0x8] %vm8_vm0, %v90_v7  }
  0x8b   :  { %803 = vst.msk [vmem:[%s2191_s1 + $0x8] sm:$0x1] %vm8_vm0, %v102_v8   ;;  %804 = vst.msk [vmem:[%s2191_s1 + $0x47] sm:$0x2] %vm8_vm0, %v102_v8  }
  0x8c   :  { %805 = vst.msk [vmem:[%s2191_s1 + $0x86] sm:$0x4] %vm8_vm0, %v102_v8   ;;  %806 = vst.msk [vmem:[%s2191_s1 + $0xc5] sm:$0x8] %vm8_vm0, %v102_v8   ;;  %v114_v9 = vpop.permute.xlu0 %113  }
  0x8d   :  { %v126_v10 = vpop.permute.xlu1 %125   ;;  %807 = vst.msk [vmem:[%s2191_s1 + $0x9] sm:$0x1] %vm8_vm0, %v114_v9   ;;  %808 = vst.msk [vmem:[%s2191_s1 + $0x48] sm:$0x2] %vm8_vm0, %v114_v9  }
  0x8e   :  { %809 = vst.msk [vmem:[%s2191_s1 + $0x87] sm:$0x4] %vm8_vm0, %v114_v9   ;;  %810 = vst.msk [vmem:[%s2191_s1 + $0xc6] sm:$0x8] %vm8_vm0, %v114_v9  }
  0x8f   :  { %811 = vst.msk [vmem:[%s2191_s1 + $0xa] sm:$0x1] %vm8_vm0, %v126_v10   ;;  %812 = vst.msk [vmem:[%s2191_s1 + $0x49] sm:$0x2] %vm8_vm0, %v126_v10  }
  0x90   :  { %813 = vst.msk [vmem:[%s2191_s1 + $0x88] sm:$0x4] %vm8_vm0, %v126_v10   ;;  %814 = vst.msk [vmem:[%s2191_s1 + $0xc7] sm:$0x8] %vm8_vm0, %v126_v10   ;;  %v138_v11 = vpop.permute.xlu0 %137  }
  0x91   :  { %v150_v12 = vpop.permute.xlu1 %149   ;;  %815 = vst.msk [vmem:[%s2191_s1 + $0xb] sm:$0x1] %vm8_vm0, %v138_v11   ;;  %816 = vst.msk [vmem:[%s2191_s1 + $0x4a] sm:$0x2] %vm8_vm0, %v138_v11  }
  0x92   :  { %817 = vst.msk [vmem:[%s2191_s1 + $0x89] sm:$0x4] %vm8_vm0, %v138_v11   ;;  %818 = vst.msk [vmem:[%s2191_s1 + $0xc8] sm:$0x8] %vm8_vm0, %v138_v11  }
  0x93   :  { %819 = vst.msk [vmem:[%s2191_s1 + $0xc] sm:$0x1] %vm8_vm0, %v150_v12   ;;  %820 = vst.msk [vmem:[%s2191_s1 + $0x4b] sm:$0x2] %vm8_vm0, %v150_v12  }
  0x94   :  { %821 = vst.msk [vmem:[%s2191_s1 + $0x8a] sm:$0x4] %vm8_vm0, %v150_v12   ;;  %822 = vst.msk [vmem:[%s2191_s1 + $0xc9] sm:$0x8] %vm8_vm0, %v150_v12   ;;  %v162_v13 = vpop.permute.xlu0 %161  }
  0x95   :  { %v174_v14 = vpop.permute.xlu1 %173   ;;  %823 = vst.msk [vmem:[%s2191_s1 + $0xd] sm:$0x1] %vm8_vm0, %v162_v13   ;;  %824 = vst.msk [vmem:[%s2191_s1 + $0x4c] sm:$0x2] %vm8_vm0, %v162_v13  }
  0x96   :  { %825 = vst.msk [vmem:[%s2191_s1 + $0x8b] sm:$0x4] %vm8_vm0, %v162_v13   ;;  %826 = vst.msk [vmem:[%s2191_s1 + $0xca] sm:$0x8] %vm8_vm0, %v162_v13  }
  0x97   :  { %827 = vst.msk [vmem:[%s2191_s1 + $0xe] sm:$0x1] %vm8_vm0, %v174_v14   ;;  %828 = vst.msk [vmem:[%s2191_s1 + $0x4d] sm:$0x2] %vm8_vm0, %v174_v14  }
  0x98   :  { %829 = vst.msk [vmem:[%s2191_s1 + $0x8c] sm:$0x4] %vm8_vm0, %v174_v14   ;;  %830 = vst.msk [vmem:[%s2191_s1 + $0xcb] sm:$0x8] %vm8_vm0, %v174_v14   ;;  %v186_v15 = vpop.permute.xlu0 %185  }
  0x99   :  { %v198_v16 = vpop.permute.xlu1 %197   ;;  %831 = vst.msk [vmem:[%s2191_s1 + $0xf] sm:$0x1] %vm8_vm0, %v186_v15   ;;  %832 = vst.msk [vmem:[%s2191_s1 + $0x4e] sm:$0x2] %vm8_vm0, %v186_v15  }
  0x9a   :  { %833 = vst.msk [vmem:[%s2191_s1 + $0x8d] sm:$0x4] %vm8_vm0, %v186_v15   ;;  %834 = vst.msk [vmem:[%s2191_s1 + $0xcc] sm:$0x8] %vm8_vm0, %v186_v15  }
  0x9b   :  { %835 = vst.msk [vmem:[%s2191_s1 + $0x10] sm:$0x1] %vm8_vm0, %v198_v16   ;;  %836 = vst.msk [vmem:[%s2191_s1 + $0x4f] sm:$0x2] %vm8_vm0, %v198_v16  }
  0x9c   :  { %837 = vst.msk [vmem:[%s2191_s1 + $0x8e] sm:$0x4] %vm8_vm0, %v198_v16   ;;  %838 = vst.msk [vmem:[%s2191_s1 + $0xcd] sm:$0x8] %vm8_vm0, %v198_v16   ;;  %v210_v17 = vpop.permute.xlu0 %209  }
  0x9d   :  { %v222_v18 = vpop.permute.xlu1 %221   ;;  %839 = vst.msk [vmem:[%s2191_s1 + $0x11] sm:$0x1] %vm8_vm0, %v210_v17   ;;  %840 = vst.msk [vmem:[%s2191_s1 + $0x50] sm:$0x2] %vm8_vm0, %v210_v17  }
  0x9e   :  { %841 = vst.msk [vmem:[%s2191_s1 + $0x8f] sm:$0x4] %vm8_vm0, %v210_v17   ;;  %842 = vst.msk [vmem:[%s2191_s1 + $0xce] sm:$0x8] %vm8_vm0, %v210_v17  }
  0x9f   :  { %843 = vst.msk [vmem:[%s2191_s1 + $0x12] sm:$0x1] %vm8_vm0, %v222_v18   ;;  %844 = vst.msk [vmem:[%s2191_s1 + $0x51] sm:$0x2] %vm8_vm0, %v222_v18  }
  0xa0   :  { %845 = vst.msk [vmem:[%s2191_s1 + $0x90] sm:$0x4] %vm8_vm0, %v222_v18   ;;  %846 = vst.msk [vmem:[%s2191_s1 + $0xcf] sm:$0x8] %vm8_vm0, %v222_v18   ;;  %v234_v19 = vpop.permute.xlu0 %233  }
  0xa1   :  { %v246_v20 = vpop.permute.xlu1 %245   ;;  %847 = vst.msk [vmem:[%s2191_s1 + $0x13] sm:$0x1] %vm8_vm0, %v234_v19   ;;  %848 = vst.msk [vmem:[%s2191_s1 + $0x52] sm:$0x2] %vm8_vm0, %v234_v19  }
  0xa2   :  { %849 = vst.msk [vmem:[%s2191_s1 + $0x91] sm:$0x4] %vm8_vm0, %v234_v19   ;;  %850 = vst.msk [vmem:[%s2191_s1 + $0xd0] sm:$0x8] %vm8_vm0, %v234_v19  }
  0xa3   :  { %851 = vst.msk [vmem:[%s2191_s1 + $0x14] sm:$0x1] %vm8_vm0, %v246_v20   ;;  %852 = vst.msk [vmem:[%s2191_s1 + $0x53] sm:$0x2] %vm8_vm0, %v246_v20  }
  0xa4   :  { %853 = vst.msk [vmem:[%s2191_s1 + $0x92] sm:$0x4] %vm8_vm0, %v246_v20   ;;  %854 = vst.msk [vmem:[%s2191_s1 + $0xd1] sm:$0x8] %vm8_vm0, %v246_v20   ;;  %v258_v21 = vpop.permute.xlu0 %257  }
  0xa5   :  { %v270_v22 = vpop.permute.xlu1 %269   ;;  %855 = vst.msk [vmem:[%s2191_s1 + $0x15] sm:$0x1] %vm8_vm0, %v258_v21   ;;  %856 = vst.msk [vmem:[%s2191_s1 + $0x54] sm:$0x2] %vm8_vm0, %v258_v21  }
  0xa6   :  { %857 = vst.msk [vmem:[%s2191_s1 + $0x93] sm:$0x4] %vm8_vm0, %v258_v21   ;;  %858 = vst.msk [vmem:[%s2191_s1 + $0xd2] sm:$0x8] %vm8_vm0, %v258_v21  }
  0xa7   :  { %859 = vst.msk [vmem:[%s2191_s1 + $0x16] sm:$0x1] %vm8_vm0, %v270_v22   ;;  %860 = vst.msk [vmem:[%s2191_s1 + $0x55] sm:$0x2] %vm8_vm0, %v270_v22  }
  0xa8   :  { %861 = vst.msk [vmem:[%s2191_s1 + $0x94] sm:$0x4] %vm8_vm0, %v270_v22   ;;  %862 = vst.msk [vmem:[%s2191_s1 + $0xd3] sm:$0x8] %vm8_vm0, %v270_v22   ;;  %v282_v23 = vpop.permute.xlu0 %281  }
  0xa9   :  { %v294_v24 = vpop.permute.xlu1 %293   ;;  %863 = vst.msk [vmem:[%s2191_s1 + $0x17] sm:$0x1] %vm8_vm0, %v282_v23   ;;  %864 = vst.msk [vmem:[%s2191_s1 + $0x56] sm:$0x2] %vm8_vm0, %v282_v23  }
  0xaa   :  { %865 = vst.msk [vmem:[%s2191_s1 + $0x95] sm:$0x4] %vm8_vm0, %v282_v23   ;;  %866 = vst.msk [vmem:[%s2191_s1 + $0xd4] sm:$0x8] %vm8_vm0, %v282_v23  }
  0xab   :  { %867 = vst.msk [vmem:[%s2191_s1 + $0x18] sm:$0x1] %vm8_vm0, %v294_v24   ;;  %868 = vst.msk [vmem:[%s2191_s1 + $0x57] sm:$0x2] %vm8_vm0, %v294_v24  }
  0xac   :  { %869 = vst.msk [vmem:[%s2191_s1 + $0x96] sm:$0x4] %vm8_vm0, %v294_v24   ;;  %870 = vst.msk [vmem:[%s2191_s1 + $0xd5] sm:$0x8] %vm8_vm0, %v294_v24   ;;  %v306_v25 = vpop.permute.xlu0 %305  }
  0xad   :  { %v318_v26 = vpop.permute.xlu1 %317   ;;  %871 = vst.msk [vmem:[%s2191_s1 + $0x19] sm:$0x1] %vm8_vm0, %v306_v25   ;;  %872 = vst.msk [vmem:[%s2191_s1 + $0x58] sm:$0x2] %vm8_vm0, %v306_v25  }
  0xae   :  { %873 = vst.msk [vmem:[%s2191_s1 + $0x97] sm:$0x4] %vm8_vm0, %v306_v25   ;;  %874 = vst.msk [vmem:[%s2191_s1 + $0xd6] sm:$0x8] %vm8_vm0, %v306_v25  }
  0xaf   :  { %875 = vst.msk [vmem:[%s2191_s1 + $0x1a] sm:$0x1] %vm8_vm0, %v318_v26   ;;  %876 = vst.msk [vmem:[%s2191_s1 + $0x59] sm:$0x2] %vm8_vm0, %v318_v26  }
  0xb0   :  { %877 = vst.msk [vmem:[%s2191_s1 + $0x98] sm:$0x4] %vm8_vm0, %v318_v26   ;;  %878 = vst.msk [vmem:[%s2191_s1 + $0xd7] sm:$0x8] %vm8_vm0, %v318_v26   ;;  %v330_v27 = vpop.permute.xlu0 %329  }
  0xb1   :  { %v342_v28 = vpop.permute.xlu1 %341   ;;  %879 = vst.msk [vmem:[%s2191_s1 + $0x1b] sm:$0x1] %vm8_vm0, %v330_v27   ;;  %880 = vst.msk [vmem:[%s2191_s1 + $0x5a] sm:$0x2] %vm8_vm0, %v330_v27  }
  0xb2   :  { %881 = vst.msk [vmem:[%s2191_s1 + $0x99] sm:$0x4] %vm8_vm0, %v330_v27   ;;  %882 = vst.msk [vmem:[%s2191_s1 + $0xd8] sm:$0x8] %vm8_vm0, %v330_v27  }
  0xb3   :  { %883 = vst.msk [vmem:[%s2191_s1 + $0x1c] sm:$0x1] %vm8_vm0, %v342_v28   ;;  %884 = vst.msk [vmem:[%s2191_s1 + $0x5b] sm:$0x2] %vm8_vm0, %v342_v28  }
  0xb4   :  { %885 = vst.msk [vmem:[%s2191_s1 + $0x9a] sm:$0x4] %vm8_vm0, %v342_v28   ;;  %886 = vst.msk [vmem:[%s2191_s1 + $0xd9] sm:$0x8] %vm8_vm0, %v342_v28   ;;  %v354_v29 = vpop.permute.xlu0 %353  }
  0xb5   :  { %v366_v30 = vpop.permute.xlu1 %365   ;;  %887 = vst.msk [vmem:[%s2191_s1 + $0x1d] sm:$0x1] %vm8_vm0, %v354_v29   ;;  %888 = vst.msk [vmem:[%s2191_s1 + $0x5c] sm:$0x2] %vm8_vm0, %v354_v29  }
  0xb6   :  { %889 = vst.msk [vmem:[%s2191_s1 + $0x9b] sm:$0x4] %vm8_vm0, %v354_v29   ;;  %890 = vst.msk [vmem:[%s2191_s1 + $0xda] sm:$0x8] %vm8_vm0, %v354_v29  }
  0xb7   :  { %891 = vst.msk [vmem:[%s2191_s1 + $0x1e] sm:$0x1] %vm8_vm0, %v366_v30   ;;  %892 = vst.msk [vmem:[%s2191_s1 + $0x5d] sm:$0x2] %vm8_vm0, %v366_v30  }
  0xb8   :  { %893 = vst.msk [vmem:[%s2191_s1 + $0x9c] sm:$0x4] %vm8_vm0, %v366_v30   ;;  %894 = vst.msk [vmem:[%s2191_s1 + $0xdb] sm:$0x8] %vm8_vm0, %v366_v30   ;;  %v378_v31 = vpop.permute.xlu0 %377  }
  0xb9   :  { %v390_v32 = vpop.permute.xlu1 %389   ;;  %895 = vst.msk [vmem:[%s2191_s1 + $0x1f] sm:$0x1] %vm8_vm0, %v378_v31   ;;  %896 = vst.msk [vmem:[%s2191_s1 + $0x5e] sm:$0x2] %vm8_vm0, %v378_v31  }
  0xba   :  { %897 = vst.msk [vmem:[%s2191_s1 + $0x9d] sm:$0x4] %vm8_vm0, %v378_v31   ;;  %898 = vst.msk [vmem:[%s2191_s1 + $0xdc] sm:$0x8] %vm8_vm0, %v378_v31  }
  0xbb   :  { %899 = vst.msk [vmem:[%s2191_s1 + $0x20] sm:$0x1] %vm8_vm0, %v390_v32   ;;  %900 = vst.msk [vmem:[%s2191_s1 + $0x5f] sm:$0x2] %vm8_vm0, %v390_v32  }
  0xbc   :  { %901 = vst.msk [vmem:[%s2191_s1 + $0x9e] sm:$0x4] %vm8_vm0, %v390_v32   ;;  %902 = vst.msk [vmem:[%s2191_s1 + $0xdd] sm:$0x8] %vm8_vm0, %v390_v32   ;;  %v402_v33 = vpop.permute.xlu0 %401  }
  0xbd   :  { %v414_v34 = vpop.permute.xlu1 %413   ;;  %903 = vst.msk [vmem:[%s2191_s1 + $0x21] sm:$0x1] %vm8_vm0, %v402_v33   ;;  %904 = vst.msk [vmem:[%s2191_s1 + $0x60] sm:$0x2] %vm8_vm0, %v402_v33  }
  0xbe   :  { %905 = vst.msk [vmem:[%s2191_s1 + $0x9f] sm:$0x4] %vm8_vm0, %v402_v33   ;;  %906 = vst.msk [vmem:[%s2191_s1 + $0xde] sm:$0x8] %vm8_vm0, %v402_v33  }
  0xbf   :  { %907 = vst.msk [vmem:[%s2191_s1 + $0x22] sm:$0x1] %vm8_vm0, %v414_v34   ;;  %908 = vst.msk [vmem:[%s2191_s1 + $0x61] sm:$0x2] %vm8_vm0, %v414_v34  }
  0xc0   :  { %909 = vst.msk [vmem:[%s2191_s1 + $0xa0] sm:$0x4] %vm8_vm0, %v414_v34   ;;  %910 = vst.msk [vmem:[%s2191_s1 + $0xdf] sm:$0x8] %vm8_vm0, %v414_v34   ;;  %v426_v35 = vpop.permute.xlu0 %425  }
  0xc1   :  { %v438_v36 = vpop.permute.xlu1 %437   ;;  %911 = vst.msk [vmem:[%s2191_s1 + $0x23] sm:$0x1] %vm8_vm0, %v426_v35   ;;  %912 = vst.msk [vmem:[%s2191_s1 + $0x62] sm:$0x2] %vm8_vm0, %v426_v35  }
  0xc2   :  { %913 = vst.msk [vmem:[%s2191_s1 + $0xa1] sm:$0x4] %vm8_vm0, %v426_v35   ;;  %914 = vst.msk [vmem:[%s2191_s1 + $0xe0] sm:$0x8] %vm8_vm0, %v426_v35  }
  0xc3   :  { %915 = vst.msk [vmem:[%s2191_s1 + $0x24] sm:$0x1] %vm8_vm0, %v438_v36   ;;  %916 = vst.msk [vmem:[%s2191_s1 + $0x63] sm:$0x2] %vm8_vm0, %v438_v36  }
  0xc4   :  { %917 = vst.msk [vmem:[%s2191_s1 + $0xa2] sm:$0x4] %vm8_vm0, %v438_v36   ;;  %918 = vst.msk [vmem:[%s2191_s1 + $0xe1] sm:$0x8] %vm8_vm0, %v438_v36   ;;  %v450_v37 = vpop.permute.xlu0 %449  }
  0xc5   :  { %v462_v38 = vpop.permute.xlu1 %461   ;;  %919 = vst.msk [vmem:[%s2191_s1 + $0x25] sm:$0x1] %vm8_vm0, %v450_v37   ;;  %920 = vst.msk [vmem:[%s2191_s1 + $0x64] sm:$0x2] %vm8_vm0, %v450_v37  }
  0xc6   :  { %921 = vst.msk [vmem:[%s2191_s1 + $0xa3] sm:$0x4] %vm8_vm0, %v450_v37   ;;  %922 = vst.msk [vmem:[%s2191_s1 + $0xe2] sm:$0x8] %vm8_vm0, %v450_v37  }
  0xc7   :  { %923 = vst.msk [vmem:[%s2191_s1 + $0x26] sm:$0x1] %vm8_vm0, %v462_v38   ;;  %924 = vst.msk [vmem:[%s2191_s1 + $0x65] sm:$0x2] %vm8_vm0, %v462_v38  }
  0xc8   :  { %925 = vst.msk [vmem:[%s2191_s1 + $0xa4] sm:$0x4] %vm8_vm0, %v462_v38   ;;  %926 = vst.msk [vmem:[%s2191_s1 + $0xe3] sm:$0x8] %vm8_vm0, %v462_v38   ;;  %v474_v39 = vpop.permute.xlu0 %473  }
  0xc9   :  { %v486_v40 = vpop.permute.xlu1 %485   ;;  %927 = vst.msk [vmem:[%s2191_s1 + $0x27] sm:$0x1] %vm8_vm0, %v474_v39   ;;  %928 = vst.msk [vmem:[%s2191_s1 + $0x66] sm:$0x2] %vm8_vm0, %v474_v39  }
  0xca   :  { %929 = vst.msk [vmem:[%s2191_s1 + $0xa5] sm:$0x4] %vm8_vm0, %v474_v39   ;;  %930 = vst.msk [vmem:[%s2191_s1 + $0xe4] sm:$0x8] %vm8_vm0, %v474_v39  }
  0xcb   :  { %931 = vst.msk [vmem:[%s2191_s1 + $0x28] sm:$0x1] %vm8_vm0, %v486_v40   ;;  %932 = vst.msk [vmem:[%s2191_s1 + $0x67] sm:$0x2] %vm8_vm0, %v486_v40  }
  0xcc   :  { %933 = vst.msk [vmem:[%s2191_s1 + $0xa6] sm:$0x4] %vm8_vm0, %v486_v40   ;;  %934 = vst.msk [vmem:[%s2191_s1 + $0xe5] sm:$0x8] %vm8_vm0, %v486_v40   ;;  %v498_v41 = vpop.permute.xlu0 %497  }
  0xcd   :  { %v510_v42 = vpop.permute.xlu1 %509   ;;  %935 = vst.msk [vmem:[%s2191_s1 + $0x29] sm:$0x1] %vm8_vm0, %v498_v41   ;;  %936 = vst.msk [vmem:[%s2191_s1 + $0x68] sm:$0x2] %vm8_vm0, %v498_v41  }
  0xce   :  { %937 = vst.msk [vmem:[%s2191_s1 + $0xa7] sm:$0x4] %vm8_vm0, %v498_v41   ;;  %938 = vst.msk [vmem:[%s2191_s1 + $0xe6] sm:$0x8] %vm8_vm0, %v498_v41  }
  0xcf   :  { %939 = vst.msk [vmem:[%s2191_s1 + $0x2a] sm:$0x1] %vm8_vm0, %v510_v42   ;;  %940 = vst.msk [vmem:[%s2191_s1 + $0x69] sm:$0x2] %vm8_vm0, %v510_v42  }
  0xd0   :  { %941 = vst.msk [vmem:[%s2191_s1 + $0xa8] sm:$0x4] %vm8_vm0, %v510_v42   ;;  %942 = vst.msk [vmem:[%s2191_s1 + $0xe7] sm:$0x8] %vm8_vm0, %v510_v42   ;;  %v522_v43 = vpop.permute.xlu0 %521  }
  0xd1   :  { %v534_v44 = vpop.permute.xlu1 %533   ;;  %943 = vst.msk [vmem:[%s2191_s1 + $0x2b] sm:$0x1] %vm8_vm0, %v522_v43   ;;  %944 = vst.msk [vmem:[%s2191_s1 + $0x6a] sm:$0x2] %vm8_vm0, %v522_v43  }
  0xd2   :  { %945 = vst.msk [vmem:[%s2191_s1 + $0xa9] sm:$0x4] %vm8_vm0, %v522_v43   ;;  %946 = vst.msk [vmem:[%s2191_s1 + $0xe8] sm:$0x8] %vm8_vm0, %v522_v43  }
  0xd3   :  { %947 = vst.msk [vmem:[%s2191_s1 + $0x2c] sm:$0x1] %vm8_vm0, %v534_v44   ;;  %948 = vst.msk [vmem:[%s2191_s1 + $0x6b] sm:$0x2] %vm8_vm0, %v534_v44  }
  0xd4   :  { %949 = vst.msk [vmem:[%s2191_s1 + $0xaa] sm:$0x4] %vm8_vm0, %v534_v44   ;;  %950 = vst.msk [vmem:[%s2191_s1 + $0xe9] sm:$0x8] %vm8_vm0, %v534_v44   ;;  %v546_v45 = vpop.permute.xlu0 %545  }
  0xd5   :  { %v558_v46 = vpop.permute.xlu1 %557   ;;  %951 = vst.msk [vmem:[%s2191_s1 + $0x2d] sm:$0x1] %vm8_vm0, %v546_v45   ;;  %952 = vst.msk [vmem:[%s2191_s1 + $0x6c] sm:$0x2] %vm8_vm0, %v546_v45  }
  0xd6   :  { %953 = vst.msk [vmem:[%s2191_s1 + $0xab] sm:$0x4] %vm8_vm0, %v546_v45   ;;  %954 = vst.msk [vmem:[%s2191_s1 + $0xea] sm:$0x8] %vm8_vm0, %v546_v45  }
  0xd7   :  { %955 = vst.msk [vmem:[%s2191_s1 + $0x2e] sm:$0x1] %vm8_vm0, %v558_v46   ;;  %956 = vst.msk [vmem:[%s2191_s1 + $0x6d] sm:$0x2] %vm8_vm0, %v558_v46  }
  0xd8   :  { %957 = vst.msk [vmem:[%s2191_s1 + $0xac] sm:$0x4] %vm8_vm0, %v558_v46   ;;  %958 = vst.msk [vmem:[%s2191_s1 + $0xeb] sm:$0x8] %vm8_vm0, %v558_v46   ;;  %v570_v47 = vpop.permute.xlu0 %569  }
  0xd9   :  { %v582_v48 = vpop.permute.xlu1 %581   ;;  %959 = vst.msk [vmem:[%s2191_s1 + $0x2f] sm:$0x1] %vm8_vm0, %v570_v47   ;;  %960 = vst.msk [vmem:[%s2191_s1 + $0x6e] sm:$0x2] %vm8_vm0, %v570_v47  }
  0xda   :  { %961 = vst.msk [vmem:[%s2191_s1 + $0xad] sm:$0x4] %vm8_vm0, %v570_v47   ;;  %962 = vst.msk [vmem:[%s2191_s1 + $0xec] sm:$0x8] %vm8_vm0, %v570_v47  }
  0xdb   :  { %963 = vst.msk [vmem:[%s2191_s1 + $0x30] sm:$0x1] %vm8_vm0, %v582_v48   ;;  %964 = vst.msk [vmem:[%s2191_s1 + $0x6f] sm:$0x2] %vm8_vm0, %v582_v48  }
  0xdc   :  { %965 = vst.msk [vmem:[%s2191_s1 + $0xae] sm:$0x4] %vm8_vm0, %v582_v48   ;;  %966 = vst.msk [vmem:[%s2191_s1 + $0xed] sm:$0x8] %vm8_vm0, %v582_v48   ;;  %v594_v49 = vpop.permute.xlu0 %593  }
  0xdd   :  { %v606_v50 = vpop.permute.xlu1 %605   ;;  %967 = vst.msk [vmem:[%s2191_s1 + $0x31] sm:$0x1] %vm8_vm0, %v594_v49   ;;  %968 = vst.msk [vmem:[%s2191_s1 + $0x70] sm:$0x2] %vm8_vm0, %v594_v49  }
  0xde   :  { %969 = vst.msk [vmem:[%s2191_s1 + $0xaf] sm:$0x4] %vm8_vm0, %v594_v49   ;;  %970 = vst.msk [vmem:[%s2191_s1 + $0xee] sm:$0x8] %vm8_vm0, %v594_v49  }
  0xdf   :  { %971 = vst.msk [vmem:[%s2191_s1 + $0x32] sm:$0x1] %vm8_vm0, %v606_v50   ;;  %972 = vst.msk [vmem:[%s2191_s1 + $0x71] sm:$0x2] %vm8_vm0, %v606_v50  }
  0xe0   :  { %973 = vst.msk [vmem:[%s2191_s1 + $0xb0] sm:$0x4] %vm8_vm0, %v606_v50   ;;  %974 = vst.msk [vmem:[%s2191_s1 + $0xef] sm:$0x8] %vm8_vm0, %v606_v50   ;;  %v618_v51 = vpop.permute.xlu0 %617  }
  0xe1   :  { %v630_v52 = vpop.permute.xlu1 %629   ;;  %975 = vst.msk [vmem:[%s2191_s1 + $0x33] sm:$0x1] %vm8_vm0, %v618_v51   ;;  %976 = vst.msk [vmem:[%s2191_s1 + $0x72] sm:$0x2] %vm8_vm0, %v618_v51  }
  0xe2   :  { %977 = vst.msk [vmem:[%s2191_s1 + $0xb1] sm:$0x4] %vm8_vm0, %v618_v51   ;;  %978 = vst.msk [vmem:[%s2191_s1 + $0xf0] sm:$0x8] %vm8_vm0, %v618_v51  }
  0xe3   :  { %979 = vst.msk [vmem:[%s2191_s1 + $0x34] sm:$0x1] %vm8_vm0, %v630_v52   ;;  %980 = vst.msk [vmem:[%s2191_s1 + $0x73] sm:$0x2] %vm8_vm0, %v630_v52  }
  0xe4   :  { %981 = vst.msk [vmem:[%s2191_s1 + $0xb2] sm:$0x4] %vm8_vm0, %v630_v52   ;;  %982 = vst.msk [vmem:[%s2191_s1 + $0xf1] sm:$0x8] %vm8_vm0, %v630_v52   ;;  %v642_v53 = vpop.permute.xlu0 %641  }
  0xe5   :  { %v654_v54 = vpop.permute.xlu1 %653   ;;  %983 = vst.msk [vmem:[%s2191_s1 + $0x35] sm:$0x1] %vm8_vm0, %v642_v53   ;;  %984 = vst.msk [vmem:[%s2191_s1 + $0x74] sm:$0x2] %vm8_vm0, %v642_v53  }
  0xe6   :  { %985 = vst.msk [vmem:[%s2191_s1 + $0xb3] sm:$0x4] %vm8_vm0, %v642_v53   ;;  %986 = vst.msk [vmem:[%s2191_s1 + $0xf2] sm:$0x8] %vm8_vm0, %v642_v53  }
  0xe7   :  { %987 = vst.msk [vmem:[%s2191_s1 + $0x36] sm:$0x1] %vm8_vm0, %v654_v54   ;;  %988 = vst.msk [vmem:[%s2191_s1 + $0x75] sm:$0x2] %vm8_vm0, %v654_v54  }
  0xe8   :  { %989 = vst.msk [vmem:[%s2191_s1 + $0xb4] sm:$0x4] %vm8_vm0, %v654_v54   ;;  %990 = vst.msk [vmem:[%s2191_s1 + $0xf3] sm:$0x8] %vm8_vm0, %v654_v54   ;;  %v666_v55 = vpop.permute.xlu0 %665  }
  0xe9   :  { %v678_v56 = vpop.permute.xlu1 %677   ;;  %991 = vst.msk [vmem:[%s2191_s1 + $0x37] sm:$0x1] %vm8_vm0, %v666_v55   ;;  %992 = vst.msk [vmem:[%s2191_s1 + $0x76] sm:$0x2] %vm8_vm0, %v666_v55  }
  0xea   :  { %993 = vst.msk [vmem:[%s2191_s1 + $0xb5] sm:$0x4] %vm8_vm0, %v666_v55   ;;  %994 = vst.msk [vmem:[%s2191_s1 + $0xf4] sm:$0x8] %vm8_vm0, %v666_v55  }
  0xeb   :  { %995 = vst.msk [vmem:[%s2191_s1 + $0x38] sm:$0x1] %vm8_vm0, %v678_v56   ;;  %996 = vst.msk [vmem:[%s2191_s1 + $0x77] sm:$0x2] %vm8_vm0, %v678_v56  }
  0xec   :  { %997 = vst.msk [vmem:[%s2191_s1 + $0xb6] sm:$0x4] %vm8_vm0, %v678_v56   ;;  %998 = vst.msk [vmem:[%s2191_s1 + $0xf5] sm:$0x8] %vm8_vm0, %v678_v56   ;;  %v690_v57 = vpop.permute.xlu0 %689  }
  0xed   :  { %v702_v58 = vpop.permute.xlu1 %701   ;;  %999 = vst.msk [vmem:[%s2191_s1 + $0x39] sm:$0x1] %vm8_vm0, %v690_v57   ;;  %1000 = vst.msk [vmem:[%s2191_s1 + $0x78] sm:$0x2] %vm8_vm0, %v690_v57  }
  0xee   :  { %1001 = vst.msk [vmem:[%s2191_s1 + $0xb7] sm:$0x4] %vm8_vm0, %v690_v57   ;;  %1002 = vst.msk [vmem:[%s2191_s1 + $0xf6] sm:$0x8] %vm8_vm0, %v690_v57  }
  0xef   :  { %1003 = vst.msk [vmem:[%s2191_s1 + $0x3a] sm:$0x1] %vm8_vm0, %v702_v58   ;;  %1004 = vst.msk [vmem:[%s2191_s1 + $0x79] sm:$0x2] %vm8_vm0, %v702_v58  }
  0xf0   :  { %1005 = vst.msk [vmem:[%s2191_s1 + $0xb8] sm:$0x4] %vm8_vm0, %v702_v58   ;;  %1006 = vst.msk [vmem:[%s2191_s1 + $0xf7] sm:$0x8] %vm8_vm0, %v702_v58   ;;  %v714_v59 = vpop.permute.xlu0 %713  }
  0xf1   :  { %v726_v60 = vpop.permute.xlu1 %725   ;;  %1007 = vst.msk [vmem:[%s2191_s1 + $0x3b] sm:$0x1] %vm8_vm0, %v714_v59   ;;  %1008 = vst.msk [vmem:[%s2191_s1 + $0x7a] sm:$0x2] %vm8_vm0, %v714_v59  }
  0xf2   :  { %1009 = vst.msk [vmem:[%s2191_s1 + $0xb9] sm:$0x4] %vm8_vm0, %v714_v59   ;;  %1010 = vst.msk [vmem:[%s2191_s1 + $0xf8] sm:$0x8] %vm8_vm0, %v714_v59  }
  0xf3   :  { %1011 = vst.msk [vmem:[%s2191_s1 + $0x3c] sm:$0x1] %vm8_vm0, %v726_v60   ;;  %1012 = vst.msk [vmem:[%s2191_s1 + $0x7b] sm:$0x2] %vm8_vm0, %v726_v60  }
  0xf4   :  { %1013 = vst.msk [vmem:[%s2191_s1 + $0xba] sm:$0x4] %vm8_vm0, %v726_v60   ;;  %1014 = vst.msk [vmem:[%s2191_s1 + $0xf9] sm:$0x8] %vm8_vm0, %v726_v60   ;;  %v738_v61 = vpop.permute.xlu0 %737  }
  0xf5   :  { %v750_v62 = vpop.permute.xlu1 %749   ;;  %1015 = vst.msk [vmem:[%s2191_s1 + $0x3d] sm:$0x1] %vm8_vm0, %v738_v61   ;;  %1016 = vst.msk [vmem:[%s2191_s1 + $0x7c] sm:$0x2] %vm8_vm0, %v738_v61  }
  0xf6   :  { %1017 = vst.msk [vmem:[%s2191_s1 + $0xbb] sm:$0x4] %vm8_vm0, %v738_v61   ;;  %1018 = vst.msk [vmem:[%s2191_s1 + $0xfa] sm:$0x8] %vm8_vm0, %v738_v61  }
  0xf7   :  { %1019 = vst.msk [vmem:[%s2191_s1 + $0x3e] sm:$0x1] %vm8_vm0, %v750_v62   ;;  %1020 = vst.msk [vmem:[%s2191_s1 + $0x7d] sm:$0x2] %vm8_vm0, %v750_v62  }
  0xf8   :  { %1021 = vst.msk [vmem:[%s2191_s1 + $0xbc] sm:$0x4] %vm8_vm0, %v750_v62   ;;  %1022 = vst.msk [vmem:[%s2191_s1 + $0xfb] sm:$0x8] %vm8_vm0, %v750_v62   ;;  %v762_v63 = vpop.permute.xlu0 %761  }
  0xf9   :  { %1023 = vst.msk [vmem:[%s2191_s1 + $0x3f] sm:$0x1] %vm8_vm0, %v762_v63   ;;  %1024 = vst.msk [vmem:[%s2191_s1 + $0x7e] sm:$0x2] %vm8_vm0, %v762_v63  }
  0xfa   :  { %1025 = vst.msk [vmem:[%s2191_s1 + $0xbd] sm:$0x4] %vm8_vm0, %v762_v63   ;;  %1026 = vst.msk [vmem:[%s2191_s1 + $0xfc] sm:$0x8] %vm8_vm0, %v762_v63  }

// kernel: tile.56
= control target key start
LH: loop header
LB: loop body
LE: loop exit
PB: predicated region body
PF: predicated region fallthrough
CT: control target
= control target key end

     0   :  { %s22_s0 = inlined_call_operand.vmem [shape: f32[32], index: 0, kind: input, shape index: {}]   ;;  %s23_s1 = inlined_call_operand.vmem [shape: f32[4,32], index: 1, kind: output, shape index: {}]  }
   0x1   :  { %v4_v0 = vld [vmem:[%s22_s0] ss:$0 sm:$0xff] }
   0x2   :  { %5 = vst [vmem:[%s23_s1] sm:$0xf] %v4_v0 }

// kernel: tile.2
= control target key start
LH: loop header
LB: loop body
LE: loop exit
PB: predicated region body
PF: predicated region fallthrough
CT: control target
= control target key end

     0   :  { %s547_s8 = smov 125   ;;  %s548_s9 = smov 126   ;;  %vm8_vm0 = vcmask 7168   ;;  %s1102_s0 = inlined_call_operand.vmem [shape: f32[4,32], index: 0, kind: input, shape index: {}]   ;;  %s1103_s1 = inlined_call_operand.vmem [shape: f32[128,1], index: 1, kind: output, shape index: {}]  }
   0x1   :  { %v5_v0 = vld [vmem:[%s1102_s0] sm:$0xf]  ;;  %s546_s0 = smov 127   ;;  %s549_s10 = smov 124  }
   0x2   :  { %6 = vst [vmem:[#allocation0] sm:$0xf] %v5_v0  ;;  %s550_s11 = smov 123   ;;  %s551_s12 = smov 122  }
   0x3   :  { %s552_s13 = smov 121   ;;  %s553_s14 = smov 120  }
   0x4   :  { %s554_s15 = smov 119   ;;  %s555_s16 = smov 118  }
   0x5   :  { %s556_s17 = smov 117   ;;  %s557_s18 = smov 116  }
   0x6   :  { %s558_s19 = smov 115   ;;  %s559_s20 = smov 114  }
   0x7   :  { %s560_s21 = smov 113   ;;  %s561_s22 = smov 112  }
   0x8   :  { %s562_s23 = smov 111   ;;  %s563_s24 = smov 110  }
   0x9   :  { %v16_v1 = vld [vmem:[#allocation0] sm:$0xf]   ;;  %s564_s25 = smov 109   ;;  %s565_s26 = smov 108  }
   0xa   :  { %v40_v2 = vld [vmem:[#allocation0] sm:$0xf]   ;;  %17 = vrot.lane.b32.xlu0 %v16_v1, %s546_s0  ;;  %s566_s27 = smov 107   ;;  %s567_s28 = smov 106  }
   0xb   :  { %41 = vrot.lane.b32.xlu1 %v40_v2, %s547_s8  ;;  %v28_v3 = vld [vmem:[#allocation0] sm:$0xf]   ;;  %s568_s29 = smov 105   ;;  %s569_s30 = smov 104  }
   0xc   :  { %v52_v4 = vld [vmem:[#allocation0] sm:$0xf]  }
   0xd   :  { %v64_v5 = vld [vmem:[#allocation0] sm:$0xf]  }
   0xe   :  { %29 = vrot.lane.b32.xlu0 %v28_v3, %s548_s9  ;;  %v76_v6 = vld [vmem:[#allocation0] sm:$0xf]   ;;  %s570_s9 = smov 103  }
   0xf   :  { %53 = vrot.lane.b32.xlu1 %v52_v4, %s549_s10  ;;  %v88_v7 = vld [vmem:[#allocation0] sm:$0xf]   ;;  %s571_s10 = smov 102  }
  0x10   :  { %v100_v8 = vld [vmem:[#allocation0] sm:$0xf]  }
  0x11   :  { %v112_v9 = vld [vmem:[#allocation0] sm:$0xf]  }
  0x12   :  { %65 = vrot.lane.b32.xlu0 %v64_v5, %s550_s11  ;;  %v124_v10 = vld [vmem:[#allocation0] sm:$0xf]   ;;  %s572_s11 = smov 101  }
  0x13   :  { %77 = vrot.lane.b32.xlu1 %v76_v6, %s551_s12  ;;  %v136_v11 = vld [vmem:[#allocation0] sm:$0xf]   ;;  %s573_s12 = smov 100  }
  0x14   :  { %v148_v12 = vld [vmem:[#allocation0] sm:$0xf]  }
  0x15   :  { %v160_v13 = vld [vmem:[#allocation0] sm:$0xf]  }
  0x16   :  { %89 = vrot.lane.b32.xlu0 %v88_v7, %s552_s13  ;;  %v172_v14 = vld [vmem:[#allocation0] sm:$0xf]   ;;  %s574_s13 = smov 99  }
  0x17   :  { %101 = vrot.lane.b32.xlu1 %v100_v8, %s553_s14  ;;  %v184_v15 = vld [vmem:[#allocation0] sm:$0xf]   ;;  %s575_s14 = smov 98  }
  0x18   :  { %v196_v16 = vld [vmem:[#allocation0] sm:$0xf]  }
  0x19   :  { %v208_v17 = vld [vmem:[#allocation0] sm:$0xf]  }
  0x1a   :  { %113 = vrot.lane.b32.xlu0 %v112_v9, %s554_s15  ;;  %v220_v18 = vld [vmem:[#allocation0] sm:$0xf]   ;;  %s576_s15 = smov 97  }
  0x1b   :  { %125 = vrot.lane.b32.xlu1 %v124_v10, %s555_s16  ;;  %v232_v19 = vld [vmem:[#allocation0] sm:$0xf]  }
  0x1c   :  { %v244_v20 = vld [vmem:[#allocation0] sm:$0xf]  }
  0x1d   :  { %v256_v21 = vld [vmem:[#allocation0] sm:$0xf]  }
  0x1e   :  { %137 = vrot.lane.b32.xlu0 %v136_v11, %s556_s17  ;;  %v268_v22 = vld [vmem:[#allocation0] sm:$0xf]  }
  0x1f   :  { %149 = vrot.lane.b32.xlu1 %v148_v12, %s557_s18  ;;  %v280_v23 = vld [vmem:[#allocation0] sm:$0xf]  }
  0x20   :  { %v292_v24 = vld [vmem:[#allocation0] sm:$0xf]  }
  0x21   :  { %v304_v25 = vld [vmem:[#allocation0] sm:$0xf]  }
  0x22   :  { %161 = vrot.lane.b32.xlu0 %v160_v13, %s558_s19  ;;  %v316_v26 = vld [vmem:[#allocation0] sm:$0xf]  }
  0x23   :  { %173 = vrot.lane.b32.xlu1 %v172_v14, %s559_s20  ;;  %v7_v27 = vld [vmem:[#allocation0] sm:$0xf]  }
  0x24   :  { %9 = vst.msk [vmem:[%s1103_s1] sm:$0x1] %vm8_vm0, %v7_v27   ;;  %388 = vst.msk [vmem:[%s1103_s1 + $0x1f] sm:$0x2] %vm8_vm0, %v7_v27   ;;  %v328_v28 = vld [vmem:[#allocation0] sm:$0xf]  }
  0x25   :  { %389 = vst.msk [vmem:[%s1103_s1 + $0x3e] sm:$0x4] %vm8_vm0, %v7_v27   ;;  %390 = vst.msk [vmem:[%s1103_s1 + $0x5d] sm:$0x8] %vm8_vm0, %v7_v27   ;;  %v340_v29 = vld [vmem:[#allocation0] sm:$0xf]  }
  0x26   :  { %185 = vrot.lane.b32.xlu0 %v184_v15, %s560_s21  ;;  %v352_v30 = vld [vmem:[#allocation0] sm:$0xf]  }
  0x27   :  { %197 = vrot.lane.b32.xlu1 %v196_v16, %s561_s22  ;;  %v364_v31 = vld [vmem:[#allocation0] sm:$0xf]  }
  0x28   :  { %v376_v32 = vld [vmem:[#allocation0] sm:$0xf]  }
  0x2a   :  { %209 = vrot.lane.b32.xlu0 %v208_v17, %s562_s23 }
  0x2b   :  { %221 = vrot.lane.b32.xlu1 %v220_v18, %s563_s24 }
  0x2e   :  { %233 = vrot.lane.b32.xlu0 %v232_v19, %s564_s25 }
  0x2f   :  { %245 = vrot.lane.b32.xlu1 %v244_v20, %s565_s26 }
  0x32   :  { %257 = vrot.lane.b32.xlu0 %v256_v21, %s566_s27 }
  0x33   :  { %269 = vrot.lane.b32.xlu1 %v268_v22, %s567_s28 }
  0x36   :  { %281 = vrot.lane.b32.xlu0 %v280_v23, %s568_s29 }
  0x37   :  { %293 = vrot.lane.b32.xlu1 %v292_v24, %s569_s30 }
  0x3a   :  { %305 = vrot.lane.b32.xlu0 %v304_v25, %s570_s9 }
  0x3b   :  { %317 = vrot.lane.b32.xlu1 %v316_v26, %s571_s10 }
  0x3e   :  { %329 = vrot.lane.b32.xlu0 %v328_v28, %s572_s11 }
  0x3f   :  { %341 = vrot.lane.b32.xlu1 %v340_v29, %s573_s12 }
  0x42   :  { %353 = vrot.lane.b32.xlu0 %v352_v30, %s574_s13 }
  0x43   :  { %365 = vrot.lane.b32.xlu1 %v364_v31, %s575_s14 }
  0x46   :  { %377 = vrot.lane.b32.xlu0 %v376_v32, %s576_s15 }
  0x7c   :  { %v18_v33 = vpop.permute.xlu0 %17  }
  0x7d   :  { %v42_v34 = vpop.permute.xlu1 %41   ;;  %391 = vst.msk [vmem:[%s1103_s1 + $0x1] sm:$0x1] %vm8_vm0, %v18_v33   ;;  %392 = vst.msk [vmem:[%s1103_s1 + $0x20] sm:$0x2] %vm8_vm0, %v18_v33  }
  0x7e   :  { %393 = vst.msk [vmem:[%s1103_s1 + $0x3f] sm:$0x4] %vm8_vm0, %v18_v33   ;;  %394 = vst.msk [vmem:[%s1103_s1 + $0x5e] sm:$0x8] %vm8_vm0, %v18_v33  }
  0x7f   :  { %399 = vst.msk [vmem:[%s1103_s1 + $0x3] sm:$0x1] %vm8_vm0, %v42_v34   ;;  %400 = vst.msk [vmem:[%s1103_s1 + $0x22] sm:$0x2] %vm8_vm0, %v42_v34  }
  0x80   :  { %401 = vst.msk [vmem:[%s1103_s1 + $0x41] sm:$0x4] %vm8_vm0, %v42_v34   ;;  %402 = vst.msk [vmem:[%s1103_s1 + $0x60] sm:$0x8] %vm8_vm0, %v42_v34   ;;  %v30_v35 = vpop.permute.xlu0 %29  }
  0x81   :  { %v54_v36 = vpop.permute.xlu1 %53   ;;  %395 = vst.msk [vmem:[%s1103_s1 + $0x2] sm:$0x1] %vm8_vm0, %v30_v35   ;;  %396 = vst.msk [vmem:[%s1103_s1 + $0x21] sm:$0x2] %vm8_vm0, %v30_v35  }
  0x82   :  { %397 = vst.msk [vmem:[%s1103_s1 + $0x40] sm:$0x4] %vm8_vm0, %v30_v35   ;;  %398 = vst.msk [vmem:[%s1103_s1 + $0x5f] sm:$0x8] %vm8_vm0, %v30_v35  }
  0x83   :  { %403 = vst.msk [vmem:[%s1103_s1 + $0x4] sm:$0x1] %vm8_vm0, %v54_v36   ;;  %404 = vst.msk [vmem:[%s1103_s1 + $0x23] sm:$0x2] %vm8_vm0, %v54_v36  }
  0x84   :  { %405 = vst.msk [vmem:[%s1103_s1 + $0x42] sm:$0x4] %vm8_vm0, %v54_v36   ;;  %406 = vst.msk [vmem:[%s1103_s1 + $0x61] sm:$0x8] %vm8_vm0, %v54_v36   ;;  %v66_v37 = vpop.permute.xlu0 %65  }
  0x85   :  { %v78_v38 = vpop.permute.xlu1 %77   ;;  %407 = vst.msk [vmem:[%s1103_s1 + $0x5] sm:$0x1] %vm8_vm0, %v66_v37   ;;  %408 = vst.msk [vmem:[%s1103_s1 + $0x24] sm:$0x2] %vm8_vm0, %v66_v37  }
  0x86   :  { %409 = vst.msk [vmem:[%s1103_s1 + $0x43] sm:$0x4] %vm8_vm0, %v66_v37   ;;  %410 = vst.msk [vmem:[%s1103_s1 + $0x62] sm:$0x8] %vm8_vm0, %v66_v37  }
  0x87   :  { %411 = vst.msk [vmem:[%s1103_s1 + $0x6] sm:$0x1] %vm8_vm0, %v78_v38   ;;  %412 = vst.msk [vmem:[%s1103_s1 + $0x25] sm:$0x2] %vm8_vm0, %v78_v38  }
  0x88   :  { %413 = vst.msk [vmem:[%s1103_s1 + $0x44] sm:$0x4] %vm8_vm0, %v78_v38   ;;  %414 = vst.msk [vmem:[%s1103_s1 + $0x63] sm:$0x8] %vm8_vm0, %v78_v38   ;;  %v90_v39 = vpop.permute.xlu0 %89  }
  0x89   :  { %v102_v40 = vpop.permute.xlu1 %101   ;;  %415 = vst.msk [vmem:[%s1103_s1 + $0x7] sm:$0x1] %vm8_vm0, %v90_v39   ;;  %416 = vst.msk [vmem:[%s1103_s1 + $0x26] sm:$0x2] %vm8_vm0, %v90_v39  }
  0x8a   :  { %417 = vst.msk [vmem:[%s1103_s1 + $0x45] sm:$0x4] %vm8_vm0, %v90_v39   ;;  %418 = vst.msk [vmem:[%s1103_s1 + $0x64] sm:$0x8] %vm8_vm0, %v90_v39  }
  0x8b   :  { %419 = vst.msk [vmem:[%s1103_s1 + $0x8] sm:$0x1] %vm8_vm0, %v102_v40   ;;  %420 = vst.msk [vmem:[%s1103_s1 + $0x27] sm:$0x2] %vm8_vm0, %v102_v40  }
  0x8c   :  { %421 = vst.msk [vmem:[%s1103_s1 + $0x46] sm:$0x4] %vm8_vm0, %v102_v40   ;;  %422 = vst.msk [vmem:[%s1103_s1 + $0x65] sm:$0x8] %vm8_vm0, %v102_v40   ;;  %v114_v41 = vpop.permute.xlu0 %113  }
  0x8d   :  { %v126_v42 = vpop.permute.xlu1 %125   ;;  %423 = vst.msk [vmem:[%s1103_s1 + $0x9] sm:$0x1] %vm8_vm0, %v114_v41   ;;  %424 = vst.msk [vmem:[%s1103_s1 + $0x28] sm:$0x2] %vm8_vm0, %v114_v41  }
  0x8e   :  { %425 = vst.msk [vmem:[%s1103_s1 + $0x47] sm:$0x4] %vm8_vm0, %v114_v41   ;;  %426 = vst.msk [vmem:[%s1103_s1 + $0x66] sm:$0x8] %vm8_vm0, %v114_v41  }
  0x8f   :  { %427 = vst.msk [vmem:[%s1103_s1 + $0xa] sm:$0x1] %vm8_vm0, %v126_v42   ;;  %428 = vst.msk [vmem:[%s1103_s1 + $0x29] sm:$0x2] %vm8_vm0, %v126_v42  }
  0x90   :  { %429 = vst.msk [vmem:[%s1103_s1 + $0x48] sm:$0x4] %vm8_vm0, %v126_v42   ;;  %430 = vst.msk [vmem:[%s1103_s1 + $0x67] sm:$0x8] %vm8_vm0, %v126_v42   ;;  %v138_v43 = vpop.permute.xlu0 %137  }
  0x91   :  { %v150_v44 = vpop.permute.xlu1 %149   ;;  %431 = vst.msk [vmem:[%s1103_s1 + $0xb] sm:$0x1] %vm8_vm0, %v138_v43   ;;  %432 = vst.msk [vmem:[%s1103_s1 + $0x2a] sm:$0x2] %vm8_vm0, %v138_v43  }
  0x92   :  { %433 = vst.msk [vmem:[%s1103_s1 + $0x49] sm:$0x4] %vm8_vm0, %v138_v43   ;;  %434 = vst.msk [vmem:[%s1103_s1 + $0x68] sm:$0x8] %vm8_vm0, %v138_v43  }
  0x93   :  { %435 = vst.msk [vmem:[%s1103_s1 + $0xc] sm:$0x1] %vm8_vm0, %v150_v44   ;;  %436 = vst.msk [vmem:[%s1103_s1 + $0x2b] sm:$0x2] %vm8_vm0, %v150_v44  }
  0x94   :  { %437 = vst.msk [vmem:[%s1103_s1 + $0x4a] sm:$0x4] %vm8_vm0, %v150_v44   ;;  %438 = vst.msk [vmem:[%s1103_s1 + $0x69] sm:$0x8] %vm8_vm0, %v150_v44   ;;  %v162_v45 = vpop.permute.xlu0 %161  }
  0x95   :  { %v174_v46 = vpop.permute.xlu1 %173   ;;  %439 = vst.msk [vmem:[%s1103_s1 + $0xd] sm:$0x1] %vm8_vm0, %v162_v45   ;;  %440 = vst.msk [vmem:[%s1103_s1 + $0x2c] sm:$0x2] %vm8_vm0, %v162_v45  }
  0x96   :  { %441 = vst.msk [vmem:[%s1103_s1 + $0x4b] sm:$0x4] %vm8_vm0, %v162_v45   ;;  %442 = vst.msk [vmem:[%s1103_s1 + $0x6a] sm:$0x8] %vm8_vm0, %v162_v45  }
  0x97   :  { %443 = vst.msk [vmem:[%s1103_s1 + $0xe] sm:$0x1] %vm8_vm0, %v174_v46   ;;  %444 = vst.msk [vmem:[%s1103_s1 + $0x2d] sm:$0x2] %vm8_vm0, %v174_v46  }
  0x98   :  { %445 = vst.msk [vmem:[%s1103_s1 + $0x4c] sm:$0x4] %vm8_vm0, %v174_v46   ;;  %446 = vst.msk [vmem:[%s1103_s1 + $0x6b] sm:$0x8] %vm8_vm0, %v174_v46   ;;  %v186_v47 = vpop.permute.xlu0 %185  }
  0x99   :  { %v198_v48 = vpop.permute.xlu1 %197   ;;  %447 = vst.msk [vmem:[%s1103_s1 + $0xf] sm:$0x1] %vm8_vm0, %v186_v47   ;;  %448 = vst.msk [vmem:[%s1103_s1 + $0x2e] sm:$0x2] %vm8_vm0, %v186_v47  }
  0x9a   :  { %449 = vst.msk [vmem:[%s1103_s1 + $0x4d] sm:$0x4] %vm8_vm0, %v186_v47   ;;  %450 = vst.msk [vmem:[%s1103_s1 + $0x6c] sm:$0x8] %vm8_vm0, %v186_v47  }
  0x9b   :  { %451 = vst.msk [vmem:[%s1103_s1 + $0x10] sm:$0x1] %vm8_vm0, %v198_v48   ;;  %452 = vst.msk [vmem:[%s1103_s1 + $0x2f] sm:$0x2] %vm8_vm0, %v198_v48  }
  0x9c   :  { %453 = vst.msk [vmem:[%s1103_s1 + $0x4e] sm:$0x4] %vm8_vm0, %v198_v48   ;;  %454 = vst.msk [vmem:[%s1103_s1 + $0x6d] sm:$0x8] %vm8_vm0, %v198_v48   ;;  %v210_v49 = vpop.permute.xlu0 %209  }
  0x9d   :  { %v222_v50 = vpop.permute.xlu1 %221   ;;  %455 = vst.msk [vmem:[%s1103_s1 + $0x11] sm:$0x1] %vm8_vm0, %v210_v49   ;;  %456 = vst.msk [vmem:[%s1103_s1 + $0x30] sm:$0x2] %vm8_vm0, %v210_v49  }
  0x9e   :  { %457 = vst.msk [vmem:[%s1103_s1 + $0x4f] sm:$0x4] %vm8_vm0, %v210_v49   ;;  %458 = vst.msk [vmem:[%s1103_s1 + $0x6e] sm:$0x8] %vm8_vm0, %v210_v49  }
  0x9f   :  { %459 = vst.msk [vmem:[%s1103_s1 + $0x12] sm:$0x1] %vm8_vm0, %v222_v50   ;;  %460 = vst.msk [vmem:[%s1103_s1 + $0x31] sm:$0x2] %vm8_vm0, %v222_v50  }
  0xa0   :  { %461 = vst.msk [vmem:[%s1103_s1 + $0x50] sm:$0x4] %vm8_vm0, %v222_v50   ;;  %462 = vst.msk [vmem:[%s1103_s1 + $0x6f] sm:$0x8] %vm8_vm0, %v222_v50   ;;  %v234_v51 = vpop.permute.xlu0 %233  }
  0xa1   :  { %v246_v52 = vpop.permute.xlu1 %245   ;;  %463 = vst.msk [vmem:[%s1103_s1 + $0x13] sm:$0x1] %vm8_vm0, %v234_v51   ;;  %464 = vst.msk [vmem:[%s1103_s1 + $0x32] sm:$0x2] %vm8_vm0, %v234_v51  }
  0xa2   :  { %465 = vst.msk [vmem:[%s1103_s1 + $0x51] sm:$0x4] %vm8_vm0, %v234_v51   ;;  %466 = vst.msk [vmem:[%s1103_s1 + $0x70] sm:$0x8] %vm8_vm0, %v234_v51  }
  0xa3   :  { %467 = vst.msk [vmem:[%s1103_s1 + $0x14] sm:$0x1] %vm8_vm0, %v246_v52   ;;  %468 = vst.msk [vmem:[%s1103_s1 + $0x33] sm:$0x2] %vm8_vm0, %v246_v52  }
  0xa4   :  { %469 = vst.msk [vmem:[%s1103_s1 + $0x52] sm:$0x4] %vm8_vm0, %v246_v52   ;;  %470 = vst.msk [vmem:[%s1103_s1 + $0x71] sm:$0x8] %vm8_vm0, %v246_v52   ;;  %v258_v53 = vpop.permute.xlu0 %257  }
  0xa5   :  { %v270_v54 = vpop.permute.xlu1 %269   ;;  %471 = vst.msk [vmem:[%s1103_s1 + $0x15] sm:$0x1] %vm8_vm0, %v258_v53   ;;  %472 = vst.msk [vmem:[%s1103_s1 + $0x34] sm:$0x2] %vm8_vm0, %v258_v53  }
  0xa6   :  { %473 = vst.msk [vmem:[%s1103_s1 + $0x53] sm:$0x4] %vm8_vm0, %v258_v53   ;;  %474 = vst.msk [vmem:[%s1103_s1 + $0x72] sm:$0x8] %vm8_vm0, %v258_v53  }
  0xa7   :  { %475 = vst.msk [vmem:[%s1103_s1 + $0x16] sm:$0x1] %vm8_vm0, %v270_v54   ;;  %476 = vst.msk [vmem:[%s1103_s1 + $0x35] sm:$0x2] %vm8_vm0, %v270_v54  }
  0xa8   :  { %477 = vst.msk [vmem:[%s1103_s1 + $0x54] sm:$0x4] %vm8_vm0, %v270_v54   ;;  %478 = vst.msk [vmem:[%s1103_s1 + $0x73] sm:$0x8] %vm8_vm0, %v270_v54   ;;  %v282_v55 = vpop.permute.xlu0 %281  }
  0xa9   :  { %v294_v56 = vpop.permute.xlu1 %293   ;;  %479 = vst.msk [vmem:[%s1103_s1 + $0x17] sm:$0x1] %vm8_vm0, %v282_v55   ;;  %480 = vst.msk [vmem:[%s1103_s1 + $0x36] sm:$0x2] %vm8_vm0, %v282_v55  }
  0xaa   :  { %481 = vst.msk [vmem:[%s1103_s1 + $0x55] sm:$0x4] %vm8_vm0, %v282_v55   ;;  %482 = vst.msk [vmem:[%s1103_s1 + $0x74] sm:$0x8] %vm8_vm0, %v282_v55  }
  0xab   :  { %483 = vst.msk [vmem:[%s1103_s1 + $0x18] sm:$0x1] %vm8_vm0, %v294_v56   ;;  %484 = vst.msk [vmem:[%s1103_s1 + $0x37] sm:$0x2] %vm8_vm0, %v294_v56  }
  0xac   :  { %485 = vst.msk [vmem:[%s1103_s1 + $0x56] sm:$0x4] %vm8_vm0, %v294_v56   ;;  %486 = vst.msk [vmem:[%s1103_s1 + $0x75] sm:$0x8] %vm8_vm0, %v294_v56   ;;  %v306_v57 = vpop.permute.xlu0 %305  }
  0xad   :  { %v318_v58 = vpop.permute.xlu1 %317   ;;  %487 = vst.msk [vmem:[%s1103_s1 + $0x19] sm:$0x1] %vm8_vm0, %v306_v57   ;;  %488 = vst.msk [vmem:[%s1103_s1 + $0x38] sm:$0x2] %vm8_vm0, %v306_v57  }
  0xae   :  { %489 = vst.msk [vmem:[%s1103_s1 + $0x57] sm:$0x4] %vm8_vm0, %v306_v57   ;;  %490 = vst.msk [vmem:[%s1103_s1 + $0x76] sm:$0x8] %vm8_vm0, %v306_v57  }
  0xaf   :  { %491 = vst.msk [vmem:[%s1103_s1 + $0x1a] sm:$0x1] %vm8_vm0, %v318_v58   ;;  %492 = vst.msk [vmem:[%s1103_s1 + $0x39] sm:$0x2] %vm8_vm0, %v318_v58  }
  0xb0   :  { %493 = vst.msk [vmem:[%s1103_s1 + $0x58] sm:$0x4] %vm8_vm0, %v318_v58   ;;  %494 = vst.msk [vmem:[%s1103_s1 + $0x77] sm:$0x8] %vm8_vm0, %v318_v58   ;;  %v330_v59 = vpop.permute.xlu0 %329  }
  0xb1   :  { %v342_v60 = vpop.permute.xlu1 %341   ;;  %495 = vst.msk [vmem:[%s1103_s1 + $0x1b] sm:$0x1] %vm8_vm0, %v330_v59   ;;  %496 = vst.msk [vmem:[%s1103_s1 + $0x3a] sm:$0x2] %vm8_vm0, %v330_v59  }
  0xb2   :  { %497 = vst.msk [vmem:[%s1103_s1 + $0x59] sm:$0x4] %vm8_vm0, %v330_v59   ;;  %498 = vst.msk [vmem:[%s1103_s1 + $0x78] sm:$0x8] %vm8_vm0, %v330_v59  }
  0xb3   :  { %499 = vst.msk [vmem:[%s1103_s1 + $0x1c] sm:$0x1] %vm8_vm0, %v342_v60   ;;  %500 = vst.msk [vmem:[%s1103_s1 + $0x3b] sm:$0x2] %vm8_vm0, %v342_v60  }
  0xb4   :  { %501 = vst.msk [vmem:[%s1103_s1 + $0x5a] sm:$0x4] %vm8_vm0, %v342_v60   ;;  %502 = vst.msk [vmem:[%s1103_s1 + $0x79] sm:$0x8] %vm8_vm0, %v342_v60   ;;  %v354_v61 = vpop.permute.xlu0 %353  }
  0xb5   :  { %v366_v62 = vpop.permute.xlu1 %365   ;;  %503 = vst.msk [vmem:[%s1103_s1 + $0x1d] sm:$0x1] %vm8_vm0, %v354_v61   ;;  %504 = vst.msk [vmem:[%s1103_s1 + $0x3c] sm:$0x2] %vm8_vm0, %v354_v61  }
  0xb6   :  { %505 = vst.msk [vmem:[%s1103_s1 + $0x5b] sm:$0x4] %vm8_vm0, %v354_v61   ;;  %506 = vst.msk [vmem:[%s1103_s1 + $0x7a] sm:$0x8] %vm8_vm0, %v354_v61  }
  0xb7   :  { %507 = vst.msk [vmem:[%s1103_s1 + $0x1e] sm:$0x1] %vm8_vm0, %v366_v62   ;;  %508 = vst.msk [vmem:[%s1103_s1 + $0x3d] sm:$0x2] %vm8_vm0, %v366_v62  }
  0xb8   :  { %509 = vst.msk [vmem:[%s1103_s1 + $0x5c] sm:$0x4] %vm8_vm0, %v366_v62   ;;  %510 = vst.msk [vmem:[%s1103_s1 + $0x7b] sm:$0x8] %vm8_vm0, %v366_v62   ;;  %v378_v63 = vpop.permute.xlu0 %377  }
  0xb9   :  { %511 = vst.msk [vmem:[%s1103_s1 + $0x1f] sm:$0x1] %vm8_vm0, %v378_v63   ;;  %512 = vst.msk [vmem:[%s1103_s1 + $0x3e] sm:$0x2] %vm8_vm0, %v378_v63  }
  0xba   :  { %513 = vst.msk [vmem:[%s1103_s1 + $0x5d] sm:$0x4] %vm8_vm0, %v378_v63   ;;  %514 = vst.msk [vmem:[%s1103_s1 + $0x7c] sm:$0x8] %vm8_vm0, %v378_v63  }

// kernel: generator_forward.6
= control target key start
LH: loop header
LB: loop body
LE: loop exit
PB: predicated region body
PF: predicated region fallthrough
CT: control target
= control target key end

     0   :  { %s1464_s21 = smov 0   ;;  %s1466_s22 = smov 0   ;;  %s1780_s0 = inlined_call_operand.vmem [shape: f32[256,1], index: 0, kind: input, shape index: {}]   ;;  %s1781_s1 = inlined_call_operand.vmem [shape: f32[256,1], index: 1, kind: input, shape index: {}]   ;;  %s1782_s2 = inlined_call_operand.vmem [shape: bf16[4,32,256], index: 2, kind: input, shape index: {}]   ;;  %s1783_s3 = inlined_call_operand.vmem [shape: bf16[4,256,128], index: 3, kind: input, shape index: {}]   ;;  %s1784_s4 = inlined_call_operand.vmem [shape: bf16[4,32,128], index: 4, kind: output, shape index: {0}]   ;;  %s1785_s5 = inlined_call_operand.vmem [shape: f32[4,32,1], index: 5, kind: output, shape index: {1}]   ;;  %s1786_s6 = inlined_call_operand.vmem [shape: f32[4,32,1], index: 6, kind: output, shape index: {2}]  }
   0x1   :  { %s1468_s23 = smov 0  }
   0x2 LB: > { %s29_s24 = sadd.s32 1, %s1421_s22  ;;  %p1205_p0 = scmp.ge.s32.totalorder %s1425_s23, 1  ;;  %s1425_s23 = sphi %s1468_s23, %s17_s23   ;;  %s1421_s22 = sphi %s1466_s22, %s1788_s22   ;;  %s1417_s21 = sphi %s1464_s21, %s1787_s21  }
   0x3   : > { %p31_p1 = scmp.ge.s32.totalorder %s29_s24, 4  ;;  %p246_p2 = scmp.lt.s32.totalorder %s1425_s23, 5 }
   0x5   : > { %s1790_s24 = smov (%p31_p1, %s29_s24), 0  ;;  %p247_p3 = pnand %p1205_p0, %p246_p2 }
   0x6   : > { %p297_p4 = scmp.lt.s32.totalorder (!%p247_p3), %s1417_s21, 3 }
   0x7   : > { %250 = sbr.rel (%p247_p3) target bundleno = 625 (0x271), region = 36 }
   0xc   : > { %v423_v0 = vld [vmem:[%s1780_s0 + $0xf0] sm:$0xff]  ;;  %v1427_v2 = vmov 0   ;;  %v424_v3 = vld [vmem:[%s1780_s0 + $0xf8] sm:$0xff]  ;;  %v421_v9 = vld [vmem:[%s1780_s0 + $0xe0] sm:$0xff]  ;;  %s1792_s21 = smov (!%p297_p4, %s1417_s21), 3  ;;  %vm986_vm0 = vcmask 7168  }
   0xd   : > { %v407_v1 = vld [vmem:[%s1780_s0 + $0x70] sm:$0xff]  ;;  %1396 = vset.pattern.permute.xlu1 %v1427_v2  ;;  %1395 = vset.pattern.permute.xlu0 %v1427_v2  ;;  %v408_v4 = vld [vmem:[%s1780_s0 + $0x78] sm:$0xff]  ;;  %v422_v10 = vld [vmem:[%s1780_s0 + $0xe8] sm:$0xff]  ;;  %s1227_s29 = sshll.u32 %s1792_s21, 7  ;;  %s1688_s13 = sshll.u32 %s1792_s21, 5 }
   0xe   : > { %577 = vperm.xlu0 %1395, %v423_v0   ;;  %497 = vperm.xlu1 %1396, %v407_v1   ;;  %v647_v5 = vld [vmem:[%s1781_s1 + $0xf0] sm:$0xff]  ;;  %v648_v6 = vld [vmem:[%s1781_s1 + $0xf8] sm:$0xff]  ;;  %v406_v11 = vld [vmem:[%s1780_s0 + $0x68] sm:$0xff]  ;;  %s1678_s8 = scalar_lea.vmem %s1783_s3, %s1227_s29  ;;  %s1694_s16 = scalar_lea.vmem %s1782_s2, %s1688_s13 }
   0xf   : > { %v631_v7 = vld [vmem:[%s1781_s1 + $0x70] sm:$0xff]  ;;  %v632_v8 = vld [vmem:[%s1781_s1 + $0x78] sm:$0xff]  ;;  %v405_v12 = vld [vmem:[%s1780_s0 + $0x60] sm:$0xff]  ;;  %s1719_s19 = scalar_lea.vmem %s1785_s5, %s1688_s13  ;;  %s1725_s26 = scalar_lea.vmem %s1786_s6, %s1688_s13 }
  0x10   : > { %v646_v13 = vld [vmem:[%s1781_s1 + $0xe8] sm:$0xff]  ;;  %v645_v14 = vld [vmem:[%s1781_s1 + $0xe0] sm:$0xff]  ;;  %v420_v17 = vld [vmem:[%s1780_s0 + $0xd8] sm:$0xff]  ;;  %s1228_s27 = sshll.u32 %s1792_s21, 4 }
  0x11   : > { %v630_v15 = vld [vmem:[%s1781_s1 + $0x68] sm:$0xff]  ;;  %v629_v16 = vld [vmem:[%s1781_s1 + $0x60] sm:$0xff]  ;;  %v419_v18 = vld [vmem:[%s1780_s0 + $0xd0] sm:$0xff]  ;;  %s317_s30 = scalar_lea.vmem %s1784_s4, %s1228_s27 }
  0x12   : > { %582 = vperm.xlu0 %1395, %v424_v3   ;;  %502 = vperm.xlu1 %1396, %v408_v4   ;;  %v404_v19 = vld [vmem:[%s1780_s0 + $0x58] sm:$0xff]  ;;  %v403_v20 = vld [vmem:[%s1780_s0 + $0x50] sm:$0xff]  ;;  %v418_v25 = vld [vmem:[%s1780_s0 + $0xc8] sm:$0xff] }
  0x13   : > { %v644_v21 = vld [vmem:[%s1781_s1 + $0xd8] sm:$0xff]  ;;  %v643_v22 = vld [vmem:[%s1781_s1 + $0xd0] sm:$0xff]  ;;  %v417_v26 = vld [vmem:[%s1780_s0 + $0xc0] sm:$0xff] }
  0x14   : > { %v628_v23 = vld [vmem:[%s1781_s1 + $0x58] sm:$0xff]  ;;  %v627_v24 = vld [vmem:[%s1781_s1 + $0x50] sm:$0xff]  ;;  %v402_v27 = vld [vmem:[%s1780_s0 + $0x48] sm:$0xff] }
  0x15   : > { %v401_v28 = vld [vmem:[%s1780_s0 + $0x40] sm:$0xff]  ;;  %v642_v29 = vld [vmem:[%s1781_s1 + $0xc8] sm:$0xff]  ;;  %v416_v33 = vld [vmem:[%s1780_s0 + $0xb8] sm:$0xff] }
  0x16   : > { %801 = vperm.xlu0 %1395, %v647_v5   ;;  %806 = vperm.xlu1 %1396, %v648_v6   ;;  %v641_v30 = vld [vmem:[%s1781_s1 + $0xc0] sm:$0xff]  ;;  %v626_v31 = vld [vmem:[%s1781_s1 + $0x48] sm:$0xff]  ;;  %v415_v34 = vld [vmem:[%s1780_s0 + $0xb0] sm:$0xff] }
  0x17   : > { %v625_v32 = vld [vmem:[%s1781_s1 + $0x40] sm:$0xff]  ;;  %v400_v35 = vld [vmem:[%s1780_s0 + $0x38] sm:$0xff]  ;;  %v399_v36 = vld [vmem:[%s1780_s0 + $0x30] sm:$0xff] }
  0x18   : > { %v640_v37 = vld [vmem:[%s1781_s1 + $0xb8] sm:$0xff]  ;;  %v639_v38 = vld [vmem:[%s1781_s1 + $0xb0] sm:$0xff]  ;;  %v414_v41 = vld [vmem:[%s1780_s0 + $0xa8] sm:$0xff] }
  0x19   : > { %v624_v39 = vld [vmem:[%s1781_s1 + $0x38] sm:$0xff]  ;;  %v623_v40 = vld [vmem:[%s1781_s1 + $0x30] sm:$0xff]  ;;  %v413_v42 = vld [vmem:[%s1780_s0 + $0xa0] sm:$0xff] }
  0x1a   : > { %721 = vperm.xlu0 %1395, %v631_v7   ;;  %726 = vperm.xlu1 %1396, %v632_v8   ;;  %v398_v43 = vld [vmem:[%s1780_s0 + $0x28] sm:$0xff]  ;;  %v397_v44 = vld [vmem:[%s1780_s0 + $0x20] sm:$0xff]  ;;  %v412_v49 = vld [vmem:[%s1780_s0 + $0x98] sm:$0xff] }
  0x1b   : > { %v638_v45 = vld [vmem:[%s1781_s1 + $0xa8] sm:$0xff]  ;;  %v637_v46 = vld [vmem:[%s1781_s1 + $0xa0] sm:$0xff]  ;;  %v411_v50 = vld [vmem:[%s1780_s0 + $0x90] sm:$0xff] }
  0x1c   : > { %v622_v47 = vld [vmem:[%s1781_s1 + $0x28] sm:$0xff]  ;;  %v621_v48 = vld [vmem:[%s1781_s1 + $0x20] sm:$0xff]  ;;  %v396_v51 = vld [vmem:[%s1780_s0 + $0x18] sm:$0xff] }
  0x1d   : > { %v395_v52 = vld [vmem:[%s1780_s0 + $0x10] sm:$0xff]  ;;  %v636_v53 = vld [vmem:[%s1781_s1 + $0x98] sm:$0xff]  ;;  %v410_v57 = vld [vmem:[%s1780_s0 + $0x88] sm:$0xff] }
  0x1e   : > { %567 = vperm.xlu0 %1395, %v421_v9   ;;  %572 = vperm.xlu1 %1396, %v422_v10   ;;  %v635_v54 = vld [vmem:[%s1781_s1 + $0x90] sm:$0xff]  ;;  %v620_v55 = vld [vmem:[%s1781_s1 + $0x18] sm:$0xff]  ;;  %v409_v58 = vld [vmem:[%s1780_s0 + $0x80] sm:$0xff] }
  0x1f   : > { %v619_v56 = vld [vmem:[%s1781_s1 + $0x10] sm:$0xff]  ;;  %v394_v59 = vld [vmem:[%s1780_s0 + $0x8] sm:$0xff]  ;;  %v393_v60 = vld [vmem:[%s1780_s0] sm:$0xff] }
  0x20   : > { %v634_v61 = vld [vmem:[%s1781_s1 + $0x88] sm:$0xff]  ;;  %v633_v62 = vld [vmem:[%s1781_s1 + $0x80] sm:$0xff]  ;;  %v1323_v2 = vld [vmem:[%s1678_s8 + $0x78] sm:$0xff]  }
  0x21   : > { %v618_v63 = vld [vmem:[%s1781_s1 + $0x8] sm:$0xff]  ;;  %v617_v0 = vld [vmem:[%s1781_s1] sm:$0xff]  ;;  %v1297_v4 = vunpack.c.l.bf16 %v1323_v2  ;;  %v1315_v5 = vld [vmem:[%s1678_s8 + $0x38] sm:$0xff]   ;;  %v1298_v6 = vunpack.c.h.bf16 %v1323_v2 }
  0x22   : > { %492 = vperm.xlu1 %1396, %v406_v11   ;;  %487 = vperm.xlu0 %1395, %v405_v12   ;;  %v1399_v9 = vld [vmem:[%s1694_s16 + $0x4] ss:$8 sps:$4 sm:$0xff]   ;;  %v1402_v10 = vld [vmem:[%s1694_s16 + $0x14] ss:$8 sps:$4 sm:$0xff]   ;;  %v1265_v12 = vunpack.c.l.bf16 %v1315_v5 }
  0x23   : > { %945 = vmatprep.mubr.bf16.mxu0 %v1399_v9  ;;  %953 = vmatprep.mubr.bf16.mxu1 %v1402_v10 }
  0x26   : > { %796 = vperm.xlu1 %1396, %v646_v13   ;;  %791 = vperm.xlu0 %1395, %v645_v14   ;;  %v1266_v14 = vunpack.c.h.bf16 %v1315_v5 }
  0x2a   : > { %716 = vperm.xlu1 %1396, %v630_v15   ;;  %711 = vperm.xlu0 %1395, %v629_v16  }
  0x2e   : > { %562 = vperm.xlu1 %1396, %v420_v17   ;;  %557 = vperm.xlu0 %1395, %v419_v18  }
  0x32   : > { %482 = vperm.xlu1 %1396, %v404_v19   ;;  %477 = vperm.xlu0 %1395, %v403_v20  }
  0x36   : > { %786 = vperm.xlu1 %1396, %v644_v21   ;;  %781 = vperm.xlu0 %1395, %v643_v22  }
  0x3a   : > { %706 = vperm.xlu1 %1396, %v628_v23   ;;  %701 = vperm.xlu0 %1395, %v627_v24  }
  0x3e   : > { %552 = vperm.xlu1 %1396, %v418_v25   ;;  %547 = vperm.xlu0 %1395, %v417_v26  }
  0x42   : > { %472 = vperm.xlu1 %1396, %v402_v27   ;;  %467 = vperm.xlu0 %1395, %v401_v28  }
  0x46   : > { %776 = vperm.xlu1 %1396, %v642_v29   ;;  %771 = vperm.xlu0 %1395, %v641_v30  }
  0x4a   : > { %696 = vperm.xlu1 %1396, %v626_v31   ;;  %691 = vperm.xlu0 %1395, %v625_v32   ;;  %v1322_v31 = vld [vmem:[%s1678_s8 + $0x70] sm:$0xff]  }
  0x4e   : > { %542 = vperm.xlu1 %1396, %v416_v33   ;;  %537 = vperm.xlu0 %1395, %v415_v34   ;;  %v1293_v34 = vunpack.c.l.bf16 %v1322_v31 }
  0x52   : > { %462 = vperm.xlu1 %1396, %v400_v35   ;;  %457 = vperm.xlu0 %1395, %v399_v36   ;;  %v1294_v35 = vunpack.c.h.bf16 %v1322_v31 }
  0x56   : > { %766 = vperm.xlu1 %1396, %v640_v37   ;;  %761 = vperm.xlu0 %1395, %v639_v38   ;;  %v1314_v37 = vld [vmem:[%s1678_s8 + $0x30] sm:$0xff]  }
  0x5a   : > { %686 = vperm.xlu1 %1396, %v624_v39   ;;  %681 = vperm.xlu0 %1395, %v623_v40  }
  0x5e   : > { %532 = vperm.xlu1 %1396, %v414_v41   ;;  %527 = vperm.xlu0 %1395, %v413_v42   ;;  %v1262_v41 = vunpack.c.h.bf16 %v1314_v37  ;;  %v1261_v42 = vunpack.c.l.bf16 %v1314_v37 }
  0x62   : > { %452 = vperm.xlu1 %1396, %v398_v43   ;;  %447 = vperm.xlu0 %1395, %v397_v44  }
  0x66   : > { %756 = vperm.xlu1 %1396, %v638_v45   ;;  %751 = vperm.xlu0 %1395, %v637_v46  }
  0x6a   : > { %676 = vperm.xlu1 %1396, %v622_v47   ;;  %671 = vperm.xlu0 %1395, %v621_v48  }
  0x6e   : > { %522 = vperm.xlu1 %1396, %v412_v49   ;;  %517 = vperm.xlu0 %1395, %v411_v50  }
  0x72   : > { %442 = vperm.xlu1 %1396, %v396_v51   ;;  %437 = vperm.xlu0 %1395, %v395_v52  }
  0x76   : > { %746 = vperm.xlu1 %1396, %v636_v53   ;;  %741 = vperm.xlu0 %1395, %v635_v54  }
  0x7a   : > { %666 = vperm.xlu1 %1396, %v620_v55   ;;  %661 = vperm.xlu0 %1395, %v619_v56  }
  0x7e   : > { %512 = vperm.xlu1 %1396, %v410_v57   ;;  %507 = vperm.xlu0 %1395, %v409_v58  }
  0x82   : > { %432 = vperm.xlu1 %1396, %v394_v59   ;;  %427 = vperm.xlu0 %1395, %v393_v60   ;;  %v1321_v59 = vld [vmem:[%s1678_s8 + $0x68] sm:$0xff]  }
  0x86   : > { %736 = vperm.xlu1 %1396, %v634_v61   ;;  %731 = vperm.xlu0 %1395, %v633_v62   ;;  %v1290_v62 = vunpack.c.h.bf16 %v1321_v59 }
  0x89   : > { %v578_v1 = vpop.permute.xlu0 %577  ;;  %v498_v3 = vpop.permute.xlu1 %497 }
  0x8a   : > { %656 = vperm.xlu1 %1396, %v618_v63   ;;  %651 = vperm.xlu0 %1395, %v617_v0   ;;  %v615_v11 = vmul.f32 %v1297_v4, %v578_v1  ;;  %v599_v19 = vmul.f32 %v1265_v12, %v498_v3  ;;  %v1289_v63 = vunpack.c.l.bf16 %v1321_v59  ;;  %v1313_v1 = vld [vmem:[%s1678_s8 + $0x28] sm:$0xff]  }
  0x8b   : > { %v1258_v5 = vunpack.c.h.bf16 %v1313_v1 }
  0x8d   : > { %v583_v7 = vpop.permute.xlu0 %582  ;;  %v503_v8 = vpop.permute.xlu1 %502 }
  0x8e   : > { %v616_v13 = vmul.f32 %v1298_v6, %v583_v7  ;;  %v600_v20 = vmul.f32 %v1266_v14, %v503_v8  ;;  %v1257_v6 = vunpack.c.l.bf16 %v1313_v1 }
  0x91   : > { %v802_v15 = vpop.permute.xlu0 %801  ;;  %v807_v16 = vpop.permute.xlu1 %806 }
  0x92   : > { %v839_v17 = vadd.f32 %v802_v15, %v615_v11  ;;  %v840_v18 = vadd.f32 %v807_v16, %v616_v13 }
  0x94   : > { %v871_v21 = vmax.f32 %v839_v17, 0.0  ;;  %v872_v22 = vmax.f32 %v840_v18, 0.0 }
  0x95   : > { %v722_v23 = vpop.permute.xlu0 %721  ;;  %v727_v24 = vpop.permute.xlu1 %726 }
  0x96   : > { %v823_v25 = vadd.f32 %v722_v23, %v599_v19  ;;  %v824_v26 = vadd.f32 %v727_v24, %v600_v20  ;;  %v892_v27 = vpack.c.bf16 %v872_v22, %v871_v21  ;;  %v1320_v23 = vld [vmem:[%s1678_s8 + $0x60] sm:$0xff]  }
  0x98   : > { %v855_v28 = vmax.f32 %v823_v25, 0.0  ;;  %v856_v29 = vmax.f32 %v824_v26, 0.0  ;;  %1325 = vmatprep.subr.bf16.mxu0 %v892_v27  ;;  %1353 = vmatprep.subr.bf16.mxu1 %v892_v27  ;;  %v1286_v26 = vunpack.c.h.bf16 %v1320_v23  ;;  %v1285_v27 = vunpack.c.l.bf16 %v1320_v23 }
  0x99   : > { %v568_v30 = vpop.permute.xlu0 %567  ;;  %v573_v32 = vpop.permute.xlu1 %572 }
  0x9a   : > { %v884_v33 = vpack.c.bf16 %v856_v29, %v855_v28  ;;  %v613_v39 = vmul.f32 %v1293_v34, %v568_v30  ;;  %v614_v40 = vmul.f32 %v1294_v35, %v573_v32  ;;  %v1312_v29 = vld [vmem:[%s1678_s8 + $0x20] sm:$0xff]  }
  0x9b   : > { %v1253_v34 = vunpack.c.l.bf16 %v1312_v29 }
  0x9c   : > { %1326 = vmatpush3.bf16.msra.mxu0 %v884_v33  ;;  %1361 = vmatpush3.bf16.msra.mxu1 %v884_v33  ;;  %v1254_v33 = vunpack.c.h.bf16 %v1312_v29 }
  0x9d   : > { %v493_v36 = vpop.permute.xlu1 %492  ;;  %v488_v38 = vpop.permute.xlu0 %487 }
  0x9e   : > { %v598_v47 = vmul.f32 %v1262_v41, %v493_v36  ;;  %v597_v48 = vmul.f32 %v1261_v42, %v488_v38 }
  0xa1   : > { %v797_v43 = vpop.permute.xlu1 %796  ;;  %v792_v44 = vpop.permute.xlu0 %791 }
  0xa2   : > { %v838_v45 = vadd.f32 %v797_v43, %v614_v40  ;;  %v837_v46 = vadd.f32 %v792_v44, %v613_v39 }
  0xa4   : > { %v870_v49 = vmax.f32 %v838_v45, 0.0  ;;  %v869_v50 = vmax.f32 %v837_v46, 0.0 }
  0xa5   : > { %v717_v51 = vpop.permute.xlu1 %716  ;;  %v712_v52 = vpop.permute.xlu0 %711 }
  0xa6   : > { %v891_v53 = vpack.c.bf16 %v870_v49, %v869_v50  ;;  %v822_v54 = vadd.f32 %v717_v51, %v598_v47  ;;  %v821_v55 = vadd.f32 %v712_v52, %v597_v48  ;;  %v1319_v51 = vld [vmem:[%s1678_s8 + $0x58] sm:$0xff]  }
  0xa8   : > { %v854_v56 = vmax.f32 %v822_v54, 0.0  ;;  %v853_v57 = vmax.f32 %v821_v55, 0.0  ;;  %1327 = vmatprep.subr.bf16.mxu0 %v891_v53  ;;  %1354 = vmatprep.subr.bf16.mxu1 %v891_v53  ;;  %v1282_v54 = vunpack.c.h.bf16 %v1319_v51  ;;  %v1281_v55 = vunpack.c.l.bf16 %v1319_v51 }
  0xa9   : > { %v563_v58 = vpop.permute.xlu1 %562  ;;  %v558_v60 = vpop.permute.xlu0 %557 }
  0xaa   : > { %v883_v61 = vpack.c.bf16 %v854_v56, %v853_v57  ;;  %v612_v3 = vmul.f32 %v1290_v62, %v563_v58  ;;  %v611_v4 = vmul.f32 %v1289_v63, %v558_v60  ;;  %v1311_v57 = vld [vmem:[%s1678_s8 + $0x18] sm:$0xff]  }
  0xab   : > { %v1249_v62 = vunpack.c.l.bf16 %v1311_v57 }
  0xac   : > { %1328 = vmatpush3.bf16.msra.mxu0 %v883_v61  ;;  %1362 = vmatpush3.bf16.msra.mxu1 %v883_v61  ;;  %v1250_v61 = vunpack.c.h.bf16 %v1311_v57 }
  0xad   : > { %v483_v0 = vpop.permute.xlu1 %482  ;;  %v478_v2 = vpop.permute.xlu0 %477 }
  0xae   : > { %v596_v11 = vmul.f32 %v1258_v5, %v483_v0  ;;  %v595_v12 = vmul.f32 %v1257_v6, %v478_v2 }
  0xb1   : > { %v787_v7 = vpop.permute.xlu1 %786  ;;  %v782_v8 = vpop.permute.xlu0 %781 }
  0xb2   : > { %v836_v9 = vadd.f32 %v787_v7, %v612_v3  ;;  %v835_v10 = vadd.f32 %v782_v8, %v611_v4 }
  0xb4   : > { %v868_v13 = vmax.f32 %v836_v9, 0.0  ;;  %v867_v14 = vmax.f32 %v835_v10, 0.0 }
  0xb5   : > { %v707_v15 = vpop.permute.xlu1 %706  ;;  %v702_v16 = vpop.permute.xlu0 %701 }
  0xb6   : > { %v890_v17 = vpack.c.bf16 %v868_v13, %v867_v14  ;;  %v820_v18 = vadd.f32 %v707_v15, %v596_v11  ;;  %v819_v19 = vadd.f32 %v702_v16, %v595_v12  ;;  %v1318_v15 = vld [vmem:[%s1678_s8 + $0x50] sm:$0xff]  }
  0xb8   : > { %v852_v20 = vmax.f32 %v820_v18, 0.0  ;;  %v851_v21 = vmax.f32 %v819_v19, 0.0  ;;  %1329 = vmatprep.subr.bf16.mxu0 %v890_v17  ;;  %1355 = vmatprep.subr.bf16.mxu1 %v890_v17  ;;  %v1278_v18 = vunpack.c.h.bf16 %v1318_v15  ;;  %v1277_v19 = vunpack.c.l.bf16 %v1318_v15 }
  0xb9   : > { %v553_v22 = vpop.permute.xlu1 %552  ;;  %v548_v24 = vpop.permute.xlu0 %547 }
  0xba   : > { %v882_v25 = vpack.c.bf16 %v852_v20, %v851_v21  ;;  %v610_v31 = vmul.f32 %v1286_v26, %v553_v22  ;;  %v609_v32 = vmul.f32 %v1285_v27, %v548_v24  ;;  %v1310_v21 = vld [vmem:[%s1678_s8 + $0x10] sm:$0xff]  }
  0xbb   : > { %v1245_v26 = vunpack.c.l.bf16 %v1310_v21 }
  0xbc   : > { %1330 = vmatpush3.bf16.msra.mxu0 %v882_v25  ;;  %1363 = vmatpush3.bf16.msra.mxu1 %v882_v25  ;;  %v1246_v25 = vunpack.c.h.bf16 %v1310_v21 }
  0xbd   : > { %v473_v28 = vpop.permute.xlu1 %472  ;;  %v468_v30 = vpop.permute.xlu0 %467 }
  0xbe   : > { %v594_v39 = vmul.f32 %v1254_v33, %v473_v28  ;;  %v593_v40 = vmul.f32 %v1253_v34, %v468_v30 }
  0xc1   : > { %v777_v35 = vpop.permute.xlu1 %776  ;;  %v772_v36 = vpop.permute.xlu0 %771 }
  0xc2   : > { %v834_v37 = vadd.f32 %v777_v35, %v610_v31  ;;  %v833_v38 = vadd.f32 %v772_v36, %v609_v32 }
  0xc4   : > { %v866_v41 = vmax.f32 %v834_v37, 0.0  ;;  %v865_v42 = vmax.f32 %v833_v38, 0.0 }
  0xc5   : > { %v697_v43 = vpop.permute.xlu1 %696  ;;  %v692_v44 = vpop.permute.xlu0 %691 }
  0xc6   : > { %v889_v45 = vpack.c.bf16 %v866_v41, %v865_v42  ;;  %v818_v46 = vadd.f32 %v697_v43, %v594_v39  ;;  %v817_v47 = vadd.f32 %v692_v44, %v593_v40  ;;  %v1317_v43 = vld [vmem:[%s1678_s8 + $0x48] sm:$0xff]  }
  0xc8   : > { %v850_v48 = vmax.f32 %v818_v46, 0.0  ;;  %v849_v49 = vmax.f32 %v817_v47, 0.0  ;;  %1331 = vmatprep.subr.bf16.mxu0 %v889_v45  ;;  %1356 = vmatprep.subr.bf16.mxu1 %v889_v45  ;;  %v1274_v46 = vunpack.c.h.bf16 %v1317_v43  ;;  %v1273_v47 = vunpack.c.l.bf16 %v1317_v43 }
  0xc9   : > { %v543_v50 = vpop.permute.xlu1 %542  ;;  %v538_v52 = vpop.permute.xlu0 %537 }
  0xca   : > { %v881_v53 = vpack.c.bf16 %v850_v48, %v849_v49  ;;  %v608_v59 = vmul.f32 %v1282_v54, %v543_v50  ;;  %v607_v60 = vmul.f32 %v1281_v55, %v538_v52  ;;  %v1309_v49 = vld [vmem:[%s1678_s8 + $0x8] sm:$0xff]  }
  0xcb   : > { %v1241_v54 = vunpack.c.l.bf16 %v1309_v49 }
  0xcc   : > { %1332 = vmatpush3.bf16.msra.mxu0 %v881_v53  ;;  %1364 = vmatpush3.bf16.msra.mxu1 %v881_v53  ;;  %v1242_v53 = vunpack.c.h.bf16 %v1309_v49 }
  0xcd   : > { %v463_v56 = vpop.permute.xlu1 %462  ;;  %v458_v58 = vpop.permute.xlu0 %457 }
  0xce   : > { %v592_v3 = vmul.f32 %v1250_v61, %v463_v56  ;;  %v591_v4 = vmul.f32 %v1249_v62, %v458_v58 }
  0xd1   : > { %v767_v63 = vpop.permute.xlu1 %766  ;;  %v762_v0 = vpop.permute.xlu0 %761 }
  0xd2   : > { %v832_v1 = vadd.f32 %v767_v63, %v608_v59  ;;  %v831_v2 = vadd.f32 %v762_v0, %v607_v60 }
  0xd4   : > { %v864_v5 = vmax.f32 %v832_v1, 0.0  ;;  %v863_v6 = vmax.f32 %v831_v2, 0.0 }
  0xd5   : > { %v687_v7 = vpop.permute.xlu1 %686  ;;  %v682_v8 = vpop.permute.xlu0 %681 }
  0xd6   : > { %v888_v9 = vpack.c.bf16 %v864_v5, %v863_v6  ;;  %v816_v10 = vadd.f32 %v687_v7, %v592_v3  ;;  %v815_v11 = vadd.f32 %v682_v8, %v591_v4  ;;  %v1316_v7 = vld [vmem:[%s1678_s8 + $0x40] sm:$0xff]  }
  0xd8   : > { %v848_v12 = vmax.f32 %v816_v10, 0.0  ;;  %v847_v13 = vmax.f32 %v815_v11, 0.0  ;;  %1333 = vmatprep.subr.bf16.mxu0 %v888_v9  ;;  %1357 = vmatprep.subr.bf16.mxu1 %v888_v9  ;;  %v1270_v10 = vunpack.c.h.bf16 %v1316_v7  ;;  %v1269_v11 = vunpack.c.l.bf16 %v1316_v7 }
  0xd9   : > { %v533_v14 = vpop.permute.xlu1 %532  ;;  %v528_v16 = vpop.permute.xlu0 %527 }
  0xda   : > { %v880_v17 = vpack.c.bf16 %v848_v12, %v847_v13  ;;  %v606_v23 = vmul.f32 %v1278_v18, %v533_v14  ;;  %v605_v24 = vmul.f32 %v1277_v19, %v528_v16  ;;  %v1236_v13 = vld [vmem:[%s1678_s8] sm:$0xff]  }
  0xdb   : > { %v1237_v18 = vunpack.c.l.bf16 %v1236_v13 }
  0xdc   : > { %1334 = vmatpush3.bf16.msra.mxu0 %v880_v17  ;;  %1365 = vmatpush3.bf16.msra.mxu1 %v880_v17  ;;  %v1238_v17 = vunpack.c.h.bf16 %v1236_v13 }
  0xdd   : > { %v453_v20 = vpop.permute.xlu1 %452  ;;  %v448_v22 = vpop.permute.xlu0 %447 }
  0xde   : > { %v590_v31 = vmul.f32 %v1246_v25, %v453_v20  ;;  %v589_v32 = vmul.f32 %v1245_v26, %v448_v22 }
  0xe1   : > { %v757_v27 = vpop.permute.xlu1 %756  ;;  %v752_v28 = vpop.permute.xlu0 %751 }
  0xe2   : > { %v830_v29 = vadd.f32 %v757_v27, %v606_v23  ;;  %v829_v30 = vadd.f32 %v752_v28, %v605_v24 }
  0xe4   : > { %v862_v33 = vmax.f32 %v830_v29, 0.0  ;;  %v861_v34 = vmax.f32 %v829_v30, 0.0 }
  0xe5   : > { %v677_v35 = vpop.permute.xlu1 %676  ;;  %v672_v36 = vpop.permute.xlu0 %671 }
  0xe6   : > { %v887_v37 = vpack.c.bf16 %v862_v33, %v861_v34  ;;  %v814_v38 = vadd.f32 %v677_v35, %v590_v31  ;;  %v813_v39 = vadd.f32 %v672_v36, %v589_v32  ;;  %v1397_v35 = vld [vmem:[%s1694_s16] ss:$8 sps:$4 sm:$0xff]   ;;  %v1400_v36 = vld [vmem:[%s1694_s16 + $0x10] ss:$8 sps:$4 sm:$0xff]  }
  0xe8   : > { %v846_v40 = vmax.f32 %v814_v38, 0.0  ;;  %v845_v41 = vmax.f32 %v813_v39, 0.0  ;;  %1335 = vmatprep.subr.bf16.mxu0 %v887_v37  ;;  %1358 = vmatprep.subr.bf16.mxu1 %v887_v37  ;;  %v1428_v37 = vmov 0.0  }
  0xe9   : > { %v523_v42 = vpop.permute.xlu1 %522  ;;  %v518_v44 = vpop.permute.xlu0 %517  ;;  %987 = vst.msk [vmem:[%s1719_s19] sm:$0xff] %vm986_vm0, %v1428_v37  ;;  %988 = vst.msk [vmem:[%s1719_s19 + $0x8] sm:$0xff] %vm986_vm0, %v1428_v37 }
  0xea   : > { %v879_v45 = vpack.c.bf16 %v846_v40, %v845_v41  ;;  %v604_v51 = vmul.f32 %v1274_v46, %v523_v42  ;;  %v603_v52 = vmul.f32 %v1273_v47, %v518_v44  ;;  %989 = vst.msk [vmem:[%s1719_s19 + $0x10] sm:$0xff] %vm986_vm0, %v1428_v37  ;;  %990 = vst.msk [vmem:[%s1719_s19 + $0x18] sm:$0xff] %vm986_vm0, %v1428_v37 }
  0xeb   : > { %991 = vst.msk [vmem:[%s1725_s26] sm:$0xff] %vm986_vm0, %v1428_v37  ;;  %992 = vst.msk [vmem:[%s1725_s26 + $0x8] sm:$0xff] %vm986_vm0, %v1428_v37 }
  0xec   : > { %1336 = vmatpush3.bf16.msra.mxu0 %v879_v45  ;;  %1366 = vmatpush3.bf16.msra.mxu1 %v879_v45  ;;  %993 = vst.msk [vmem:[%s1725_s26 + $0x10] sm:$0xff] %vm986_vm0, %v1428_v37  ;;  %994 = vst.msk [vmem:[%s1725_s26 + $0x18] sm:$0xff] %vm986_vm0, %v1428_v37 }
  0xed   : > { %v443_v48 = vpop.permute.xlu1 %442  ;;  %v438_v50 = vpop.permute.xlu0 %437 }
  0xee   : > { %v588_v59 = vmul.f32 %v1242_v53, %v443_v48  ;;  %v587_v60 = vmul.f32 %v1241_v54, %v438_v50 }
  0xf1   : > { %v747_v55 = vpop.permute.xlu1 %746  ;;  %v742_v56 = vpop.permute.xlu0 %741 }
  0xf2   : > { %v828_v57 = vadd.f32 %v747_v55, %v604_v51  ;;  %v827_v58 = vadd.f32 %v742_v56, %v603_v52  ;;  %v995_v56 = vld [vmem:[%s1719_s19] sm:$0xff] }
  0xf3   : > { %v1019_v13 = vld [vmem:[%s1725_s26 + $0x18] sm:$0xff] }
  0xf4   : > { %v860_v61 = vmax.f32 %v828_v57, 0.0  ;;  %v859_v62 = vmax.f32 %v827_v58, 0.0  ;;  %v1016_v58 = vld [vmem:[%s1725_s26] sm:$0xff] }
  0xf5   : > { %v667_v63 = vpop.permute.xlu1 %666  ;;  %v662_v0 = vpop.permute.xlu0 %661 }
  0xf6   : > { %v886_v1 = vpack.c.bf16 %v860_v61, %v859_v62  ;;  %v812_v2 = vadd.f32 %v667_v63, %v588_v59  ;;  %v811_v3 = vadd.f32 %v662_v0, %v587_v60  ;;  %v997_v61 = vld [vmem:[%s1719_s19 + $0x10] sm:$0xff]  ;;  %v996_v0 = vld [vmem:[%s1719_s19 + $0x8] sm:$0xff] }
  0xf8   : > { %v844_v4 = vmax.f32 %v812_v2, 0.0  ;;  %v843_v5 = vmax.f32 %v811_v3, 0.0  ;;  %1337 = vmatprep.subr.bf16.mxu0 %v886_v1  ;;  %1359 = vmatprep.subr.bf16.mxu1 %v886_v1  ;;  %v998_v3 = vld [vmem:[%s1719_s19 + $0x18] sm:$0xff] }
  0xf9   : > { %v513_v6 = vpop.permute.xlu1 %512  ;;  %v508_v8 = vpop.permute.xlu0 %507 }
  0xfa   : > { %v878_v9 = vpack.c.bf16 %v844_v4, %v843_v5  ;;  %v602_v15 = vmul.f32 %v1270_v10, %v513_v6  ;;  %v601_v16 = vmul.f32 %v1269_v11, %v508_v8  ;;  %v1018_v6 = vld [vmem:[%s1725_s26 + $0x10] sm:$0xff] }
  0xfc   : > { %1338 = vmatpush3.bf16.msra.mxu0 %v878_v9  ;;  %1367 = vmatpush3.bf16.msra.mxu1 %v878_v9  ;;  %v1017_v9 = vld [vmem:[%s1725_s26 + $0x8] sm:$0xff] }
  0xfd   : > { %v433_v12 = vpop.permute.xlu1 %432  ;;  %v428_v14 = vpop.permute.xlu0 %427 }
  0xfe   : > { %v586_v23 = vmul.f32 %v1238_v17, %v433_v12  ;;  %v585_v24 = vmul.f32 %v1237_v18, %v428_v14 }
 0x101   : > { %v737_v19 = vpop.permute.xlu1 %736  ;;  %v732_v20 = vpop.permute.xlu0 %731 }
 0x102   : > { %v826_v21 = vadd.f32 %v737_v19, %v602_v15  ;;  %v825_v22 = vadd.f32 %v732_v20, %v601_v16 }
 0x104   : > { %v858_v25 = vmax.f32 %v826_v21, 0.0  ;;  %v857_v26 = vmax.f32 %v825_v22, 0.0 }
 0x105   : > { %v657_v27 = vpop.permute.xlu1 %656  ;;  %v652_v28 = vpop.permute.xlu0 %651 }
 0x106   : > { %v885_v29 = vpack.c.bf16 %v858_v25, %v857_v26  ;;  %v810_v30 = vadd.f32 %v657_v27, %v586_v23  ;;  %v809_v31 = vadd.f32 %v652_v28, %v585_v24 }
 0x108   : > { %v842_v32 = vmax.f32 %v810_v30, 0.0  ;;  %v841_v33 = vmax.f32 %v809_v31, 0.0  ;;  %1339 = vmatprep.subr.bf16.mxu0 %v885_v29  ;;  %1360 = vmatprep.subr.bf16.mxu1 %v885_v29 }
 0x10a   : > { %v877_v34 = vpack.c.bf16 %v842_v32, %v841_v33 }
 0x10c   : > { %1340 = vmatpush3.bf16.msra.mxu0 %v877_v34  ;;  %1368 = vmatpush3.bf16.msra.mxu1 %v877_v34 }
 0x10f   : > { %946 = vmatmul.mubr.bf16.vlgmr.msra.gmra.mxu0 %v1397_v35  ;;  %954 = vmatmul.mubr.bf16.vlgmr.msra.gmra.mxu1 %v1400_v36 }
 0x1cf   : > { %v1341_v38 = vpop.f32.mrf.mxu0  ;;  %v1347_v39 = vpop.f32.mrf.mxu1 }
 0x1d1   : > { %v1342_v40 = vpop.f32.mrf.mxu0  ;;  %v1348_v41 = vpop.f32.mrf.mxu1 }
 0x1d2   : > { %v1343_v42 = vadd.f32 %v1342_v40, %v1341_v38  ;;  %v1349_v48 = vadd.f32 %v1348_v41, %v1347_v39 }
 0x1d3   : > { %v1344_v43 = vpop.f32.mrf.mxu0  ;;  %v1350_v44 = vpop.f32.mrf.mxu1 }
 0x1d4   : > { %999 = vadd.xlane.f32.xlu0 %v1343_v42  ;;  %v1020_v45 = vmul.f32 %v1343_v42, %v1343_v42  ;;  %v1022_v53 = vmul.f32 %v1349_v48, %v1349_v48 }
 0x1d5   : > { %v1345_v46 = vpop.f32.mrf.mxu0  ;;  %v1351_v47 = vpop.f32.mrf.mxu1 }
 0x1d6   : > { %v1346_v49 = vadd.f32 %v1345_v46, %v1344_v43  ;;  %v1352_v50 = vadd.f32 %v1351_v47, %v1350_v44  ;;  %1024 = vadd.xlane.f32.xlu1 %v1020_v45 }
 0x1d8   : > { %v1302_v51 = vpack.c.bf16 %v1346_v49, %v1343_v42  ;;  %v1307_v52 = vpack.c.bf16 %v1352_v50, %v1349_v48  ;;  %1003 = vadd.xlane.f32.xlu0 %v1349_v48  ;;  %v1021_v54 = vmul.f32 %v1346_v49, %v1346_v49  ;;  %v1023_v55 = vmul.f32 %v1352_v50, %v1352_v50 }
 0x1da   : > { %1303 = vst [vmem:[%s317_s30] sm:$0xff] %v1302_v51   ;;  %1324 = vst [vmem:[%s317_s30 + $0x8] sm:$0xff] %v1307_v52   ;;  %1001 = vadd.xlane.f32.xlu1 %v1346_v49 }
 0x1dc   : > { %1005 = vadd.xlane.f32.xlu0 %v1352_v50 }
 0x1de   : > { %1028 = vadd.xlane.f32.xlu1 %v1022_v53 }
 0x1e0   : > { %1026 = vadd.xlane.f32.xlu0 %v1021_v54 }
 0x1e4   : > { %1030 = vadd.xlane.f32.xlu0 %v1023_v55 }
 0x25d   : > { %v1000_v57 = vpop.xlane.xlu0 %999 }
 0x25e   : > { %v1007_v59 = vadd.f32 %v1000_v57, %v995_v56 }
 0x25f   : > { %v1025_v60 = vpop.xlane.xlu1 %1024 }
 0x260   : > { %1012 = vst.msk [vmem:[%s1719_s19] sm:$0xff] %vm986_vm0, %v1007_v59  ;;  %v1032_v62 = vadd.f32 %v1025_v60, %v1016_v58 }
 0x261   : > { %v1004_v63 = vpop.xlane.xlu0 %1003 }
 0x262   : > { %1036 = vst.msk [vmem:[%s1725_s26] sm:$0xff] %vm986_vm0, %v1032_v62  ;;  %v1009_v1 = vadd.f32 %v1004_v63, %v997_v61 }
 0x263   : > { %v1002_v2 = vpop.xlane.xlu1 %1001 }
 0x264   : > { %1014 = vst.msk [vmem:[%s1719_s19 + $0x10] sm:$0xff] %vm986_vm0, %v1009_v1  ;;  %v1008_v4 = vadd.f32 %v1002_v2, %v996_v0 }
 0x265   : > { %v1006_v5 = vpop.xlane.xlu0 %1005 }
 0x266   : > { %1013 = vst.msk [vmem:[%s1719_s19 + $0x8] sm:$0xff] %vm986_vm0, %v1008_v4  ;;  %v1010_v7 = vadd.f32 %v1006_v5, %v998_v3 }
 0x267   : > { %v1029_v8 = vpop.xlane.xlu1 %1028 }
 0x268   : > { %1015 = vst.msk [vmem:[%s1719_s19 + $0x18] sm:$0xff] %vm986_vm0, %v1010_v7  ;;  %v1034_v10 = vadd.f32 %v1029_v8, %v1018_v6 }
 0x269   : > { %v1027_v11 = vpop.xlane.xlu0 %1026 }
 0x26a   : > { %1038 = vst.msk [vmem:[%s1725_s26 + $0x10] sm:$0xff] %vm986_vm0, %v1034_v10  ;;  %v1033_v12 = vadd.f32 %v1027_v11, %v1017_v9 }
 0x26c   : > { %1037 = vst.msk [vmem:[%s1725_s26 + $0x8] sm:$0xff] %vm986_vm0, %v1033_v12 }
 0x26d   : > { %v1031_v14 = vpop.xlane.xlu0 %1030 }
 0x26e   : > { %v1035_v15 = vadd.f32 %v1031_v14, %v1019_v13 }
 0x270   : > { %1039 = vst.msk [vmem:[%s1725_s26 + $0x18] sm:$0xff] %vm986_vm0, %v1035_v15 }
 0x271 PF: > { %s17_s23 = sadd.s32 1, %s1425_s23   ;;  %s1787_s21 = smov %s1421_s22 }
 0x272   : > { %p14_p5 = scmp.ge.s32.totalorder %s17_s23, 6   ;;  %s1788_s22 = smov %s1790_s24 }
 0x274   :  { %16 = sbr.rel (!%p14_p5) target bundleno = 2 (0x2), region = 97 }

// kernel: tile.64
= control target key start
LH: loop header
LB: loop body
LE: loop exit
PB: predicated region body
PF: predicated region fallthrough
CT: control target
= control target key end

     0   :  { %s22_s0 = inlined_call_operand.vmem [shape: f32[16], index: 0, kind: input, shape index: {}]   ;;  %s23_s1 = inlined_call_operand.vmem [shape: f32[4,16], index: 1, kind: output, shape index: {}]  }
   0x1   :  { %v4_v0 = vld [vmem:[%s22_s0] ss:$0 sm:$0xff] }
   0x2   :  { %5 = vst [vmem:[%s23_s1] sm:$0xf] %v4_v0 }

// kernel: tile.4
= control target key start
LH: loop header
LB: loop body
LE: loop exit
PB: predicated region body
PF: predicated region fallthrough
CT: control target
= control target key end

     0   :  { %s177_s8 = smov 125   ;;  %s178_s9 = smov 126   ;;  %vm8_vm0 = vcmask 7168   ;;  %s332_s0 = inlined_call_operand.vmem [shape: f32[4,16], index: 0, kind: input, shape index: {}]   ;;  %s333_s1 = inlined_call_operand.vmem [shape: f32[64,1], index: 1, kind: output, shape index: {}]  }
   0x1   :  { %v5_v0 = vld [vmem:[%s332_s0] sm:$0xf]  ;;  %s176_s0 = smov 127   ;;  %s179_s10 = smov 124  }
   0x2   :  { %6 = vst [vmem:[#allocation0] sm:$0xf] %v5_v0  ;;  %s180_s11 = smov 123   ;;  %s181_s12 = smov 122  }
   0x3   :  { %s182_s13 = smov 121   ;;  %s183_s14 = smov 120  }
   0x4   :  { %s184_s19 = smov 119   ;;  %s185_s20 = smov 118  }
   0x5   :  { %s186_s21 = smov 117   ;;  %s187_s22 = smov 116  }
   0x6   :  { %s188_s23 = smov 115   ;;  %s189_s24 = smov 114  }
   0x7   :  { %s190_s25 = smov 113  }
   0x9   :  { %v11_v1 = vld [vmem:[#allocation0] sm:$0xf]  }
   0xa   :  { %v27_v2 = vld [vmem:[#allocation0] sm:$0xf]   ;;  %12 = vrot.lane.b32.xlu0 %v11_v1, %s176_s0 }
   0xb   :  { %28 = vrot.lane.b32.xlu1 %v27_v2, %s177_s8  ;;  %v19_v3 = vld [vmem:[#allocation0] sm:$0xf]  }
   0xc   :  { %v35_v4 = vld [vmem:[#allocation0] sm:$0xf]  }
   0xd   :  { %v43_v5 = vld [vmem:[#allocation0] sm:$0xf]  }
   0xe   :  { %20 = vrot.lane.b32.xlu0 %v19_v3, %s178_s9  ;;  %v51_v6 = vld [vmem:[#allocation0] sm:$0xf]  }
   0xf   :  { %36 = vrot.lane.b32.xlu1 %v35_v4, %s179_s10  ;;  %v59_v7 = vld [vmem:[#allocation0] sm:$0xf]  }
  0x10   :  { %v67_v8 = vld [vmem:[#allocation0] sm:$0xf]  }
  0x11   :  { %v75_v9 = vld [vmem:[#allocation0] sm:$0xf]  }
  0x12   :  { %44 = vrot.lane.b32.xlu0 %v43_v5, %s180_s11  ;;  %v83_v10 = vld [vmem:[#allocation0] sm:$0xf]  }
  0x13   :  { %52 = vrot.lane.b32.xlu1 %v51_v6, %s181_s12  ;;  %v7_v11 = vld [vmem:[#allocation0] sm:$0xf]  }
  0x14   :  { %9 = vst.msk [vmem:[%s333_s1] ss:$16 sm:$0x3] %vm8_vm0, %v7_v11   ;;  %10 = vst.msk [vmem:[%s333_s1] ss:$16 sm:$0xc] %vm8_vm0, %v7_v11  }
  0x15   :  { %v91_v12 = vld [vmem:[#allocation0] sm:$0xf]  }
  0x16   :  { %60 = vrot.lane.b32.xlu0 %v59_v7, %s182_s13  ;;  %v99_v13 = vld [vmem:[#allocation0] sm:$0xf]  }
  0x17   :  { %68 = vrot.lane.b32.xlu1 %v67_v8, %s183_s14  ;;  %v107_v14 = vld [vmem:[#allocation0] sm:$0xf]  }
  0x18   :  { %v115_v15 = vld [vmem:[#allocation0] sm:$0xf]  }
  0x19   :  { %v123_v16 = vld [vmem:[#allocation0] sm:$0xf]  }
  0x1a   :  { %76 = vrot.lane.b32.xlu0 %v75_v9, %s184_s19 }
  0x1b   :  { %84 = vrot.lane.b32.xlu1 %v83_v10, %s185_s20 }
  0x1e   :  { %92 = vrot.lane.b32.xlu0 %v91_v12, %s186_s21 }
  0x1f   :  { %100 = vrot.lane.b32.xlu1 %v99_v13, %s187_s22 }
  0x22   :  { %108 = vrot.lane.b32.xlu0 %v107_v14, %s188_s23 }
  0x23   :  { %116 = vrot.lane.b32.xlu1 %v115_v15, %s189_s24 }
  0x26   :  { %124 = vrot.lane.b32.xlu0 %v123_v16, %s190_s25 }
  0x7c   :  { %v13_v17 = vpop.permute.xlu0 %12  }
  0x7d   :  { %v29_v18 = vpop.permute.xlu1 %28   ;;  %131 = vst.msk [vmem:[%s333_s1 + $0x1] ss:$16 sm:$0x3] %vm8_vm0, %v13_v17   ;;  %132 = vst.msk [vmem:[%s333_s1 + $0x1] ss:$16 sm:$0xc] %vm8_vm0, %v13_v17  }
  0x7e   :  { %135 = vst.msk [vmem:[%s333_s1 + $0x3] ss:$16 sm:$0x3] %vm8_vm0, %v29_v18   ;;  %136 = vst.msk [vmem:[%s333_s1 + $0x3] ss:$16 sm:$0xc] %vm8_vm0, %v29_v18  }
  0x80   :  { %v21_v19 = vpop.permute.xlu0 %20  }
  0x81   :  { %v37_v20 = vpop.permute.xlu1 %36   ;;  %133 = vst.msk [vmem:[%s333_s1 + $0x2] ss:$16 sm:$0x3] %vm8_vm0, %v21_v19   ;;  %134 = vst.msk [vmem:[%s333_s1 + $0x2] ss:$16 sm:$0xc] %vm8_vm0, %v21_v19  }
  0x82   :  { %137 = vst.msk [vmem:[%s333_s1 + $0x4] ss:$16 sm:$0x3] %vm8_vm0, %v37_v20   ;;  %138 = vst.msk [vmem:[%s333_s1 + $0x4] ss:$16 sm:$0xc] %vm8_vm0, %v37_v20  }
  0x84   :  { %v45_v21 = vpop.permute.xlu0 %44  }
  0x85   :  { %v53_v22 = vpop.permute.xlu1 %52   ;;  %139 = vst.msk [vmem:[%s333_s1 + $0x5] ss:$16 sm:$0x3] %vm8_vm0, %v45_v21   ;;  %140 = vst.msk [vmem:[%s333_s1 + $0x5] ss:$16 sm:$0xc] %vm8_vm0, %v45_v21  }
  0x86   :  { %141 = vst.msk [vmem:[%s333_s1 + $0x6] ss:$16 sm:$0x3] %vm8_vm0, %v53_v22   ;;  %142 = vst.msk [vmem:[%s333_s1 + $0x6] ss:$16 sm:$0xc] %vm8_vm0, %v53_v22  }
  0x88   :  { %v61_v23 = vpop.permute.xlu0 %60  }
  0x89   :  { %v69_v24 = vpop.permute.xlu1 %68   ;;  %143 = vst.msk [vmem:[%s333_s1 + $0x7] ss:$16 sm:$0x3] %vm8_vm0, %v61_v23   ;;  %144 = vst.msk [vmem:[%s333_s1 + $0x7] ss:$16 sm:$0xc] %vm8_vm0, %v61_v23  }
  0x8a   :  { %145 = vst.msk [vmem:[%s333_s1 + $0x8] ss:$16 sm:$0x3] %vm8_vm0, %v69_v24   ;;  %146 = vst.msk [vmem:[%s333_s1 + $0x8] ss:$16 sm:$0xc] %vm8_vm0, %v69_v24  }
  0x8c   :  { %v77_v25 = vpop.permute.xlu0 %76  }
  0x8d   :  { %v85_v26 = vpop.permute.xlu1 %84   ;;  %147 = vst.msk [vmem:[%s333_s1 + $0x9] ss:$16 sm:$0x3] %vm8_vm0, %v77_v25   ;;  %148 = vst.msk [vmem:[%s333_s1 + $0x9] ss:$16 sm:$0xc] %vm8_vm0, %v77_v25  }
  0x8e   :  { %149 = vst.msk [vmem:[%s333_s1 + $0xa] ss:$16 sm:$0x3] %vm8_vm0, %v85_v26   ;;  %150 = vst.msk [vmem:[%s333_s1 + $0xa] ss:$16 sm:$0xc] %vm8_vm0, %v85_v26  }
  0x90   :  { %v93_v27 = vpop.permute.xlu0 %92  }
  0x91   :  { %v101_v28 = vpop.permute.xlu1 %100   ;;  %151 = vst.msk [vmem:[%s333_s1 + $0xb] ss:$16 sm:$0x3] %vm8_vm0, %v93_v27   ;;  %152 = vst.msk [vmem:[%s333_s1 + $0xb] ss:$16 sm:$0xc] %vm8_vm0, %v93_v27  }
  0x92   :  { %153 = vst.msk [vmem:[%s333_s1 + $0xc] ss:$16 sm:$0x3] %vm8_vm0, %v101_v28   ;;  %154 = vst.msk [vmem:[%s333_s1 + $0xc] ss:$16 sm:$0xc] %vm8_vm0, %v101_v28  }
  0x94   :  { %v109_v29 = vpop.permute.xlu0 %108  }
  0x95   :  { %v117_v30 = vpop.permute.xlu1 %116   ;;  %155 = vst.msk [vmem:[%s333_s1 + $0xd] ss:$16 sm:$0x3] %vm8_vm0, %v109_v29   ;;  %156 = vst.msk [vmem:[%s333_s1 + $0xd] ss:$16 sm:$0xc] %vm8_vm0, %v109_v29  }
  0x96   :  { %157 = vst.msk [vmem:[%s333_s1 + $0xe] ss:$16 sm:$0x3] %vm8_vm0, %v117_v30   ;;  %158 = vst.msk [vmem:[%s333_s1 + $0xe] ss:$16 sm:$0xc] %vm8_vm0, %v117_v30  }
  0x98   :  { %v125_v31 = vpop.permute.xlu0 %124  }
  0x99   :  { %159 = vst.msk [vmem:[%s333_s1 + $0xf] ss:$16 sm:$0x3] %vm8_vm0, %v125_v31   ;;  %160 = vst.msk [vmem:[%s333_s1 + $0xf] ss:$16 sm:$0xc] %vm8_vm0, %v125_v31  }

// kernel: generator_forward.7
= control target key start
LH: loop header
LB: loop body
LE: loop exit
PB: predicated region body
PF: predicated region fallthrough
CT: control target
= control target key end

     0   :  { %s1053_s21 = smov 0   ;;  %s1055_s22 = smov 0   ;;  %s1246_s0 = inlined_call_operand.vmem [shape: f32[128,1], index: 0, kind: input, shape index: {}]   ;;  %s1247_s1 = inlined_call_operand.vmem [shape: f32[128,1], index: 1, kind: input, shape index: {}]   ;;  %s1248_s2 = inlined_call_operand.vmem [shape: bf16[4,16,128], index: 2, kind: input, shape index: {}]   ;;  %s1249_s3 = inlined_call_operand.vmem [shape: bf16[4,128,128], index: 3, kind: input, shape index: {}]   ;;  %s1250_s4 = inlined_call_operand.vmem [shape: bf16[4,16,128], index: 4, kind: output, shape index: {0}]   ;;  %s1251_s5 = inlined_call_operand.vmem [shape: f32[4,16,1], index: 5, kind: output, shape index: {1}]   ;;  %s1252_s6 = inlined_call_operand.vmem [shape: f32[4,16,1], index: 6, kind: output, shape index: {2}]  }
   0x1   :  { %s1057_s23 = smov 0  }
   0x2 LB: > { %s29_s24 = sadd.s32 1, %s1009_s22  ;;  %p865_p0 = scmp.ge.s32.totalorder %s1013_s23, 1  ;;  %s1013_s23 = sphi %s1057_s23, %s17_s23   ;;  %s1009_s22 = sphi %s1055_s22, %s1254_s22   ;;  %s1005_s21 = sphi %s1053_s21, %s1253_s21  }
   0x3   : > { %p31_p1 = scmp.ge.s32.totalorder %s29_s24, 4  ;;  %p246_p2 = scmp.lt.s32.totalorder %s1013_s23, 5 }
   0x5   : > { %s1256_s24 = smov (%p31_p1, %s29_s24), 0  ;;  %p247_p3 = pnand %p865_p0, %p246_p2 }
   0x6   : > { %p297_p4 = scmp.lt.s32.totalorder (!%p247_p3), %s1005_s21, 3 }
   0x7   : > { %250 = sbr.rel (%p247_p3) target bundleno = 549 (0x225), region = 36 }
   0xc   : > { %v487_v0 = vld [vmem:[%s1247_s1 + $0x70] sm:$0xff]  ;;  %v1015_v2 = vmov 0   ;;  %v488_v3 = vld [vmem:[%s1247_s1 + $0x78] sm:$0xff]  ;;  %v374_v5 = vld [vmem:[%s1246_s0 + $0x68] sm:$0xff]  ;;  %v1016_v7 = vmov 0.0   ;;  %s1258_s21 = smov (!%p297_p4, %s1005_s21), 3 }
   0xd   : > { %v375_v1 = vld [vmem:[%s1246_s0 + $0x70] sm:$0xff]  ;;  %989 = vset.pattern.permute.xlu1 %v1015_v2  ;;  %988 = vset.pattern.permute.xlu0 %v1015_v2  ;;  %v376_v4 = vld [vmem:[%s1246_s0 + $0x78] sm:$0xff]  ;;  %v373_v6 = vld [vmem:[%s1246_s0 + $0x60] sm:$0xff]  ;;  %s881_s29 = sshll.u32 %s1258_s21, 3  ;;  %vm1017_vm0 = vmmov 0   ;;  %s882_s9 = sshll.u32 %s1258_s21, 6 }
   0xe   : > { %561 = vperm.xlu1 %989, %v487_v0   ;;  %449 = vperm.xlu0 %988, %v375_v1   ;;  %v486_v8 = vld [vmem:[%s1247_s1 + $0x68] sm:$0xff]  ;;  %v485_v9 = vld [vmem:[%s1247_s1 + $0x60] sm:$0xff]  ;;  %v372_v10 = vld [vmem:[%s1246_s0 + $0x58] sm:$0xff]  ;;  %s1180_s8 = scalar_lea.vmem %s1248_s2, %s881_s29  ;;  %s1187_s12 = scalar_lea.vmem %s1249_s3, %s882_s9  ;;  %vm672_vm1 = vcmask 7168  }
   0xf   : > { %941 = vmatprep.subr.bf16.mxu0 %v1016_v7  ;;  %v371_v11 = vld [vmem:[%s1246_s0 + $0x50] sm:$0xff]  ;;  %v484_v12 = vld [vmem:[%s1247_s1 + $0x58] sm:$0xff]  ;;  %v370_v14 = vld [vmem:[%s1246_s0 + $0x48] sm:$0xff]  ;;  %957 = vmatprep.mubr.msk.bf16.mxu0 %vm1017_vm0, %v1016_v7  ;;  %s884_s13 = sshll.u32 %s1258_s21, 4  ;;  %s317_s19 = scalar_lea.vmem %s1250_s4, %s881_s29 }
  0x10   : > { %v483_v13 = vld [vmem:[%s1247_s1 + $0x50] sm:$0xff]  ;;  %v369_v15 = vld [vmem:[%s1246_s0 + $0x40] sm:$0xff]  ;;  %v482_v16 = vld [vmem:[%s1247_s1 + $0x48] sm:$0xff]  ;;  %s1209_s16 = scalar_lea.vmem %s1251_s5, %s884_s13  ;;  %s327_s26 = scalar_lea.vmem %s1252_s6, %s884_s13 }
  0x11   : > { %v481_v17 = vld [vmem:[%s1247_s1 + $0x40] sm:$0xff]  ;;  %v368_v18 = vld [vmem:[%s1246_s0 + $0x38] sm:$0xff]  ;;  %v367_v19 = vld [vmem:[%s1246_s0 + $0x30] sm:$0xff]  ;;  %673 = vst.msk [vmem:[%s1209_s16] sm:$0xff] %vm672_vm1, %v1016_v7 }
  0x12   : > { %566 = vperm.xlu1 %989, %v488_v3   ;;  %454 = vperm.xlu0 %988, %v376_v4   ;;  %v480_v20 = vld [vmem:[%s1247_s1 + $0x38] sm:$0xff]  ;;  %v479_v21 = vld [vmem:[%s1247_s1 + $0x30] sm:$0xff]  ;;  %v366_v22 = vld [vmem:[%s1246_s0 + $0x28] sm:$0xff]  ;;  %674 = vst.msk [vmem:[%s1209_s16 + $0x8] sm:$0xff] %vm672_vm1, %v1016_v7 }
  0x13   : > { %v365_v23 = vld [vmem:[%s1246_s0 + $0x20] sm:$0xff]  ;;  %v478_v24 = vld [vmem:[%s1247_s1 + $0x28] sm:$0xff]  ;;  %v364_v26 = vld [vmem:[%s1246_s0 + $0x18] sm:$0xff]  ;;  %675 = vst.msk [vmem:[%s327_s26] sm:$0xff] %vm672_vm1, %v1016_v7 }
  0x14   : > { %v477_v25 = vld [vmem:[%s1247_s1 + $0x20] sm:$0xff]  ;;  %v363_v27 = vld [vmem:[%s1246_s0 + $0x10] sm:$0xff]  ;;  %v476_v28 = vld [vmem:[%s1247_s1 + $0x18] sm:$0xff]  ;;  %676 = vst.msk [vmem:[%s327_s26 + $0x8] sm:$0xff] %vm672_vm1, %v1016_v7 }
  0x15   : > { %v475_v29 = vld [vmem:[%s1247_s1 + $0x10] sm:$0xff]  ;;  %v362_v30 = vld [vmem:[%s1246_s0 + $0x8] sm:$0xff]  ;;  %v361_v31 = vld [vmem:[%s1246_s0] sm:$0xff] }
  0x16   : > { %444 = vperm.xlu1 %989, %v374_v5   ;;  %439 = vperm.xlu0 %988, %v373_v6   ;;  %v474_v32 = vld [vmem:[%s1247_s1 + $0x8] sm:$0xff]  ;;  %v473_v33 = vld [vmem:[%s1247_s1] sm:$0xff]  ;;  %v931_v34 = vld [vmem:[%s1187_s12 + $0x38] sm:$0xff]  }
  0x17   : > { %v918_v35 = vunpack.c.l.bf16 %v931_v34  ;;  %v919_v39 = vunpack.c.h.bf16 %v931_v34  ;;  %v930_v42 = vld [vmem:[%s1187_s12 + $0x30] sm:$0xff]   ;;  %v929_v57 = vld [vmem:[%s1187_s12 + $0x28] sm:$0xff]  }
  0x18   : > { %v915_v46 = vunpack.c.h.bf16 %v930_v42  ;;  %v914_v47 = vunpack.c.l.bf16 %v930_v42  ;;  %v911_v62 = vunpack.c.h.bf16 %v929_v57  ;;  %v910_v63 = vunpack.c.l.bf16 %v929_v57 }
  0x1a   : > { %556 = vperm.xlu1 %989, %v486_v8   ;;  %551 = vperm.xlu0 %988, %v485_v9   ;;  %v928_v8 = vld [vmem:[%s1187_s12 + $0x20] sm:$0xff]  }
  0x1e   : > { %434 = vperm.xlu1 %989, %v372_v10   ;;  %429 = vperm.xlu0 %988, %v371_v11  }
  0x22   : > { %546 = vperm.xlu1 %989, %v484_v12   ;;  %541 = vperm.xlu0 %988, %v483_v13   ;;  %v907_v13 = vunpack.c.h.bf16 %v928_v8 }
  0x26   : > { %424 = vperm.xlu1 %989, %v370_v14   ;;  %419 = vperm.xlu0 %988, %v369_v15   ;;  %v906_v14 = vunpack.c.l.bf16 %v928_v8 }
  0x2a   : > { %536 = vperm.xlu1 %989, %v482_v16   ;;  %531 = vperm.xlu0 %988, %v481_v17  }
  0x2e   : > { %414 = vperm.xlu1 %989, %v368_v18   ;;  %409 = vperm.xlu0 %988, %v367_v19  }
  0x32   : > { %526 = vperm.xlu1 %989, %v480_v20   ;;  %521 = vperm.xlu0 %988, %v479_v21  }
  0x36   : > { %404 = vperm.xlu1 %989, %v366_v22   ;;  %399 = vperm.xlu0 %988, %v365_v23   ;;  %v927_v22 = vld [vmem:[%s1187_s12 + $0x18] sm:$0xff]  }
  0x3a   : > { %516 = vperm.xlu1 %989, %v478_v24   ;;  %511 = vperm.xlu0 %988, %v477_v25  }
  0x3e   : > { %394 = vperm.xlu1 %989, %v364_v26   ;;  %389 = vperm.xlu0 %988, %v363_v27   ;;  %v903_v27 = vunpack.c.h.bf16 %v927_v22 }
  0x42   : > { %506 = vperm.xlu1 %989, %v476_v28   ;;  %501 = vperm.xlu0 %988, %v475_v29   ;;  %v902_v28 = vunpack.c.l.bf16 %v927_v22 }
  0x46   : > { %384 = vperm.xlu1 %989, %v362_v30   ;;  %379 = vperm.xlu0 %988, %v361_v31  }
  0x4a   : > { %496 = vperm.xlu1 %989, %v474_v32   ;;  %491 = vperm.xlu0 %988, %v473_v33  }
  0x89   : > { %v562_v36 = vpop.permute.xlu1 %561  ;;  %v450_v37 = vpop.permute.xlu0 %449 }
  0x8a   : > { %v471_v38 = vmul.f32 %v918_v35, %v450_v37 }
  0x8c   : > { %v583_v43 = vadd.f32 %v562_v36, %v471_v38  ;;  %v926_v36 = vld [vmem:[%s1187_s12 + $0x10] sm:$0xff]  }
  0x8d   : > { %v567_v40 = vpop.permute.xlu1 %566  ;;  %v455_v41 = vpop.permute.xlu0 %454  ;;  %v898_v42 = vunpack.c.l.bf16 %v926_v36 }
  0x8e   : > { %v472_v44 = vmul.f32 %v919_v39, %v455_v41  ;;  %v599_v50 = vmax.f32 %v583_v43, 0.0  ;;  %v899_v41 = vunpack.c.h.bf16 %v926_v36 }
  0x90   : > { %v584_v45 = vadd.f32 %v567_v40, %v472_v44 }
  0x91   : > { %v445_v48 = vpop.permute.xlu1 %444  ;;  %v440_v49 = vpop.permute.xlu0 %439 }
  0x92   : > { %v600_v51 = vmax.f32 %v584_v45, 0.0  ;;  %v470_v52 = vmul.f32 %v915_v46, %v445_v48  ;;  %v469_v53 = vmul.f32 %v914_v47, %v440_v49 }
  0x94   : > { %v610_v54 = vpack.c.bf16 %v600_v51, %v599_v50  ;;  %v925_v50 = vld [vmem:[%s1187_s12 + $0x8] sm:$0xff]  }
  0x95   : > { %v557_v55 = vpop.permute.xlu1 %556  ;;  %v552_v56 = vpop.permute.xlu0 %551 }
  0x96   : > { %v582_v58 = vadd.f32 %v557_v55, %v470_v52  ;;  %v581_v59 = vadd.f32 %v552_v56, %v469_v53  ;;  %942 = vmatpush3.bf16.msra.mxu0 %v610_v54  ;;  %v895_v55 = vunpack.c.h.bf16 %v925_v50  ;;  %v894_v56 = vunpack.c.l.bf16 %v925_v50 }
  0x97   : > { %943 = vmatprep.subr.bf16.mxu0 %v1016_v7 }
  0x98   : > { %v598_v60 = vmax.f32 %v582_v58, 0.0  ;;  %v597_v61 = vmax.f32 %v581_v59, 0.0 }
  0x99   : > { %v435_v0 = vpop.permute.xlu1 %434  ;;  %v430_v1 = vpop.permute.xlu0 %429 }
  0x9a   : > { %v609_v2 = vpack.c.bf16 %v598_v60, %v597_v61  ;;  %v468_v3 = vmul.f32 %v911_v62, %v435_v0  ;;  %v467_v4 = vmul.f32 %v910_v63, %v430_v1  ;;  %v889_v0 = vld [vmem:[%s1187_s12] sm:$0xff]  }
  0x9c   : > { %944 = vmatpush3.bf16.msra.mxu0 %v609_v2 }
  0x9d   : > { %v547_v5 = vpop.permute.xlu1 %546  ;;  %v542_v6 = vpop.permute.xlu0 %541  ;;  %945 = vmatprep.subr.bf16.mxu0 %v1016_v7 }
  0x9e   : > { %v580_v9 = vadd.f32 %v547_v5, %v468_v3  ;;  %v579_v10 = vadd.f32 %v542_v6, %v467_v4  ;;  %v891_v5 = vunpack.c.h.bf16 %v889_v0  ;;  %v890_v6 = vunpack.c.l.bf16 %v889_v0 }
  0xa0   : > { %v596_v11 = vmax.f32 %v580_v9, 0.0  ;;  %v595_v12 = vmax.f32 %v579_v10, 0.0 }
  0xa1   : > { %v425_v15 = vpop.permute.xlu1 %424  ;;  %v420_v16 = vpop.permute.xlu0 %419 }
  0xa2   : > { %v608_v17 = vpack.c.bf16 %v596_v11, %v595_v12  ;;  %v466_v18 = vmul.f32 %v907_v13, %v425_v15  ;;  %v465_v19 = vmul.f32 %v906_v14, %v420_v16 }
  0xa4   : > { %946 = vmatpush3.bf16.msra.mxu0 %v608_v17 }
  0xa5   : > { %v537_v20 = vpop.permute.xlu1 %536  ;;  %v532_v21 = vpop.permute.xlu0 %531  ;;  %947 = vmatprep.subr.bf16.mxu0 %v1016_v7 }
  0xa6   : > { %v578_v23 = vadd.f32 %v537_v20, %v466_v18  ;;  %v577_v24 = vadd.f32 %v532_v21, %v465_v19  ;;  %v990_v20 = vld [vmem:[%s1180_s8] sm:$0xff]  }
  0xa8   : > { %v594_v25 = vmax.f32 %v578_v23, 0.0  ;;  %v593_v26 = vmax.f32 %v577_v24, 0.0 }
  0xa9   : > { %v415_v29 = vpop.permute.xlu1 %414  ;;  %v410_v30 = vpop.permute.xlu0 %409 }
  0xaa   : > { %v607_v31 = vpack.c.bf16 %v594_v25, %v593_v26  ;;  %v464_v32 = vmul.f32 %v903_v27, %v415_v29  ;;  %v463_v33 = vmul.f32 %v902_v28, %v410_v30  ;;  %v677_v28 = vld [vmem:[%s1209_s16] sm:$0xff] }
  0xac   : > { %948 = vmatpush3.bf16.msra.mxu0 %v607_v31  ;;  %v688_v31 = vld [vmem:[%s327_s26] sm:$0xff] }
  0xad   : > { %v527_v34 = vpop.permute.xlu1 %526  ;;  %v522_v35 = vpop.permute.xlu0 %521  ;;  %949 = vmatprep.subr.bf16.mxu0 %v1016_v7 }
  0xae   : > { %v576_v37 = vadd.f32 %v527_v34, %v464_v32  ;;  %v575_v38 = vadd.f32 %v522_v35, %v463_v33  ;;  %v678_v32 = vld [vmem:[%s1209_s16 + $0x8] sm:$0xff] }
  0xb0   : > { %v592_v39 = vmax.f32 %v576_v37, 0.0  ;;  %v591_v40 = vmax.f32 %v575_v38, 0.0  ;;  %v689_v37 = vld [vmem:[%s327_s26 + $0x8] sm:$0xff] }
  0xb1   : > { %v405_v43 = vpop.permute.xlu1 %404  ;;  %v400_v44 = vpop.permute.xlu0 %399 }
  0xb2   : > { %v606_v45 = vpack.c.bf16 %v592_v39, %v591_v40  ;;  %v462_v46 = vmul.f32 %v899_v41, %v405_v43  ;;  %v461_v47 = vmul.f32 %v898_v42, %v400_v44 }
  0xb4   : > { %950 = vmatpush3.bf16.msra.mxu0 %v606_v45 }
  0xb5   : > { %v517_v48 = vpop.permute.xlu1 %516  ;;  %v512_v49 = vpop.permute.xlu0 %511  ;;  %951 = vmatprep.subr.bf16.mxu0 %v1016_v7 }
  0xb6   : > { %v574_v51 = vadd.f32 %v517_v48, %v462_v46  ;;  %v573_v52 = vadd.f32 %v512_v49, %v461_v47 }
  0xb8   : > { %v590_v53 = vmax.f32 %v574_v51, 0.0  ;;  %v589_v54 = vmax.f32 %v573_v52, 0.0 }
  0xb9   : > { %v395_v57 = vpop.permute.xlu1 %394  ;;  %v390_v58 = vpop.permute.xlu0 %389 }
  0xba   : > { %v605_v59 = vpack.c.bf16 %v590_v53, %v589_v54  ;;  %v460_v60 = vmul.f32 %v895_v55, %v395_v57  ;;  %v459_v61 = vmul.f32 %v894_v56, %v390_v58 }
  0xbc   : > { %952 = vmatpush3.bf16.msra.mxu0 %v605_v59 }
  0xbd   : > { %v507_v62 = vpop.permute.xlu1 %506  ;;  %v502_v63 = vpop.permute.xlu0 %501  ;;  %953 = vmatprep.subr.bf16.mxu0 %v1016_v7 }
  0xbe   : > { %v572_v1 = vadd.f32 %v507_v62, %v460_v60  ;;  %v571_v2 = vadd.f32 %v502_v63, %v459_v61 }
  0xc0   : > { %v588_v3 = vmax.f32 %v572_v1, 0.0  ;;  %v587_v4 = vmax.f32 %v571_v2, 0.0 }
  0xc1   : > { %v385_v8 = vpop.permute.xlu1 %384  ;;  %v380_v9 = vpop.permute.xlu0 %379 }
  0xc2   : > { %v604_v10 = vpack.c.bf16 %v588_v3, %v587_v4  ;;  %v458_v11 = vmul.f32 %v891_v5, %v385_v8  ;;  %v457_v12 = vmul.f32 %v890_v6, %v380_v9 }
  0xc4   : > { %954 = vmatpush3.bf16.msra.mxu0 %v604_v10 }
  0xc5   : > { %v497_v13 = vpop.permute.xlu1 %496  ;;  %v492_v14 = vpop.permute.xlu0 %491  ;;  %955 = vmatprep.subr.bf16.mxu0 %v1016_v7 }
  0xc6   : > { %v570_v15 = vadd.f32 %v497_v13, %v458_v11  ;;  %v569_v16 = vadd.f32 %v492_v14, %v457_v12 }
  0xc8   : > { %v586_v17 = vmax.f32 %v570_v15, 0.0  ;;  %v585_v18 = vmax.f32 %v569_v16, 0.0 }
  0xca   : > { %v603_v19 = vpack.c.bf16 %v586_v17, %v585_v18 }
  0xcc   : > { %956 = vmatpush3.bf16.msra.mxu0 %v603_v19 }
  0xcf   : > { %958 = vmatmul.mubr.bf16.vlgmr.msra.gmra.mxu0 %v990_v20 }
 0x18f   : > { %v651_v21 = vpop.f32.mrf.mxu0 }
 0x190   : > { %679 = vadd.xlane.f32.xlu0 %v651_v21  ;;  %v690_v23 = vmul.f32 %v651_v21, %v651_v21 }
 0x191   : > { %v959_v22 = vpop.f32.mrf.mxu0 }
 0x193   : > { %v654_v24 = vpop.f32.mrf.mxu0 }
 0x194   : > { %v923_v25 = vpack.c.bf16 %v654_v24, %v651_v21  ;;  %692 = vadd.xlane.f32.xlu0 %v690_v23  ;;  %681 = vadd.xlane.f32.xlu1 %v654_v24  ;;  %v691_v27 = vmul.f32 %v654_v24, %v654_v24 }
 0x195   : > { %v960_v26 = vpop.f32.mrf.mxu0 }
 0x196   : > { %924 = vst [vmem:[%s317_s19] sm:$0xff] %v923_v25  }
 0x198   : > { %694 = vadd.xlane.f32.xlu0 %v691_v27 }
 0x219   : > { %v680_v29 = vpop.xlane.xlu0 %679 }
 0x21a   : > { %v683_v30 = vadd.f32 %v680_v29, %v677_v28 }
 0x21c   : > { %686 = vst.msk [vmem:[%s1209_s16] sm:$0xff] %vm672_vm1, %v683_v30 }
 0x21d   : > { %v693_v33 = vpop.xlane.xlu0 %692  ;;  %v682_v34 = vpop.xlane.xlu1 %681 }
 0x21e   : > { %v696_v35 = vadd.f32 %v693_v33, %v688_v31  ;;  %v684_v36 = vadd.f32 %v682_v34, %v678_v32 }
 0x220   : > { %698 = vst.msk [vmem:[%s327_s26] sm:$0xff] %vm672_vm1, %v696_v35  ;;  %687 = vst.msk [vmem:[%s1209_s16 + $0x8] sm:$0xff] %vm672_vm1, %v684_v36 }
 0x221   : > { %v695_v38 = vpop.xlane.xlu0 %694 }
 0x222   : > { %v697_v39 = vadd.f32 %v695_v38, %v689_v37 }
 0x224   : > { %699 = vst.msk [vmem:[%s327_s26 + $0x8] sm:$0xff] %vm672_vm1, %v697_v39 }
 0x225 PF: > { %s17_s23 = sadd.s32 1, %s1013_s23   ;;  %s1253_s21 = smov %s1009_s22 }
 0x226   : > { %p14_p5 = scmp.ge.s32.totalorder %s17_s23, 6   ;;  %s1254_s22 = smov %s1256_s24 }
 0x228   :  { %16 = sbr.rel (!%p14_p5) target bundleno = 2 (0x2), region = 97 }

// kernel: generator_forward.8
= control target key start
LH: loop header
LB: loop body
LE: loop exit
PB: predicated region body
PF: predicated region fallthrough
CT: control target
= control target key end

     0   :  { %s991_s21 = smov 0   ;;  %s993_s22 = smov 0   ;;  %s1186_s0 = inlined_call_operand.vmem [shape: f32[64,1], index: 0, kind: input, shape index: {}]   ;;  %s1187_s1 = inlined_call_operand.vmem [shape: f32[64,1], index: 1, kind: input, shape index: {}]   ;;  %s1188_s2 = inlined_call_operand.vmem [shape: bf16[4,8,64], index: 2, kind: input, shape index: {}]   ;;  %s1189_s3 = inlined_call_operand.vmem [shape: bf16[4,64,512], index: 3, kind: input, shape index: {}]   ;;  %s1190_s4 = inlined_call_operand.vmem [shape: bf16[4,8,512], index: 4, kind: output, shape index: {0}]   ;;  %s1191_s5 = inlined_call_operand.vmem [shape: f32[4,8,1], index: 5, kind: output, shape index: {1}]   ;;  %s1192_s6 = inlined_call_operand.vmem [shape: f32[4,8,1], index: 6, kind: output, shape index: {2}]  }
   0x1   :  { %s995_s23 = smov 0  }
   0x2 LB: > { %s29_s24 = sadd.s32 1, %s948_s22  ;;  %p884_p0 = scmp.ge.s32.totalorder %s952_s23, 1  ;;  %s952_s23 = sphi %s995_s23, %s17_s23   ;;  %s948_s22 = sphi %s993_s22, %s1194_s22   ;;  %s944_s21 = sphi %s991_s21, %s1193_s21  }
   0x3   : > { %p31_p1 = scmp.ge.s32.totalorder %s29_s24, 4  ;;  %p247_p2 = scmp.lt.s32.totalorder %s952_s23, 5 }
   0x5   : > { %s1196_s24 = smov (%p31_p1, %s29_s24), 0  ;;  %p248_p3 = pnand %p884_p0, %p247_p2 }
   0x6   : > { %p297_p4 = scmp.lt.s32.totalorder (!%p248_p3), %s944_s21, 3 }
   0x7   : > { %251 = sbr.rel (%p248_p3) target bundleno = 521 (0x209), region = 36 }
   0xc   : > { %v464_v0 = vld [vmem:[%s1187_s1 + $0x30] sm:$0xff]  ;;  %v954_v2 = vmov 0   ;;  %v465_v3 = vld [vmem:[%s1187_s1 + $0x38] sm:$0xff]  ;;  %v383_v5 = vld [vmem:[%s1186_s0 + $0x28] sm:$0xff]  ;;  %s1198_s21 = smov (!%p297_p4, %s944_s21), 3  ;;  %vm587_vm0 = vcmask 523264  }
   0xd   : > { %v384_v1 = vld [vmem:[%s1186_s0 + $0x30] sm:$0xff]  ;;  %929 = vset.pattern.permute.xlu1 %v954_v2  ;;  %928 = vset.pattern.permute.xlu0 %v954_v2  ;;  %v385_v4 = vld [vmem:[%s1186_s0 + $0x38] sm:$0xff]  ;;  %v382_v6 = vld [vmem:[%s1186_s0 + $0x20] sm:$0xff]  ;;  %s898_s13 = sshll.u32 %s1198_s21, 7  ;;  %s885_s17 = sshll.u32 %s1198_s21, 2  ;;  %vm695_vm1 = vcmask 7168  }
   0xe   : > { %498 = vperm.xlu1 %929, %v464_v0   ;;  %418 = vperm.xlu0 %928, %v384_v1   ;;  %v463_v7 = vld [vmem:[%s1187_s1 + $0x28] sm:$0xff]  ;;  %v462_v8 = vld [vmem:[%s1187_s1 + $0x20] sm:$0xff]  ;;  %v381_v9 = vld [vmem:[%s1186_s0 + $0x18] sm:$0xff]  ;;  %s1067_s16 = scalar_lea.vmem %s1189_s3, %s898_s13  ;;  %s300_s20 = scalar_lea.vmem %s1188_s2, %s885_s17 }
   0xf   : > { %623 = vmatprep.mubr.bf16.mxu0 %v954_v2  ;;  %664 = vmatprep.mubr.bf16.mxu1 %v954_v2  ;;  %v380_v10 = vld [vmem:[%s1186_s0 + $0x10] sm:$0xff]  ;;  %v461_v11 = vld [vmem:[%s1187_s1 + $0x18] sm:$0xff]  ;;  %v379_v13 = vld [vmem:[%s1186_s0 + $0x8] sm:$0xff]  ;;  %s890_s25 = sshll.u32 %s1198_s21, 3  ;;  %s899_s29 = sshll.u32 %s1198_s21, 4 }
  0x10   : > { %v460_v12 = vld [vmem:[%s1187_s1 + $0x10] sm:$0xff]  ;;  %v378_v14 = vld [vmem:[%s1186_s0] sm:$0xff]  ;;  %v459_v15 = vld [vmem:[%s1187_s1 + $0x8] sm:$0xff]  ;;  %s1159_s28 = scalar_lea.vmem %s1191_s5, %s890_s25  ;;  %s319_s8 = scalar_lea.vmem %s1190_s4, %s899_s29 }
  0x11   : > { %v458_v16 = vld [vmem:[%s1187_s1] sm:$0xff]  ;;  %v343_v18 = vld [vmem:[%s1067_s16 + $0x68] sm:$0xff]  ;;  %v344_v19 = vld [vmem:[%s1067_s16 + $0x70] sm:$0xff]  ;;  %s328_s11 = scalar_lea.vmem %s1192_s6, %s890_s25 }
  0x12   : > { %503 = vperm.xlu1 %929, %v465_v3   ;;  %423 = vperm.xlu0 %928, %v385_v4   ;;  %v342_v17 = vld [vmem:[%s1067_s16 + $0x60] sm:$0xff]  ;;  %v345_v20 = vld [vmem:[%s1067_s16 + $0x78] sm:$0xff]  ;;  %v1074_v21 = vld [vmem:[%s1067_s16 + $0x50] sm:$0xff]  ;;  %v372_v23 = vunpack.c.l.bf16 %v343_v18  ;;  %v373_v27 = vunpack.c.h.bf16 %v343_v18  ;;  %v374_v28 = vunpack.c.l.bf16 %v344_v19  ;;  %v375_v38 = vunpack.c.h.bf16 %v344_v19 }
  0x13   : > { %v370_v22 = vunpack.c.l.bf16 %v342_v17  ;;  %v1077_v24 = vld [vmem:[%s1067_s16 + $0x58] sm:$0xff]  ;;  %v1080_v25 = vld [vmem:[%s1067_s16 + $0x40] sm:$0xff]  ;;  %v371_v26 = vunpack.c.h.bf16 %v342_v17  ;;  %v376_v29 = vunpack.c.l.bf16 %v345_v20  ;;  %v366_v30 = vunpack.c.l.bf16 %v1074_v21  ;;  %v1085_v32 = vld [vmem:[%s1067_s16 + $0x48] sm:$0xff] }
  0x14   : > { %v367_v31 = vunpack.c.h.bf16 %v1074_v21  ;;  %v368_v35 = vunpack.c.l.bf16 %v1077_v24  ;;  %v369_v36 = vunpack.c.h.bf16 %v1077_v24  ;;  %v362_v37 = vunpack.c.l.bf16 %v1080_v25  ;;  %v1091_v39 = vld [vmem:[%s1067_s16 + $0x30] sm:$0xff]  ;;  %v1094_v40 = vld [vmem:[%s1067_s16 + $0x38] sm:$0xff]  ;;  %v1097_v45 = vld [vmem:[%s1067_s16 + $0x20] sm:$0xff] }
  0x15   : > { %v363_v46 = vunpack.c.h.bf16 %v1080_v25  ;;  %v364_v47 = vunpack.c.l.bf16 %v1085_v32  ;;  %v365_v48 = vunpack.c.h.bf16 %v1085_v32  ;;  %v377_v49 = vunpack.c.h.bf16 %v345_v20  ;;  %v1107_v54 = vld [vmem:[%s1067_s16 + $0x28] sm:$0xff]  ;;  %v1111_v61 = vld [vmem:[%s1067_s16 + $0x10] sm:$0xff]  ;;  %v1114_v2 = vld [vmem:[%s1067_s16 + $0x18] sm:$0xff] }
  0x16   : > { %413 = vperm.xlu1 %929, %v383_v5   ;;  %408 = vperm.xlu0 %928, %v382_v6   ;;  %v358_v50 = vunpack.c.l.bf16 %v1091_v39  ;;  %v359_v51 = vunpack.c.h.bf16 %v1091_v39  ;;  %v360_v52 = vunpack.c.l.bf16 %v1094_v40  ;;  %v361_v53 = vunpack.c.h.bf16 %v1094_v40 }
  0x17   : > { %v354_v60 = vunpack.c.l.bf16 %v1097_v45  ;;  %v355_v4 = vunpack.c.h.bf16 %v1097_v45  ;;  %v356_v5 = vunpack.c.l.bf16 %v1107_v54  ;;  %v357_v6 = vunpack.c.h.bf16 %v1107_v54 }
  0x1a   : > { %493 = vperm.xlu1 %929, %v463_v7   ;;  %488 = vperm.xlu0 %928, %v462_v8  }
  0x1e   : > { %403 = vperm.xlu1 %929, %v381_v9   ;;  %398 = vperm.xlu0 %928, %v380_v10   ;;  %v350_v10 = vunpack.c.l.bf16 %v1111_v61 }
  0x22   : > { %483 = vperm.xlu1 %929, %v461_v11   ;;  %478 = vperm.xlu0 %928, %v460_v12  }
  0x26   : > { %393 = vperm.xlu1 %929, %v379_v13   ;;  %388 = vperm.xlu0 %928, %v378_v14   ;;  %v351_v14 = vunpack.c.h.bf16 %v1111_v61 }
  0x2a   : > { %473 = vperm.xlu1 %929, %v459_v15   ;;  %468 = vperm.xlu0 %928, %v458_v16   ;;  %v352_v15 = vunpack.c.l.bf16 %v1114_v2  ;;  %v353_v16 = vunpack.c.h.bf16 %v1114_v2 }
  0x89   : > { %v499_v33 = vpop.permute.xlu1 %498  ;;  %v419_v34 = vpop.permute.xlu0 %418 }
  0x8a   : > { %v450_v41 = vmul.f32 %v419_v34, %v370_v22  ;;  %v452_v42 = vmul.f32 %v419_v34, %v372_v23  ;;  %v451_v43 = vmul.f32 %v419_v34, %v371_v26  ;;  %v453_v44 = vmul.f32 %v419_v34, %v373_v27 }
  0x8c   : > { %v531_v57 = vadd.f32 %v499_v33, %v451_v43  ;;  %v533_v58 = vadd.f32 %v499_v33, %v453_v44  ;;  %v530_v59 = vadd.f32 %v499_v33, %v450_v41  ;;  %v532_v1 = vadd.f32 %v499_v33, %v452_v42 }
  0x8d   : > { %v504_v55 = vpop.permute.xlu1 %503  ;;  %v424_v56 = vpop.permute.xlu0 %423 }
  0x8e   : > { %v454_v62 = vmul.f32 %v424_v56, %v374_v28  ;;  %v456_v63 = vmul.f32 %v424_v56, %v376_v29  ;;  %v455_v0 = vmul.f32 %v424_v56, %v375_v38  ;;  %v457_v3 = vmul.f32 %v424_v56, %v377_v49 }
  0x8f   : > { %v563_v17 = vmax.f32 %v531_v57, 0.0  ;;  %v565_v18 = vmax.f32 %v533_v58, 0.0  ;;  %v562_v19 = vmax.f32 %v530_v59, 0.0  ;;  %v564_v20 = vmax.f32 %v532_v1, 0.0 }
  0x90   : > { %v535_v7 = vadd.f32 %v504_v55, %v455_v0  ;;  %v534_v8 = vadd.f32 %v504_v55, %v454_v62  ;;  %v536_v9 = vadd.f32 %v504_v55, %v456_v63  ;;  %v537_v13 = vadd.f32 %v504_v55, %v457_v3 }
  0x91   : > { %v414_v11 = vpop.permute.xlu1 %413  ;;  %v409_v12 = vpop.permute.xlu0 %408 }
  0x92   : > { %v446_v21 = vmul.f32 %v414_v11, %v366_v30  ;;  %v447_v22 = vmul.f32 %v414_v11, %v367_v31  ;;  %v448_v23 = vmul.f32 %v414_v11, %v368_v35  ;;  %v449_v24 = vmul.f32 %v414_v11, %v369_v36  ;;  %v1124_v36 = vld [vmem:[%s1067_s16] sm:$0xff] }
  0x93   : > { %v567_v25 = vmax.f32 %v535_v7, 0.0  ;;  %v569_v26 = vmax.f32 %v537_v13, 0.0  ;;  %v566_v27 = vmax.f32 %v534_v8, 0.0  ;;  %v568_v28 = vmax.f32 %v536_v9, 0.0 }
  0x94   : > { %v442_v29 = vmul.f32 %v409_v12, %v362_v37  ;;  %v443_v32 = vmul.f32 %v409_v12, %v363_v46  ;;  %v444_v33 = vmul.f32 %v409_v12, %v364_v47  ;;  %v445_v34 = vmul.f32 %v409_v12, %v365_v48 }
  0x95   : > { %v494_v38 = vpop.permute.xlu1 %493  ;;  %v489_v41 = vpop.permute.xlu0 %488  ;;  %v584_v56 = vpack.c.bf16 %v567_v25, %v563_v17  ;;  %v586_v57 = vpack.c.bf16 %v569_v26, %v565_v18  ;;  %v583_v58 = vpack.c.bf16 %v566_v27, %v562_v19  ;;  %v585_v59 = vpack.c.bf16 %v568_v28, %v564_v20 }
  0x96   : > { %v526_v42 = vadd.f32 %v494_v38, %v446_v21  ;;  %v527_v43 = vadd.f32 %v494_v38, %v447_v22  ;;  %v528_v44 = vadd.f32 %v494_v38, %v448_v23  ;;  %v529_v49 = vadd.f32 %v494_v38, %v449_v24 }
  0x97   : > { %v522_v55 = vadd.f32 %v489_v41, %v442_v29  ;;  %v523_v30 = vadd.f32 %v489_v41, %v443_v32  ;;  %v524_v31 = vadd.f32 %v489_v41, %v444_v33  ;;  %v525_v35 = vadd.f32 %v489_v41, %v445_v34  ;;  %599 = vmatprep.subr.bf16.mxu0 %v584_v56 }
  0x98   : > { %v559_v48 = vmax.f32 %v527_v43, 0.0  ;;  %v561_v63 = vmax.f32 %v529_v49, 0.0  ;;  %640 = vmatprep.subr.bf16.mxu1 %v586_v57  ;;  %v346_v7 = vunpack.c.l.bf16 %v1124_v36  ;;  %600 = vmatpush1.bf16.msra.mxu0 %v583_v58  ;;  %v558_v12 = vmax.f32 %v526_v42, 0.0 }
  0x99   : > { %v404_v37 = vpop.permute.xlu1 %403  ;;  %v399_v46 = vpop.permute.xlu0 %398  ;;  %v555_v47 = vmax.f32 %v523_v30, 0.0  ;;  %v557_v62 = vmax.f32 %v525_v35, 0.0  ;;  %v554_v3 = vmax.f32 %v522_v55, 0.0  ;;  %641 = vmatpush1.bf16.msra.mxu1 %v585_v59  ;;  %v556_v21 = vmax.f32 %v524_v31, 0.0 }
  0x9a   : > { %v438_v0 = vmul.f32 %v404_v37, %v358_v50  ;;  %v439_v1 = vmul.f32 %v404_v37, %v359_v51  ;;  %v440_v8 = vmul.f32 %v404_v37, %v360_v52  ;;  %v441_v9 = vmul.f32 %v404_v37, %v361_v53 }
  0x9b   : > { %v434_v11 = vmul.f32 %v399_v46, %v354_v60  ;;  %v435_v50 = vmul.f32 %v399_v46, %v355_v4  ;;  %v436_v13 = vmul.f32 %v399_v46, %v356_v5  ;;  %v580_v39 = vpack.c.bf16 %v559_v48, %v555_v47  ;;  %v331_v60 = vld [vmem:[%s1067_s16 + $0x8] sm:$0xff] }
  0x9c   : > { %v582_v51 = vpack.c.bf16 %v561_v63, %v557_v62  ;;  %v437_v17 = vmul.f32 %v399_v46, %v357_v6  ;;  %v579_v20 = vpack.c.bf16 %v558_v12, %v554_v3  ;;  %v560_v52 = vmax.f32 %v528_v44, 0.0 }
  0x9d   : > { %v484_v18 = vpop.permute.xlu1 %483  ;;  %v479_v19 = vpop.permute.xlu0 %478  ;;  %601 = vmatprep.subr.bf16.mxu0 %v580_v39  ;;  %v347_v22 = vunpack.c.h.bf16 %v1124_v36  ;;  %v348_v29 = vunpack.c.l.bf16 %v331_v60  ;;  %v349_v32 = vunpack.c.h.bf16 %v331_v60 }
  0x9e   : > { %642 = vmatprep.subr.bf16.mxu1 %v582_v51  ;;  %v518_v40 = vadd.f32 %v484_v18, %v438_v0  ;;  %v519_v53 = vadd.f32 %v484_v18, %v439_v1  ;;  %v520_v45 = vadd.f32 %v484_v18, %v440_v8  ;;  %v521_v4 = vadd.f32 %v484_v18, %v441_v9  ;;  %v570_v51 = vld [vmem:[%s300_s20] sm:$0xf] }
  0x9f   : > { %v514_v5 = vadd.f32 %v479_v19, %v434_v11  ;;  %v515_v23 = vadd.f32 %v479_v19, %v435_v50  ;;  %v516_v24 = vadd.f32 %v479_v19, %v436_v13  ;;  %602 = vmatpush1.bf16.msra.mxu0 %v579_v20  ;;  %v517_v54 = vadd.f32 %v479_v19, %v437_v17 }
  0xa0   : > { %v581_v6 = vpack.c.bf16 %v560_v52, %v556_v21  ;;  %v551_v25 = vmax.f32 %v519_v53, 0.0  ;;  %v550_v26 = vmax.f32 %v518_v40, 0.0  ;;  %v553_v38 = vmax.f32 %v521_v4, 0.0 }
  0xa1   : > { %v394_v27 = vpop.permute.xlu1 %393  ;;  %v389_v28 = vpop.permute.xlu0 %388  ;;  %v547_v33 = vmax.f32 %v515_v23, 0.0  ;;  %v546_v34 = vmax.f32 %v514_v5, 0.0  ;;  %v548_v41 = vmax.f32 %v516_v24, 0.0  ;;  %v549_v30 = vmax.f32 %v517_v54, 0.0 }
  0xa2   : > { %643 = vmatpush1.bf16.msra.mxu1 %v581_v6  ;;  %v430_v42 = vmul.f32 %v394_v27, %v350_v10  ;;  %v431_v43 = vmul.f32 %v394_v27, %v351_v14  ;;  %v432_v44 = vmul.f32 %v394_v27, %v352_v15  ;;  %v433_v49 = vmul.f32 %v394_v27, %v353_v16 }
  0xa3   : > { %v576_v55 = vpack.c.bf16 %v551_v25, %v547_v33  ;;  %v575_v31 = vpack.c.bf16 %v550_v26, %v546_v34  ;;  %v552_v35 = vmax.f32 %v520_v45, 0.0  ;;  %v426_v36 = vmul.f32 %v389_v28, %v346_v7 }
  0xa4   : > { %v427_v56 = vmul.f32 %v389_v28, %v347_v22  ;;  %v428_v57 = vmul.f32 %v389_v28, %v348_v29  ;;  %v429_v58 = vmul.f32 %v389_v28, %v349_v32  ;;  %v578_v61 = vpack.c.bf16 %v553_v38, %v549_v30 }
  0xa5   : > { %v474_v59 = vpop.permute.xlu1 %473  ;;  %v469_v37 = vpop.permute.xlu0 %468  ;;  %603 = vmatprep.subr.bf16.mxu0 %v576_v55  ;;  %v577_v62 = vpack.c.bf16 %v552_v35, %v548_v41  ;;  %v955_v17 = vmov 0.0  }
  0xa6   : > { %v510_v10 = vadd.f32 %v474_v59, %v430_v42  ;;  %v511_v14 = vadd.f32 %v474_v59, %v431_v43  ;;  %v512_v46 = vadd.f32 %v474_v59, %v432_v44  ;;  %v513_v15 = vadd.f32 %v474_v59, %v433_v49  ;;  %604 = vmatpush1.bf16.msra.mxu0 %v575_v31 }
  0xa7   : > { %v506_v47 = vadd.f32 %v469_v37, %v426_v36  ;;  %v507_v2 = vadd.f32 %v469_v37, %v427_v56  ;;  %v508_v16 = vadd.f32 %v469_v37, %v428_v57  ;;  %644 = vmatprep.subr.bf16.mxu1 %v578_v61  ;;  %v509_v48 = vadd.f32 %v469_v37, %v429_v58 }
  0xa8   : > { %v543_v63 = vmax.f32 %v511_v14, 0.0  ;;  %v542_v0 = vmax.f32 %v510_v10, 0.0  ;;  %v545_v3 = vmax.f32 %v513_v15, 0.0  ;;  %645 = vmatpush1.bf16.msra.mxu1 %v577_v62  ;;  %v544_v11 = vmax.f32 %v512_v46, 0.0  ;;  %696 = vst.msk [vmem:[%s1159_s28] sm:$0xff] %vm695_vm1, %v955_v17  ;;  %697 = vst.msk [vmem:[%s328_s11] sm:$0xff] %vm695_vm1, %v955_v17 }
  0xa9   : > { %v539_v1 = vmax.f32 %v507_v2, 0.0  ;;  %v538_v7 = vmax.f32 %v506_v47, 0.0  ;;  %v540_v8 = vmax.f32 %v508_v16, 0.0  ;;  %v541_v9 = vmax.f32 %v509_v48, 0.0 }
  0xab   : > { %v572_v12 = vpack.c.bf16 %v543_v63, %v539_v1  ;;  %v571_v50 = vpack.c.bf16 %v542_v0, %v538_v7  ;;  %v574_v13 = vpack.c.bf16 %v545_v3, %v541_v9  ;;  %v573_v39 = vpack.c.bf16 %v544_v11, %v540_v8 }
  0xad   : > { %605 = vmatprep.subr.bf16.mxu0 %v572_v12  ;;  %646 = vmatprep.subr.bf16.mxu1 %v574_v13 }
  0xae   : > { %606 = vmatpush1.bf16.msra.mxu0 %v571_v50  ;;  %647 = vmatpush1.bf16.msra.mxu1 %v573_v39 }
  0xaf   : > { %v698_v29 = vld [vmem:[%s1159_s28] sm:$0xff] }
  0xb0   : > { %v707_v33 = vld [vmem:[%s328_s11] sm:$0xff] }
  0xb1   : > { %892 = vmatmul.mubr.msk.bf16.vlgmr.msra.gmra.mxu0 %vm587_vm0, %v570_v51  ;;  %893 = vmatmul.mubr.msk.bf16.vlgmr.msra.gmra.mxu1 %vm587_vm0, %v570_v51 }
 0x171   : > { %v625_v18 = vpop.f32.mrf.mxu0  ;;  %v666_v19 = vpop.f32.mrf.mxu1 }
 0x172   : > { %v708_v20 = vmul.f32 %v625_v18, %v625_v18  ;;  %v710_v52 = vmul.f32 %v666_v19, %v666_v19 }
 0x173   : > { %v627_v21 = vpop.f32.mrf.mxu0  ;;  %v668_v60 = vpop.f32.mrf.mxu1 }
 0x174   : > { %v900_v40 = vpack.c.bf16 %v627_v21, %v625_v18  ;;  %v699_v53 = vadd.f32 %v627_v21, %v625_v18  ;;  %v709_v45 = vmul.f32 %v627_v21, %v627_v21  ;;  %v901_v22 = vpack.c.bf16 %v668_v60, %v666_v19 }
 0x175   : > { %v629_v4 = vpop.f32.mrf.mxu0  ;;  %v670_v5 = vpop.f32.mrf.mxu1  ;;  %v711_v26 = vmul.f32 %v668_v60, %v668_v60 }
 0x176   : > { %689 = vst [vmem:[%s319_s8] sm:$0xff] %v900_v40  ;;  %v700_v23 = vadd.f32 %v699_v53, %v666_v19  ;;  %v712_v24 = vadd.f32 %v709_v45, %v708_v20  ;;  %690 = vst [vmem:[%s319_s8 + $0x8] sm:$0xff] %v901_v22 }
 0x177   : > { %v630_v54 = vpop.f32.mrf.mxu0  ;;  %v671_v6 = vpop.f32.mrf.mxu1 }
 0x178   : > { %v701_v25 = vadd.f32 %v700_v23, %v668_v60  ;;  %v713_v27 = vadd.f32 %v712_v24, %v710_v52 }
 0x17a   : > { %702 = vadd.xlane.f32.xlu0 %v701_v25  ;;  %v714_v28 = vadd.f32 %v713_v27, %v711_v26 }
 0x17c   : > { %715 = vadd.xlane.f32.xlu1 %v714_v28 }
 0x203   : > { %v703_v32 = vpop.xlane.xlu0 %702 }
 0x204   : > { %v704_v34 = vadd.f32 %v703_v32, %v698_v29 }
 0x205   : > { %v716_v38 = vpop.xlane.xlu1 %715 }
 0x206   : > { %706 = vst.msk [vmem:[%s1159_s28] sm:$0xff] %vm695_vm1, %v704_v34  ;;  %v717_v41 = vadd.f32 %v716_v38, %v707_v33 }
 0x208   : > { %718 = vst.msk [vmem:[%s328_s11] sm:$0xff] %vm695_vm1, %v717_v41 }
 0x209 PF: > { %s17_s23 = sadd.s32 1, %s952_s23   ;;  %s1193_s21 = smov %s948_s22 }
 0x20a   : > { %p14_p5 = scmp.ge.s32.totalorder %s17_s23, 6   ;;  %s1194_s22 = smov %s1196_s24 }
 0x20c   :  { %16 = sbr.rel (!%p14_p5) target bundleno = 2 (0x2), region = 97 }

// kernel: tile.72
= control target key start
LH: loop header
LB: loop body
LE: loop exit
PB: predicated region body
PF: predicated region fallthrough
CT: control target
= control target key end

     0   :  { %s22_s0 = inlined_call_operand.vmem [shape: f32[8], index: 0, kind: input, shape index: {}]   ;;  %s23_s1 = inlined_call_operand.vmem [shape: f32[4,8], index: 1, kind: output, shape index: {}]  }
   0x1   :  { %v4_v0 = vld [vmem:[%s22_s0] ss:$0 sm:$0xff] }
   0x2   :  { %5 = vst [vmem:[%s23_s1] sm:$0xf] %v4_v0 }

// kernel: tile.6
= control target key start
LH: loop header
LB: loop body
LE: loop exit
PB: predicated region body
PF: predicated region fallthrough
CT: control target
= control target key end

     0   :  { %s67_s8 = smov 125   ;;  %vm8_vm0 = vcmask 7168   ;;  %s68_s11 = smov 126   ;;  %s118_s0 = inlined_call_operand.vmem [shape: f32[4,8], index: 0, kind: input, shape index: {}]   ;;  %s119_s1 = inlined_call_operand.vmem [shape: f32[32,1], index: 1, kind: output, shape index: {}]  }
   0x1   :  { %v5_v0 = vld [vmem:[%s118_s0] sm:$0xf]  ;;  %s66_s0 = smov 127   ;;  %s69_s12 = smov 124  }
   0x2   :  { %6 = vst [vmem:[#allocation0] sm:$0xf] %v5_v0  ;;  %s70_s13 = smov 123   ;;  %s71_s14 = smov 122  }
   0x3   :  { %s72_s15 = smov 121  }
   0x9   :  { %v10_v1 = vld [vmem:[#allocation0] sm:$0xf]  }
   0xa   :  { %v22_v2 = vld [vmem:[#allocation0] sm:$0xf]   ;;  %11 = vrot.lane.b32.xlu0 %v10_v1, %s66_s0 }
   0xb   :  { %23 = vrot.lane.b32.xlu1 %v22_v2, %s67_s8  ;;  %v16_v3 = vld [vmem:[#allocation0] sm:$0xf]  }
   0xc   :  { %v28_v4 = vld [vmem:[#allocation0] sm:$0xf]  }
   0xd   :  { %v7_v5 = vld [vmem:[#allocation0] sm:$0xf]  }
   0xe   :  { %9 = vst.msk [vmem:[%s119_s1] ss:$8 sm:$0xf] %vm8_vm0, %v7_v5   ;;  %17 = vrot.lane.b32.xlu0 %v16_v3, %s68_s11  ;;  %v34_v6 = vld [vmem:[#allocation0] sm:$0xf]  }
   0xf   :  { %29 = vrot.lane.b32.xlu1 %v28_v4, %s69_s12  ;;  %v40_v7 = vld [vmem:[#allocation0] sm:$0xf]  }
  0x10   :  { %v46_v8 = vld [vmem:[#allocation0] sm:$0xf]  }
  0x12   :  { %35 = vrot.lane.b32.xlu0 %v34_v6, %s70_s13 }
  0x13   :  { %41 = vrot.lane.b32.xlu1 %v40_v7, %s71_s14 }
  0x16   :  { %47 = vrot.lane.b32.xlu0 %v46_v8, %s72_s15 }
  0x7c   :  { %v12_v9 = vpop.permute.xlu0 %11  }
  0x7d   :  { %v24_v10 = vpop.permute.xlu1 %23   ;;  %52 = vst.msk [vmem:[%s119_s1 + $0x1] ss:$8 sm:$0xf] %vm8_vm0, %v12_v9  }
  0x7e   :  { %54 = vst.msk [vmem:[%s119_s1 + $0x3] ss:$8 sm:$0xf] %vm8_vm0, %v24_v10  }
  0x80   :  { %v18_v11 = vpop.permute.xlu0 %17  }
  0x81   :  { %v30_v12 = vpop.permute.xlu1 %29   ;;  %53 = vst.msk [vmem:[%s119_s1 + $0x2] ss:$8 sm:$0xf] %vm8_vm0, %v18_v11  }
  0x82   :  { %55 = vst.msk [vmem:[%s119_s1 + $0x4] ss:$8 sm:$0xf] %vm8_vm0, %v30_v12  }
  0x84   :  { %v36_v13 = vpop.permute.xlu0 %35  }
  0x85   :  { %v42_v14 = vpop.permute.xlu1 %41   ;;  %56 = vst.msk [vmem:[%s119_s1 + $0x5] ss:$8 sm:$0xf] %vm8_vm0, %v36_v13  }
  0x86   :  { %57 = vst.msk [vmem:[%s119_s1 + $0x6] ss:$8 sm:$0xf] %vm8_vm0, %v42_v14  }
  0x88   :  { %v48_v15 = vpop.permute.xlu0 %47  }
  0x89   :  { %58 = vst.msk [vmem:[%s119_s1 + $0x7] ss:$8 sm:$0xf] %vm8_vm0, %v48_v15  }

// kernel: generator_forward.9
= control target key start
LH: loop header
LB: loop body
LE: loop exit
PB: predicated region body
PF: predicated region fallthrough
CT: control target
= control target key end

     0   :  { %s1242_s15 = smov 0   ;;  %s1244_s16 = smov 0   ;;  %s1795_s0 = inlined_call_operand.vmem [shape: f32[32,1], index: 0, kind: input, shape index: {}]   ;;  %s1796_s1 = inlined_call_operand.vmem [shape: f32[32,1], index: 1, kind: input, shape index: {}]   ;;  %s1797_s2 = inlined_call_operand.vmem [shape: bf16[4,3,32], index: 2, kind: input, shape index: {}]   ;;  %s1798_s3 = inlined_call_operand.vmem [shape: bf16[4,32,2048], index: 3, kind: input, shape index: {}]   ;;  %s1799_s4 = inlined_call_operand.vmem [shape: f32[4,3,2048], index: 4, kind: output, shape index: {}]  }
   0x1   :  { %s1246_s17 = smov 0  }
   0x2 LB: > { %s26_s18 = sadd.s32 1, %s1210_s16  ;;  %p1115_p0 = scmp.ge.s32.totalorder %s1214_s17, 1  ;;  %s1214_s17 = sphi %s1246_s17, %s14_s17   ;;  %s1210_s16 = sphi %s1244_s16, %s1845_s16   ;;  %s1206_s15 = sphi %s1242_s15, %s1844_s15  }
   0x3   : > { %p28_p1 = scmp.ge.s32.totalorder %s26_s18, 4  ;;  %p192_p2 = scmp.lt.s32.totalorder %s1214_s17, 5 }
   0x5   : > { %s1847_s18 = smov (%p28_p1, %s26_s18), 0  ;;  %p193_p3 = pnand %p1115_p0, %p192_p2 }
   0x6   : > { %p230_p4 = scmp.lt.s32.totalorder (!%p193_p3), %s1206_s15, 3 }
   0x7   : > { %196 = sbr.rel (%p193_p3) target bundleno = 426 (0x1aa), region = 36 }
   0xc   : > { %v441_v0 = vld [vmem:[%s1796_s1 + $0x10] sm:$0xff]  ;;  %v1800_v2 = vmov 0   ;;  %v442_v3 = vld [vmem:[%s1796_s1 + $0x18] sm:$0xff]  ;;  %v352_v5 = vld [vmem:[%s1795_s0 + $0x8] sm:$0xff]  ;;  %s1849_s15 = smov (!%p230_p4, %s1206_s15), 3  ;;  %vm624_vm0 = vcmask 261120  }
   0xd   : > { %v353_v1 = vld [vmem:[%s1795_s0 + $0x10] sm:$0xff]  ;;  %1159 = vset.pattern.permute.xlu1 %v1800_v2  ;;  %1158 = vset.pattern.permute.xlu0 %v1800_v2  ;;  %v354_v4 = vld [vmem:[%s1795_s0 + $0x18] sm:$0xff]  ;;  %v351_v6 = vld [vmem:[%s1795_s0] sm:$0xff]  ;;  %s1131_s9 = sshll.u32 %s1849_s15, 8  ;;  %s1116_s13 = sshll.u32 %s1849_s15, 1 }
   0xe   : > { %455 = vperm.xlu1 %1159, %v441_v0   ;;  %367 = vperm.xlu0 %1158, %v353_v1   ;;  %v440_v7 = vld [vmem:[%s1796_s1 + $0x8] sm:$0xff]  ;;  %v439_v8 = vld [vmem:[%s1796_s1] sm:$0xff]  ;;  %s1298_s12 = scalar_lea.vmem %s1798_s3, %s1131_s9  ;;  %s233_s20 = scalar_lea.vmem %s1797_s2, %s1116_s13 }
   0xf   : > { %660 = vmatprep.mubr.bf16.mxu0 %v1800_v2  ;;  %701 = vmatprep.mubr.bf16.mxu1 %v1800_v2  ;;  %v1301_v9 = vld [vmem:[%s1298_s12 + $0x80] sm:$0xff]  ;;  %v1307_v11 = vld [vmem:[%s1298_s12 + $0x88] sm:$0xff]  ;;  %v1332_v24 = vld [vmem:[%s1298_s12 + $0x90] sm:$0xff]  ;;  %s1132_s21 = sshll.u32 %s1849_s15, 6 }
  0x10   : > { %v1304_v10 = vld [vmem:[%s1298_s12 + $0xc0] sm:$0xff]  ;;  %v1310_v12 = vld [vmem:[%s1298_s12 + $0xc8] sm:$0xff]  ;;  %v320_v16 = vunpack.c.h.bf16 %v1301_v9  ;;  %v322_v18 = vunpack.c.h.bf16 %v1307_v11  ;;  %v319_v21 = vunpack.c.l.bf16 %v1301_v9  ;;  %v321_v23 = vunpack.c.l.bf16 %v1307_v11  ;;  %v1335_v25 = vld [vmem:[%s1298_s12 + $0xd0] sm:$0xff]  ;;  %s1776_s24 = scalar_lea.vmem %s1799_s4, %s1132_s21 }
  0x11   : > { %v1313_v13 = vld [vmem:[%s1298_s12] sm:$0xff]  ;;  %v1319_v15 = vld [vmem:[%s1298_s12 + $0x8] sm:$0xff]  ;;  %v336_v17 = vunpack.c.h.bf16 %v1304_v10  ;;  %v338_v20 = vunpack.c.h.bf16 %v1310_v12  ;;  %v335_v22 = vunpack.c.l.bf16 %v1304_v10  ;;  %v337_v26 = vunpack.c.l.bf16 %v1310_v12  ;;  %v1342_v30 = vld [vmem:[%s1298_s12 + $0x98] sm:$0xff] }
  0x12   : > { %460 = vperm.xlu1 %1159, %v442_v3   ;;  %372 = vperm.xlu0 %1158, %v354_v4   ;;  %v1316_v14 = vld [vmem:[%s1298_s12 + $0x40] sm:$0xff]  ;;  %v1325_v19 = vld [vmem:[%s1298_s12 + $0x48] sm:$0xff]  ;;  %v288_v27 = vunpack.c.h.bf16 %v1313_v13  ;;  %v290_v29 = vunpack.c.h.bf16 %v1319_v15  ;;  %v1345_v31 = vld [vmem:[%s1298_s12 + $0xd8] sm:$0xff]  ;;  %v287_v33 = vunpack.c.l.bf16 %v1313_v13  ;;  %v289_v35 = vunpack.c.l.bf16 %v1319_v15 }
  0x13   : > { %v304_v28 = vunpack.c.h.bf16 %v1316_v14  ;;  %v306_v32 = vunpack.c.h.bf16 %v1325_v19  ;;  %v303_v34 = vunpack.c.l.bf16 %v1316_v14  ;;  %v1352_v36 = vld [vmem:[%s1298_s12 + $0xa0] sm:$0xff]  ;;  %v305_v38 = vunpack.c.l.bf16 %v1325_v19  ;;  %v1362_v42 = vld [vmem:[%s1298_s12 + $0x10] sm:$0xff]  ;;  %v1372_v48 = vld [vmem:[%s1298_s12 + $0x18] sm:$0xff] }
  0x14   : > { %v1355_v37 = vld [vmem:[%s1298_s12 + $0xe0] sm:$0xff]  ;;  %v323_v39 = vunpack.c.l.bf16 %v1332_v24  ;;  %v324_v40 = vunpack.c.h.bf16 %v1332_v24  ;;  %v1365_v43 = vld [vmem:[%s1298_s12 + $0x50] sm:$0xff]  ;;  %v340_v44 = vunpack.c.h.bf16 %v1335_v25  ;;  %v325_v45 = vunpack.c.l.bf16 %v1342_v30  ;;  %v1375_v49 = vld [vmem:[%s1298_s12 + $0x58] sm:$0xff] }
  0x15   : > { %v326_v46 = vunpack.c.h.bf16 %v1342_v30  ;;  %v342_v50 = vunpack.c.h.bf16 %v1345_v31  ;;  %v1382_v54 = vld [vmem:[%s1298_s12 + $0xa8] sm:$0xff]  ;;  %v1392_v60 = vld [vmem:[%s1298_s12 + $0xb0] sm:$0xff]  ;;  %v1402_v3 = vld [vmem:[%s1298_s12 + $0x20] sm:$0xff] }
  0x16   : > { %362 = vperm.xlu1 %1159, %v352_v5   ;;  %357 = vperm.xlu0 %1158, %v351_v6   ;;  %v1385_v55 = vld [vmem:[%s1298_s12 + $0xe8] sm:$0xff]  ;;  %v1395_v61 = vld [vmem:[%s1298_s12 + $0xf0] sm:$0xff]  ;;  %v1405_v4 = vld [vmem:[%s1298_s12 + $0x60] sm:$0xff] }
  0x17   : > { %v1412_v53 = vld [vmem:[%s1298_s12 + $0x28] sm:$0xff]  ;;  %v1422_v6 = vld [vmem:[%s1298_s12 + $0xb8] sm:$0xff]  ;;  %v1432_v56 = vld [vmem:[%s1298_s12 + $0x30] sm:$0xff] }
  0x18   : > { %v1415_v51 = vld [vmem:[%s1298_s12 + $0x68] sm:$0xff]  ;;  %v1425_v63 = vld [vmem:[%s1298_s12 + $0xf8] sm:$0xff]  ;;  %v1435_v52 = vld [vmem:[%s1298_s12 + $0x70] sm:$0xff] }
  0x19   : > { %v1442_v62 = vld [vmem:[%s1298_s12 + $0x38] sm:$0xff]  ;;  %v350_v2 = vunpack.c.h.bf16 %v1425_v63 }
  0x1a   : > { %450 = vperm.xlu1 %1159, %v440_v7   ;;  %445 = vperm.xlu0 %1158, %v439_v8   ;;  %v1445_v8 = vld [vmem:[%s1298_s12 + $0x78] sm:$0xff] }
  0x89   : > { %v1455_v47 = vpop.permute.xlu1 %455  ;;  %v1457_v41 = vpop.permute.xlu0 %367 }
  0x8a   : > { %v408_v1 = vmul.f32 %v1457_v41, %v320_v16  ;;  %v410_v0 = vmul.f32 %v1457_v41, %v322_v18  ;;  %v407_v5 = vmul.f32 %v1457_v41, %v319_v21  ;;  %v409_v59 = vmul.f32 %v1457_v41, %v321_v23 }
  0x8b   : > { %v412_v57 = vmul.f32 %v1457_v41, %v324_v40  ;;  %v414_v16 = vmul.f32 %v1457_v41, %v326_v46  ;;  %v411_v18 = vmul.f32 %v1457_v41, %v323_v39  ;;  %v413_v9 = vmul.f32 %v1457_v41, %v325_v45 }
  0x8c   : > { %v496_v11 = vadd.f32 %v1455_v47, %v408_v1  ;;  %v498_v21 = vadd.f32 %v1455_v47, %v410_v0  ;;  %v495_v23 = vadd.f32 %v1455_v47, %v407_v5  ;;  %v497_v40 = vadd.f32 %v1455_v47, %v409_v59 }
  0x8d   : > { %v1491_v7 = vpop.permute.xlu1 %460  ;;  %v1493_v58 = vpop.permute.xlu0 %372  ;;  %v1496_v24 = vadd.f32 %v1455_v47, %v412_v57  ;;  %v1499_v39 = vadd.f32 %v1455_v47, %v414_v16  ;;  %v1502_v30 = vadd.f32 %v1455_v47, %v411_v18  ;;  %v1512_v57 = vadd.f32 %v1455_v47, %v413_v9 }
  0x8e   : > { %v424_v46 = vmul.f32 %v1493_v58, %v336_v17  ;;  %v560_v59 = vmax.f32 %v496_v11, 0.0  ;;  %v426_v0 = vmul.f32 %v1493_v58, %v338_v20  ;;  %v562_v1 = vmax.f32 %v498_v21, 0.0 }
  0x8f   : > { %v423_v5 = vmul.f32 %v1493_v58, %v335_v22  ;;  %v559_v16 = vmax.f32 %v495_v23, 0.0  ;;  %v425_v18 = vmul.f32 %v1493_v58, %v337_v26  ;;  %v561_v45 = vmax.f32 %v497_v40, 0.0 }
  0x90   : > { %v512_v17 = vadd.f32 %v1491_v7, %v424_v46  ;;  %v514_v11 = vadd.f32 %v1491_v7, %v426_v0  ;;  %v428_v20 = vmul.f32 %v1493_v58, %v340_v44  ;;  %v564_v12 = vmax.f32 %v1496_v24, 0.0 }
  0x91   : > { %v1525_v9 = vpop.permute.xlu1 %362  ;;  %v1527_v21 = vpop.permute.xlu0 %357  ;;  %v511_v10 = vadd.f32 %v1491_v7, %v423_v5  ;;  %v513_v22 = vadd.f32 %v1491_v7, %v425_v18  ;;  %v430_v26 = vmul.f32 %v1493_v58, %v342_v50 }
  0x92   : > { %v576_v23 = vmax.f32 %v512_v17, 0.0  ;;  %v578_v40 = vmax.f32 %v514_v11, 0.0  ;;  %v376_v44 = vmul.f32 %v1527_v21, %v288_v27  ;;  %v392_v46 = vmul.f32 %v1525_v9, %v304_v28 }
  0x93   : > { %v575_v0 = vmax.f32 %v511_v10, 0.0  ;;  %v577_v5 = vmax.f32 %v513_v22, 0.0  ;;  %v378_v24 = vmul.f32 %v1527_v21, %v290_v29  ;;  %v394_v50 = vmul.f32 %v1525_v9, %v306_v32 }
  0x94   : > { %v609_v18 = vpack.c.bf16 %v576_v23, %v560_v59  ;;  %v611_v17 = vpack.c.bf16 %v578_v40, %v562_v1  ;;  %v375_v27 = vmul.f32 %v1527_v21, %v287_v33  ;;  %v391_v28 = vmul.f32 %v1525_v9, %v303_v34 }
  0x95   : > { %v1553_v11 = vpop.permute.xlu1 %450  ;;  %v1555_v10 = vpop.permute.xlu0 %445  ;;  %v608_v22 = vpack.c.bf16 %v575_v0, %v559_v16  ;;  %v610_v29 = vpack.c.bf16 %v577_v5, %v561_v45  ;;  %v377_v32 = vmul.f32 %v1527_v21, %v289_v35  ;;  %v393_v13 = vmul.f32 %v1525_v9, %v305_v38 }
  0x96   : > { %640 = vmatprep.subr.bf16.mxu0 %v609_v18  ;;  %681 = vmatprep.subr.bf16.mxu1 %v611_v17  ;;  %v464_v14 = vadd.f32 %v1555_v10, %v376_v44  ;;  %v480_v33 = vadd.f32 %v1553_v11, %v392_v46  ;;  %v466_v34 = vadd.f32 %v1555_v10, %v378_v24  ;;  %v566_v59 = vmax.f32 %v1499_v39, 0.0 }
  0x97   : > { %641 = vmatpush1.bf16.msra.mxu0 %v608_v22  ;;  %682 = vmatpush1.bf16.msra.mxu1 %v610_v29  ;;  %v482_v15 = vadd.f32 %v1553_v11, %v394_v50  ;;  %v463_v19 = vadd.f32 %v1555_v10, %v375_v27  ;;  %v479_v35 = vadd.f32 %v1553_v11, %v391_v28  ;;  %v563_v38 = vmax.f32 %v1502_v30, 0.0 }
  0x98   : > { %v528_v45 = vmax.f32 %v464_v14, 0.0  ;;  %v544_v1 = vmax.f32 %v480_v33, 0.0  ;;  %v530_v16 = vmax.f32 %v466_v34, 0.0  ;;  %v465_v23 = vadd.f32 %v1555_v10, %v377_v32 }
  0x99   : > { %v546_v40 = vmax.f32 %v482_v15, 0.0  ;;  %v527_v44 = vmax.f32 %v463_v19, 0.0  ;;  %v543_v39 = vmax.f32 %v479_v35, 0.0  ;;  %v481_v46 = vadd.f32 %v1553_v11, %v393_v13 }
  0x9a   : > { %v593_v0 = vpack.c.bf16 %v544_v1, %v528_v45  ;;  %v529_v5 = vmax.f32 %v465_v23, 0.0  ;;  %v516_v24 = vadd.f32 %v1491_v7, %v428_v20  ;;  %v518_v50 = vadd.f32 %v1491_v7, %v430_v26 }
  0x9b   : > { %v595_v18 = vpack.c.bf16 %v546_v40, %v530_v16  ;;  %v592_v17 = vpack.c.bf16 %v543_v39, %v527_v44  ;;  %v545_v30 = vmax.f32 %v481_v46, 0.0  ;;  %v1802_v27 = vunpack.c.l.bf16 %v1335_v25 }
  0x9c   : > { %642 = vmatprep.subr.bf16.mxu0 %v593_v0  ;;  %v580_v22 = vmax.f32 %v516_v24, 0.0  ;;  %v582_v29 = vmax.f32 %v518_v50, 0.0  ;;  %v1803_v32 = vunpack.c.l.bf16 %v1345_v31  ;;  %v1804_v26 = vunpack.c.h.bf16 %v1362_v42  ;;  %v1593_v31 = vld [vmem:[%s233_s20] sm:$0x3] }
  0x9d   : > { %v427_v28 = vmul.f32 %v1493_v58, %v1802_v27  ;;  %683 = vmatprep.subr.bf16.mxu1 %v595_v18  ;;  %643 = vmatpush1.bf16.msra.mxu0 %v592_v17  ;;  %v594_v14 = vpack.c.bf16 %v545_v30, %v529_v5  ;;  %v565_v25 = vmax.f32 %v1512_v57, 0.0  ;;  %v1805_v34 = vunpack.c.h.bf16 %v1365_v43 }
  0x9e   : > { %v429_v20 = vmul.f32 %v1493_v58, %v1803_v32  ;;  %v380_v13 = vmul.f32 %v1527_v21, %v1804_v26  ;;  %v613_v19 = vpack.c.bf16 %v580_v22, %v564_v12  ;;  %v615_v35 = vpack.c.bf16 %v582_v29, %v566_v59 }
  0x9f   : > { %v515_v33 = vadd.f32 %v1491_v7, %v427_v28  ;;  %v396_v15 = vmul.f32 %v1525_v9, %v1805_v34  ;;  %684 = vmatpush1.bf16.msra.mxu1 %v594_v14  ;;  %v1806_v40 = vunpack.c.h.bf16 %v1372_v48  ;;  %v1807_v44 = vunpack.c.h.bf16 %v1375_v49 }
  0xa0   : > { %v517_v45 = vadd.f32 %v1491_v7, %v429_v20  ;;  %v468_v1 = vadd.f32 %v1555_v10, %v380_v13  ;;  %722 = vmatprep.subr.bf16.mxu0 %v613_v19  ;;  %763 = vmatprep.subr.bf16.mxu1 %v615_v35  ;;  %v1808_v46 = vunpack.c.l.bf16 %v1362_v42  ;;  %v1809_v5 = vunpack.c.l.bf16 %v1365_v43 }
  0xa1   : > { %v579_v16 = vmax.f32 %v515_v33, 0.0  ;;  %v484_v23 = vadd.f32 %v1553_v11, %v396_v15  ;;  %v382_v57 = vmul.f32 %v1527_v21, %v1806_v40  ;;  %v398_v39 = vmul.f32 %v1525_v9, %v1807_v44  ;;  %1121 = vmatmul.mubr.msk.bf16.vlgmr.msra.gmra.mxu0 %vm624_vm0, %v1593_v31 }
  0xa2   : > { %v581_v12 = vmax.f32 %v517_v45, 0.0  ;;  %v532_v59 = vmax.f32 %v468_v1, 0.0  ;;  %v379_v0 = vmul.f32 %v1527_v21, %v1808_v46  ;;  %v395_v24 = vmul.f32 %v1525_v9, %v1809_v5  ;;  %1122 = vmatmul.mubr.msk.bf16.vlgmr.msra.gmra.mxu1 %vm624_vm0, %v1593_v31 }
  0xa3   : > { %v612_v50 = vpack.c.bf16 %v579_v16, %v563_v38  ;;  %v548_v18 = vmax.f32 %v484_v23, 0.0  ;;  %v470_v17 = vadd.f32 %v1555_v10, %v382_v57  ;;  %v486_v30 = vadd.f32 %v1553_v11, %v398_v39 }
  0xa4   : > { %v614_v27 = vpack.c.bf16 %v581_v12, %v565_v25  ;;  %v467_v42 = vadd.f32 %v1555_v10, %v379_v0  ;;  %v483_v28 = vadd.f32 %v1553_v11, %v395_v24  ;;  %v1810_v43 = vunpack.c.l.bf16 %v1372_v48 }
  0xa5   : > { %723 = vmatpush1.bf16.msra.mxu0 %v612_v50  ;;  %v597_v29 = vpack.c.bf16 %v548_v18, %v532_v59  ;;  %v534_v38 = vmax.f32 %v470_v17, 0.0  ;;  %v550_v32 = vmax.f32 %v486_v30, 0.0  ;;  %v1811_v20 = vunpack.c.l.bf16 %v1375_v49 }
  0xa6   : > { %v381_v22 = vmul.f32 %v1527_v21, %v1810_v43  ;;  %v1812_v13 = vmov 0   ;;  %764 = vmatpush1.bf16.msra.mxu1 %v614_v27  ;;  %v531_v14 = vmax.f32 %v467_v42, 0.0  ;;  %v547_v33 = vmax.f32 %v483_v28, 0.0 }
  0xa7   : > { %v397_v26 = vmul.f32 %v1525_v9, %v1811_v20  ;;  %742 = vmatprep.mubr.bf16.mxu0 %v1812_v13  ;;  %v1813_v34 = vunpack.c.h.bf16 %v1352_v36  ;;  %783 = vmatprep.mubr.bf16.mxu1 %v1812_v13  ;;  %v599_v15 = vpack.c.bf16 %v550_v32, %v534_v38  ;;  %v1814_v49 = vunpack.c.h.bf16 %v1355_v37 }
  0xa8   : > { %v469_v25 = vadd.f32 %v1555_v10, %v381_v22  ;;  %724 = vmatprep.subr.bf16.mxu0 %v597_v29  ;;  %v1815_v45 = vunpack.c.h.bf16 %v1382_v54  ;;  %v596_v16 = vpack.c.bf16 %v547_v33, %v531_v14  ;;  %v1816_v57 = vunpack.c.h.bf16 %v1385_v55 }
  0xa9   : > { %v416_v48 = vmul.f32 %v1457_v41, %v1813_v34  ;;  %v485_v19 = vadd.f32 %v1553_v11, %v397_v26  ;;  %v432_v35 = vmul.f32 %v1493_v58, %v1814_v49  ;;  %765 = vmatprep.subr.bf16.mxu1 %v599_v15  ;;  %v1817_v46 = vunpack.c.l.bf16 %v1352_v36 }
  0xaa   : > { %v418_v1 = vmul.f32 %v1457_v41, %v1815_v45  ;;  %v533_v23 = vmax.f32 %v469_v25, 0.0  ;;  %v434_v44 = vmul.f32 %v1493_v58, %v1816_v57  ;;  %725 = vmatpush1.bf16.msra.mxu0 %v596_v16  ;;  %v1818_v50 = vunpack.c.l.bf16 %v1355_v37 }
  0xab   : > { %v504_v40 = vadd.f32 %v1455_v47, %v416_v48  ;;  %v549_v39 = vmax.f32 %v485_v19, 0.0  ;;  %v520_v12 = vadd.f32 %v1491_v7, %v432_v35  ;;  %v415_v0 = vmul.f32 %v1457_v41, %v1817_v46 }
  0xac   : > { %v506_v59 = vadd.f32 %v1455_v47, %v418_v1  ;;  %v522_v24 = vadd.f32 %v1491_v7, %v434_v44  ;;  %v431_v18 = vmul.f32 %v1493_v58, %v1818_v50  ;;  %v1819_v17 = vunpack.c.l.bf16 %v1382_v54 }
  0xad   : > { %v568_v5 = vmax.f32 %v504_v40, 0.0  ;;  %v598_v27 = vpack.c.bf16 %v549_v39, %v533_v23  ;;  %v584_v42 = vmax.f32 %v520_v12, 0.0  ;;  %v503_v43 = vadd.f32 %v1455_v47, %v415_v0  ;;  %1123 = vmatmul.mubr.msk.bf16.vlgmr.msra.gmra.mxu0 %vm624_vm0, %v1593_v31 }
  0xae   : > { %v417_v30 = vmul.f32 %v1457_v41, %v1819_v17  ;;  %v570_v28 = vmax.f32 %v506_v59, 0.0  ;;  %v586_v36 = vmax.f32 %v522_v24, 0.0  ;;  %v519_v22 = vadd.f32 %v1491_v7, %v431_v18  ;;  %824 = vmatprep.mubr.bf16.mxu0 %v1812_v13 }
  0xaf   : > { %v1820_v29 = vunpack.c.l.bf16 %v1385_v55  ;;  %766 = vmatpush1.bf16.msra.mxu1 %v598_v27  ;;  %v617_v32 = vpack.c.bf16 %v584_v42, %v568_v5  ;;  %v567_v54 = vmax.f32 %v503_v43, 0.0  ;;  %v1821_v20 = vunpack.c.h.bf16 %v1402_v3 }
  0xb0   : > { %v505_v37 = vadd.f32 %v1455_v47, %v417_v30  ;;  %v1822_v14 = vunpack.c.h.bf16 %v1405_v4  ;;  %v619_v25 = vpack.c.bf16 %v586_v36, %v570_v28  ;;  %v583_v55 = vmax.f32 %v519_v22, 0.0 }
  0xb1   : > { %v433_v38 = vmul.f32 %v1493_v58, %v1820_v29  ;;  %v384_v26 = vmul.f32 %v1527_v21, %v1821_v20  ;;  %804 = vmatprep.subr.bf16.mxu0 %v617_v32  ;;  %v1823_v49 = vunpack.c.h.bf16 %v1412_v53  ;;  %v1824_v45 = vunpack.c.h.bf16 %v1415_v51 }
  0xb2   : > { %v400_v33 = vmul.f32 %v1525_v9, %v1822_v14  ;;  %v569_v48 = vmax.f32 %v505_v37, 0.0  ;;  %845 = vmatprep.subr.bf16.mxu1 %v619_v25  ;;  %1124 = vmatmul.mubr.msk.bf16.vlgmr.msra.gmra.mxu1 %vm624_vm0, %v1593_v31  ;;  %v616_v16 = vpack.c.bf16 %v583_v55, %v567_v54  ;;  %v1825_v40 = vunpack.c.l.bf16 %v1402_v3 }
  0xb3   : > { %v521_v34 = vadd.f32 %v1491_v7, %v433_v38  ;;  %v472_v15 = vadd.f32 %v1555_v10, %v384_v26  ;;  %v386_v35 = vmul.f32 %v1527_v21, %v1823_v49  ;;  %v402_v1 = vmul.f32 %v1525_v9, %v1824_v45  ;;  %865 = vmatprep.mubr.bf16.mxu1 %v1812_v13 }
  0xb4   : > { %v488_v19 = vadd.f32 %v1553_v11, %v400_v33  ;;  %v383_v57 = vmul.f32 %v1527_v21, %v1825_v40  ;;  %v1826_v44 = vunpack.c.l.bf16 %v1405_v4  ;;  %805 = vmatpush1.bf16.msra.mxu0 %v616_v16  ;;  %v1827_v50 = vunpack.c.l.bf16 %v1412_v53 }
  0xb5   : > { %v585_v23 = vmax.f32 %v521_v34, 0.0  ;;  %v536_v12 = vmax.f32 %v472_v15, 0.0  ;;  %v474_v46 = vadd.f32 %v1555_v10, %v386_v35  ;;  %v490_v0 = vadd.f32 %v1553_v11, %v402_v1 }
  0xb6   : > { %v399_v39 = vmul.f32 %v1525_v9, %v1826_v44  ;;  %v552_v59 = vmax.f32 %v488_v19, 0.0  ;;  %v471_v24 = vadd.f32 %v1555_v10, %v383_v57  ;;  %v385_v4 = vmul.f32 %v1527_v21, %v1827_v50 }
  0xb7   : > { %v618_v5 = vpack.c.bf16 %v585_v23, %v569_v48  ;;  %v538_v17 = vmax.f32 %v474_v46, 0.0  ;;  %v554_v30 = vmax.f32 %v490_v0, 0.0  ;;  %v1828_v27 = vunpack.c.l.bf16 %v1415_v51 }
  0xb8   : > { %v487_v3 = vadd.f32 %v1553_v11, %v399_v39  ;;  %v601_v18 = vpack.c.bf16 %v552_v59, %v536_v12  ;;  %v535_v28 = vmax.f32 %v471_v24, 0.0  ;;  %v473_v36 = vadd.f32 %v1555_v10, %v385_v4 }
  0xb9   : > { %v401_v42 = vmul.f32 %v1525_v9, %v1828_v27  ;;  %846 = vmatpush1.bf16.msra.mxu1 %v618_v5  ;;  %v1829_v22 = vunpack.c.h.bf16 %v1392_v60  ;;  %v603_v53 = vpack.c.bf16 %v554_v30, %v538_v17  ;;  %v1830_v37 = vunpack.c.h.bf16 %v1395_v61 }
  0xba   : > { %v551_v43 = vmax.f32 %v487_v3, 0.0  ;;  %806 = vmatprep.subr.bf16.mxu0 %v601_v18  ;;  %v1831_v51 = vunpack.c.h.bf16 %v1422_v6  ;;  %v537_v26 = vmax.f32 %v473_v36, 0.0  ;;  %v438_v33 = vmul.f32 %v1493_v58, %v350_v2 }
  0xbb   : > { %v420_v29 = vmul.f32 %v1457_v41, %v1829_v22  ;;  %v489_v38 = vadd.f32 %v1553_v11, %v401_v42  ;;  %v436_v32 = vmul.f32 %v1493_v58, %v1830_v37  ;;  %847 = vmatprep.subr.bf16.mxu1 %v603_v53  ;;  %v1832_v48 = vunpack.c.l.bf16 %v1392_v60 }
  0xbc   : > { %v422_v54 = vmul.f32 %v1457_v41, %v1831_v51  ;;  %v600_v20 = vpack.c.bf16 %v551_v43, %v535_v28  ;;  %v526_v49 = vadd.f32 %v1491_v7, %v438_v33  ;;  %v1833_v35 = vunpack.c.l.bf16 %v1395_v61 }
  0xbd   : > { %v508_v14 = vadd.f32 %v1455_v47, %v420_v29  ;;  %v553_v25 = vmax.f32 %v489_v38, 0.0  ;;  %v524_v55 = vadd.f32 %v1491_v7, %v436_v32  ;;  %v419_v15 = vmul.f32 %v1457_v41, %v1832_v48 }
  0xbe   : > { %v510_v34 = vadd.f32 %v1455_v47, %v422_v54  ;;  %807 = vmatpush1.bf16.msra.mxu0 %v600_v20  ;;  %v435_v45 = vmul.f32 %v1493_v58, %v1833_v35  ;;  %v1834_v2 = vunpack.c.l.bf16 %v1422_v6  ;;  %v590_v60 = vmax.f32 %v526_v49, 0.0 }
  0xbf   : > { %v572_v19 = vmax.f32 %v508_v14, 0.0  ;;  %v602_v16 = vpack.c.bf16 %v553_v25, %v537_v26  ;;  %v588_v23 = vmax.f32 %v524_v55, 0.0  ;;  %v507_v57 = vadd.f32 %v1455_v47, %v419_v15 }
  0xc0   : > { %v421_v1 = vmul.f32 %v1457_v41, %v1834_v2  ;;  %v574_v40 = vmax.f32 %v510_v34, 0.0  ;;  %v523_v44 = vadd.f32 %v1491_v7, %v435_v45  ;;  %v1835_v39 = vunpack.c.l.bf16 %v1425_v63 }
  0xc1   : > { %848 = vmatpush1.bf16.msra.mxu1 %v602_v16  ;;  %v621_v59 = vpack.c.bf16 %v588_v23, %v572_v19  ;;  %1125 = vmatmul.mubr.msk.bf16.vlgmr.msra.gmra.mxu0 %vm624_vm0, %v1593_v31  ;;  %v571_v41 = vmax.f32 %v507_v57, 0.0  ;;  %v1836_v6 = vunpack.c.h.bf16 %v1432_v56  ;;  %v1837_v0 = vunpack.c.h.bf16 %v1435_v52 }
  0xc2   : > { %v437_v12 = vmul.f32 %v1493_v58, %v1835_v39  ;;  %v509_v61 = vadd.f32 %v1455_v47, %v421_v1  ;;  %v623_v24 = vpack.c.bf16 %v590_v60, %v574_v40  ;;  %v587_v63 = vmax.f32 %v523_v44, 0.0  ;;  %906 = vmatprep.mubr.bf16.mxu0 %v1812_v13 }
  0xc3   : > { %v388_v46 = vmul.f32 %v1527_v21, %v1836_v6  ;;  %v404_v5 = vmul.f32 %v1525_v9, %v1837_v0  ;;  %886 = vmatprep.subr.bf16.mxu0 %v621_v59  ;;  %v1838_v4 = vunpack.c.h.bf16 %v1442_v62  ;;  %v1839_v17 = vunpack.c.h.bf16 %v1445_v8 }
  0xc4   : > { %v525_v58 = vadd.f32 %v1491_v7, %v437_v12  ;;  %v573_v3 = vmax.f32 %v509_v61, 0.0  ;;  %927 = vmatprep.subr.bf16.mxu1 %v623_v24  ;;  %1126 = vmatmul.mubr.msk.bf16.vlgmr.msra.gmra.mxu1 %vm624_vm0, %v1593_v31  ;;  %v620_v7 = vpack.c.bf16 %v587_v63, %v571_v41  ;;  %v1840_v42 = vunpack.c.l.bf16 %v1432_v56 }
  0xc5   : > { %v476_v47 = vadd.f32 %v1555_v10, %v388_v46  ;;  %v492_v50 = vadd.f32 %v1553_v11, %v404_v5  ;;  %v390_v18 = vmul.f32 %v1527_v21, %v1838_v4  ;;  %v406_v30 = vmul.f32 %v1525_v9, %v1839_v17  ;;  %947 = vmatprep.mubr.bf16.mxu1 %v1812_v13 }
  0xc6   : > { %v589_v27 = vmax.f32 %v525_v58, 0.0  ;;  %v387_v28 = vmul.f32 %v1527_v21, %v1840_v42  ;;  %v1841_v43 = vunpack.c.l.bf16 %v1435_v52  ;;  %887 = vmatpush1.bf16.msra.mxu0 %v620_v7  ;;  %v1842_v51 = vunpack.c.l.bf16 %v1442_v62 }
  0xc7   : > { %v540_v22 = vmax.f32 %v476_v47, 0.0  ;;  %v556_v29 = vmax.f32 %v492_v50, 0.0  ;;  %v478_v53 = vadd.f32 %v1555_v10, %v390_v18  ;;  %v494_v38 = vadd.f32 %v1553_v11, %v406_v30 }
  0xc8   : > { %v403_v36 = vmul.f32 %v1525_v9, %v1841_v43  ;;  %v622_v37 = vpack.c.bf16 %v589_v27, %v573_v3  ;;  %v475_v32 = vadd.f32 %v1555_v10, %v387_v28  ;;  %v389_v52 = vmul.f32 %v1527_v21, %v1842_v51 }
  0xc9   : > { %v605_v54 = vpack.c.bf16 %v556_v29, %v540_v22  ;;  %v542_v20 = vmax.f32 %v478_v53, 0.0  ;;  %v558_v26 = vmax.f32 %v494_v38, 0.0  ;;  %v1843_v14 = vunpack.c.l.bf16 %v1445_v8 }
  0xca   : > { %v491_v56 = vadd.f32 %v1553_v11, %v403_v36  ;;  %928 = vmatpush1.bf16.msra.mxu1 %v622_v37  ;;  %v539_v25 = vmax.f32 %v475_v32, 0.0  ;;  %v477_v55 = vadd.f32 %v1555_v10, %v389_v52 }
  0xcb   : > { %v405_v33 = vmul.f32 %v1525_v9, %v1843_v14  ;;  %888 = vmatprep.subr.bf16.mxu0 %v605_v54  ;;  %v607_v34 = vpack.c.bf16 %v558_v26, %v542_v20 }
  0xcc   : > { %v555_v13 = vmax.f32 %v491_v56, 0.0  ;;  %v541_v62 = vmax.f32 %v477_v55, 0.0 }
  0xcd   : > { %v493_v48 = vadd.f32 %v1553_v11, %v405_v33  ;;  %929 = vmatprep.subr.bf16.mxu1 %v607_v34 }
  0xce   : > { %v604_v15 = vpack.c.bf16 %v555_v13, %v539_v25 }
  0xcf   : > { %v557_v21 = vmax.f32 %v493_v48, 0.0 }
  0xd0   : > { %889 = vmatpush1.bf16.msra.mxu0 %v604_v15 }
  0xd1   : > { %v606_v19 = vpack.c.bf16 %v557_v21, %v541_v62 }
  0xd3   : > { %930 = vmatpush1.bf16.msra.mxu1 %v606_v19  ;;  %1127 = vmatmul.mubr.msk.bf16.vlgmr.msra.gmra.mxu0 %vm624_vm0, %v1593_v31 }
  0xd6   : > { %1128 = vmatmul.mubr.msk.bf16.vlgmr.msra.gmra.mxu1 %vm624_vm0, %v1593_v31 }
 0x161   : > { %v662_v8 = vpop.f32.mrf.mxu0 }
 0x162   : > { %1160 = vtanh.f32 %v662_v8  ;;  %v703_v9 = vpop.f32.mrf.mxu1 }
 0x163   : > { %1162 = vtanh.f32 %v703_v9  ;;  %v664_v10 = vpop.f32.mrf.mxu0 }
 0x164   : > { %1164 = vtanh.f32 %v664_v10  ;;  %v705_v11 = vpop.f32.mrf.mxu1 }
 0x165   : > { %1166 = vtanh.f32 %v705_v11  ;;  %v666_v49 = vpop.f32.mrf.mxu0 }
 0x166   : > { %v707_v35 = vpop.f32.mrf.mxu1 }
 0x167   : > { %v667_v45 = vpop.f32.mrf.mxu0 }
 0x168   : > { %v708_v2 = vpop.f32.mrf.mxu1 }
 0x16d   : > { %v744_v1 = vpop.f32.mrf.mxu0 }
 0x16e   : > { %1168 = vtanh.f32 %v744_v1 }
 0x16f   : > { %v746_v16 = vpop.f32.mrf.mxu0  ;;  %v1161_v31 = vpop.eup %1160 }
 0x170   : > { %1170 = vtanh.f32 %v746_v16  ;;  %v1163_v57 = vpop.eup %1162 }
 0x171   : > { %v748_v40 = vpop.f32.mrf.mxu0  ;;  %v1165_v44 = vpop.eup %1164 }
 0x172   : > { %v785_v23 = vpop.f32.mrf.mxu1  ;;  %v1167_v12 = vpop.eup %1166  ;;  %v988_v61 = vcombine.low %v1161_v31, %v1165_v44 }
 0x173   : > { %1172 = vtanh.f32 %v785_v23  ;;  %v749_v39 = vpop.f32.mrf.mxu0  ;;  %v989_v41 = vcombine.low %v1163_v57, %v1167_v12 }
 0x174   : > { %v787_v60 = vpop.f32.mrf.mxu1  ;;  %1004 = vst [vmem:[%s1776_s24] sm:$0x77] %v988_v61 }
 0x175   : > { %1174 = vtanh.f32 %v787_v60  ;;  %1005 = vst [vmem:[%s1776_s24 + $0x8] sm:$0x77] %v989_v41 }
 0x176   : > { %v789_v59 = vpop.f32.mrf.mxu1 }
 0x178   : > { %v790_v6 = vpop.f32.mrf.mxu1 }
 0x17b   : > { %v1169_v0 = vpop.eup %1168 }
 0x17d   : > { %v1171_v5 = vpop.eup %1170 }
 0x17e   : > { %v990_v63 = vcombine.low %v1169_v0, %v1171_v5 }
 0x180   : > { %v1173_v3 = vpop.eup %1172  ;;  %1006 = vst [vmem:[%s1776_s24 + $0x10] sm:$0x77] %v990_v63 }
 0x181   : > { %v826_v46 = vpop.f32.mrf.mxu0 }
 0x182   : > { %1176 = vtanh.f32 %v826_v46  ;;  %v1175_v50 = vpop.eup %1174 }
 0x183   : > { %v828_v24 = vpop.f32.mrf.mxu0  ;;  %v991_v18 = vcombine.low %v1173_v3, %v1175_v50 }
 0x184   : > { %v867_v58 = vpop.f32.mrf.mxu1  ;;  %1178 = vtanh.f32 %v828_v24 }
 0x185   : > { %v830_v47 = vpop.f32.mrf.mxu0  ;;  %1180 = vtanh.f32 %v867_v58  ;;  %1007 = vst [vmem:[%s1776_s24 + $0x18] sm:$0x77] %v991_v18 }
 0x186   : > { %v869_v4 = vpop.f32.mrf.mxu1 }
 0x187   : > { %1182 = vtanh.f32 %v869_v4  ;;  %v831_v17 = vpop.f32.mrf.mxu0 }
 0x188   : > { %v871_v30 = vpop.f32.mrf.mxu1 }
 0x18a   : > { %v872_v7 = vpop.f32.mrf.mxu1 }
 0x18f   : > { %v1177_v42 = vpop.eup %1176 }
 0x191   : > { %v1179_v28 = vpop.eup %1178 }
 0x192   : > { %v992_v36 = vcombine.low %v1177_v42, %v1179_v28  ;;  %v1181_v29 = vpop.eup %1180 }
 0x193   : > { %v908_v27 = vpop.f32.mrf.mxu0 }
 0x194   : > { %1184 = vtanh.f32 %v908_v27  ;;  %v1183_v38 = vpop.eup %1182  ;;  %1008 = vst [vmem:[%s1776_s24 + $0x20] sm:$0x77] %v992_v36 }
 0x195   : > { %v910_v43 = vpop.f32.mrf.mxu0  ;;  %v993_v32 = vcombine.low %v1181_v29, %v1183_v38 }
 0x196   : > { %v949_v22 = vpop.f32.mrf.mxu1  ;;  %1186 = vtanh.f32 %v910_v43 }
 0x197   : > { %v912_v53 = vpop.f32.mrf.mxu0  ;;  %1188 = vtanh.f32 %v949_v22  ;;  %1009 = vst [vmem:[%s1776_s24 + $0x28] sm:$0x77] %v993_v32 }
 0x198   : > { %v951_v37 = vpop.f32.mrf.mxu1 }
 0x199   : > { %1190 = vtanh.f32 %v951_v37  ;;  %v913_v56 = vpop.f32.mrf.mxu0 }
 0x19a   : > { %v953_v51 = vpop.f32.mrf.mxu1 }
 0x19c   : > { %v954_v52 = vpop.f32.mrf.mxu1 }
 0x1a1   : > { %v1185_v54 = vpop.eup %1184 }
 0x1a3   : > { %v1187_v20 = vpop.eup %1186 }
 0x1a4   : > { %v994_v26 = vcombine.low %v1185_v54, %v1187_v20  ;;  %v1189_v14 = vpop.eup %1188 }
 0x1a6   : > { %v1191_v33 = vpop.eup %1190  ;;  %1010 = vst [vmem:[%s1776_s24 + $0x30] sm:$0x77] %v994_v26 }
 0x1a7   : > { %v995_v25 = vcombine.low %v1189_v14, %v1191_v33 }
 0x1a9   : > { %1011 = vst [vmem:[%s1776_s24 + $0x38] sm:$0x77] %v995_v25 }
 0x1aa PF: > { %s14_s17 = sadd.s32 1, %s1214_s17   ;;  %s1844_s15 = smov %s1210_s16 }
 0x1ab   : > { %p11_p5 = scmp.ge.s32.totalorder %s14_s17, 6   ;;  %s1845_s16 = smov %s1847_s18 }
 0x1ad   :  { %13 = sbr.rel (!%p11_p5) target bundleno = 2 (0x2), region = 69 }

</bundles_post_ra>
